<compile_context>
chip_gen: v5e
topology: v5e:2x2
jax: 0.10.0
libtpu: 0.0.40
codegen_flags: <defaults>
</compile_context>

<pallas_src>
import numpy as np
import jax
import jax.numpy as jnp
from jax.experimental import pallas as pl
from jax.experimental.pallas import tpu as pltpu

EPS = 1e-5

# name, KH, KW  (fixed SegNextBlock topology)
LAYERS = (
    ("depth_ini",   1,  1),
    ("conv_square", 5,  5),
    ("conv1a",      1,  7),
    ("conv1b",      7,  1),
    ("conv2a",      1, 11),
    ("conv2b",     11,  1),
    ("conv3a",      1, 21),
    ("conv3b",     21,  1),
    ("depthwise",   1,  1),
)


def _densify(w, groups):
    """Grouped (Cout, Cin//groups, KH, KW) weight -> dense (Cout, Cin, KH, KW).

    Works for any group count (PyTorch/XLA contiguous-group convention)."""
    w = np.asarray(w, np.float32)
    cout, cin_g, kh, kw = w.shape
    if groups == 1:
        return w
    cin = cin_g * groups
    cpg_out = cout // groups
    wd = np.zeros((cout, cin, kh, kw), np.float32)
    for co in range(cout):
        g = co // cpg_out
        wd[co, g * cin_g:(g + 1) * cin_g] = w[co]
    return wd


# -----------------------------------------------------------------------------
# Fused Pallas implementation
# -----------------------------------------------------------------------------
def segnext_block_pallas(image_nchw, params, *, batch_tile=1):
    N, Cin, H, W = map(int, image_nchw.shape)
    C = int(params["depth_ini"]["w"].shape[0])
    M = H * W
    bt = int(batch_tile)
    assert N % bt == 0, "batch_tile must divide the batch size"
    Mt = bt * M                              # lane width per grid step
    Cin_pad = -(-Cin // 8) * 8               # MXU contraction dims multiple of 8

    # ---- fold BN into dense weights, pack all layers into one (C, L) slab ----
    n_layers = len(LAYERS)
    w_blocks, w_off, cins = [], [], []
    bias_list = []
    lane_off = 0
    for li, (name, KH, KW) in enumerate(LAYERS):
        p = params[name]
        groups = int(p.get("groups", 1))
        scale = np.asarray(p["scale"], np.float32)
        wd = _densify(p["w"], groups) * scale[:, None, None, None]
        cin = int(wd.shape[1])
        if li == 0 and cin < Cin_pad:        # zero-pad the image-channel axis
            wd = np.pad(wd, ((0, 0), (0, Cin_pad - cin), (0, 0), (0, 0)))
            cin = Cin_pad
        K = KH * KW * cin
        # im2col row order is t*cin + ci with t = kh*KW + kw
        blk = np.transpose(wd, (0, 2, 3, 1)).reshape(C, K)
        pad = (-K) % 128                     # keep every block 128-lane aligned
        w_blocks.append(np.pad(blk, ((0, 0), (0, pad))))
        w_off.append(lane_off)
        lane_off += K + pad
        cins.append(cin)
        bias_list.append(np.asarray(p["bias"], np.float32))
    w_pack = np.concatenate(w_blocks, axis=1)                      # (C, Wlanes)

    # per-layer bias, pre-broadcast to (C, Mt): no in-kernel sublane broadcasts
    bias_slab = np.stack([np.broadcast_to(b[:, None], (C, Mt)).copy()
                          for b in bias_list])                     # (L, C, Mt)

    # ---- combined (dh, dw) 'same'-padding validity masks, pre-broadcast ------
    row = np.arange(M, dtype=np.int32) // W
    col = np.arange(M, dtype=np.int32) % W
    mask_idx, mask_rows = {}, []
    for (_name, KH, KW) in LAYERS:
        ph, pw = (KH - 1) // 2, (KW - 1) // 2
        for kh in range(KH):
            for kw in range(KW):
                dh, dw = kh - ph, kw - pw
                if (dh, dw) == (0, 0) or (dh, dw) in mask_idx:
                    continue
                m = ((row + dh >= 0) & (row + dh < H)
                     & (col + dw >= 0) & (col + dw < W)).astype(np.float32)
                m = np.tile(m, bt)           # also blocks cross-image leakage
                mask_idx[(dh, dw)] = len(mask_rows)
                mask_rows.append(np.broadcast_to(m[None, :], (C, Mt)).copy())
    mask_slab = np.stack(mask_rows)                                # (n_masks, C, Mt)
    n_masks = int(mask_slab.shape[0])

    max_rows = max(KH * KW * cins[li]
                   for li, (_n, KH, KW) in enumerate(LAYERS) if KH * KW > 1)

    # -------------------------------------------------------------------------
    def kernel(img_ref, w_ref, b_ref, m_ref, o_ref, col_ref):
        def cbr(x, li):
            """ConvBNReLU as im2col (VMEM scratch) + one MXU matmul."""
            _name, KH, KW = LAYERS[li]
            cin = cins[li]
            K = KH * KW * cin
            wmat = w_ref[:, w_off[li]:w_off[li] + K]               # (C, K)
            if KH == 1 and KW == 1:
                rows = x                                           # (cin, Mt)
            else:
                ph, pw = (KH - 1) // 2, (KW - 1) // 2
                s = ph * W + pw
                z = jnp.zeros((cin, s), jnp.float32)
                xe = jnp.concatenate([z, x, z], axis=1)            # (cin, Mt+2s)
                for kh in range(KH):
                    for kw in range(KW):
                        dh, dw = kh - ph, kw - pw
                        d = dh * W + dw
                        sl = xe[:, s + d:s + d + Mt]
                        if (dh, dw) != (0, 0):
                            sl = sl * m_ref[mask_idx[(dh, dw)]]
                        t = kh * KW + kw
                        col_ref[t * cin:(t + 1) * cin, :] = sl
                rows = col_ref[0:K, :]
            y = jnp.dot(wmat, rows, preferred_element_type=jnp.float32)
            return jnp.maximum(y + b_ref[li], 0.0)

        x0 = img_ref[0]                                            # (Cin_pad, Mt)
        img = cbr(x0, 0)                                           # depth_ini
        xs = cbr(img, 1)                                           # conv_square
        c1 = cbr(cbr(xs, 2), 3)                                    # conv1
        c2 = cbr(cbr(xs, 4), 5)                                    # conv2
        c3 = cbr(cbr(xs, 6), 7)                                    # conv3
        attn = cbr(c1 + c2 + c3, 8)                                # depthwise
        o_ref[0] = (attn * img).astype(o_ref.dtype)

    # ---- input: pad channels, stack `bt` images along the lane axis ----------
    x = image_nchw.astype(jnp.float32).reshape(N, Cin, M)
    if Cin_pad > Cin:
        x = jnp.pad(x, ((0, 0), (0, Cin_pad - Cin), (0, 0)))
    x = (x.reshape(N // bt, bt, Cin_pad, M)
          .transpose(0, 2, 1, 3).reshape(N // bt, Cin_pad, Mt))

    out = pl.pallas_call(
        kernel,
        out_shape=jax.ShapeDtypeStruct((N // bt, C, Mt), jnp.float32),
        grid_spec=pltpu.PrefetchScalarGridSpec(
            num_scalar_prefetch=0,
            grid=(N // bt,),
            in_specs=[
                pl.BlockSpec((1, Cin_pad, Mt), lambda n: (n, 0, 0)),   # image
                pl.BlockSpec((C, int(w_pack.shape[1])), lambda n: (0, 0)),  # weights
                pl.BlockSpec((n_layers, C, Mt), lambda n: (0, 0, 0)),  # biases
                pl.BlockSpec((n_masks, C, Mt), lambda n: (0, 0, 0)),   # pad masks
            ],
            out_specs=pl.BlockSpec((1, C, Mt), lambda n: (n, 0, 0)),   # lane-dense
            scratch_shapes=[pltpu.VMEM((max_rows, Mt), jnp.float32)],  # im2col
        ),
        compiler_params=pltpu.CompilerParams(dimension_semantics=("parallel",)),
    )(x, jnp.asarray(w_pack), jnp.asarray(bias_slab), jnp.asarray(mask_slab))

    out = (out.reshape(N // bt, C, bt, M)
              .transpose(0, 2, 1, 3).reshape(N, C, H, W))
    return out


# -----------------------------------------------------------------------------
# Parameters (deterministic synthetic init, inference-mode BN folded in kernel)
# -----------------------------------------------------------------------------
def make_cbr(key, cin, cout, kh, kw, groups=1):
    ks = jax.random.split(key, 5)
    w = jax.random.normal(ks[0], (cout, cin // groups, kh, kw), jnp.float32) * 0.15
    gamma = jax.random.uniform(ks[1], (cout,), jnp.float32, 0.5, 1.5)
    beta = jax.random.normal(ks[2], (cout,), jnp.float32) * 0.1
    mean = jax.random.normal(ks[3], (cout,), jnp.float32) * 0.1
    var = jax.random.uniform(ks[4], (cout,), jnp.float32, 0.5, 1.5)
    scale = gamma / jnp.sqrt(var + EPS)
    bias = beta - mean * scale
    return dict(w=w, scale=scale, bias=bias, groups=groups)


# -----------------------------------------------------------------------------
# Pure-JAX reference (correctness check)
# -----------------------------------------------------------------------------
def conv_bn_relu_ref(x, w, scale, bias, groups, pad):
    y = jax.lax.conv_general_dilated(
        x, w, (1, 1), ((pad[0], pad[0]), (pad[1], pad[1])),
        dimension_numbers=("NCHW", "OIHW", "NCHW"),
        feature_group_count=groups,
        precision=jax.lax.Precision.HIGHEST)
    return jnp.maximum(y * scale[None, :, None, None] + bias[None, :, None, None], 0.0)


def segnext_block_ref(image, p):
    img = conv_bn_relu_ref(image, **p["depth_ini"], pad=(0, 0))
    xs = conv_bn_relu_ref(img, **p["conv_square"], pad=(2, 2))
    c1 = conv_bn_relu_ref(conv_bn_relu_ref(xs, **p["conv1a"], pad=(0, 3)),
                          **p["conv1b"], pad=(3, 0))
    c2 = conv_bn_relu_ref(conv_bn_relu_ref(xs, **p["conv2a"], pad=(0, 5)),
                          **p["conv2b"], pad=(5, 0))
    c3 = conv_bn_relu_ref(conv_bn_relu_ref(xs, **p["conv3a"], pad=(0, 10)),
                          **p["conv3b"], pad=(10, 0))
    attn = conv_bn_relu_ref(c1 + c2 + c3, **p["depthwise"], pad=(0, 0))
    return attn * img


# -----------------------------------------------------------------------------
if __name__ == "__main__":
    key = jax.random.PRNGKey(0)
    N, Cin, Cout, H, W = 2, 4, 8, 16, 16
    k_img, k_p = jax.random.split(key)
    image = jax.random.normal(k_img, (N, Cin, H, W), jnp.float32)  # NCHW like PyTorch

    keys = jax.random.split(k_p, 9)
    G = Cout // 2
    params = {
        "depth_ini":   make_cbr(keys[0], Cin, Cout, 1, 1),
        "conv_square": make_cbr(keys[1], Cout, Cout, 5, 5),
        "conv1a": make_cbr(keys[2], Cout, Cout, 1, 7, G),
        "conv1b": make_cbr(keys[3], Cout, Cout, 7, 1, G),
        "conv2a": make_cbr(keys[4], Cout, Cout, 1, 11, G),
        "conv2b": make_cbr(keys[5], Cout, Cout, 11, 1, G),
        "conv3a": make_cbr(keys[6], Cout, Cout, 1, 21, G),
        "conv3b": make_cbr(keys[7], Cout, Cout, 21, 1, G),
        "depthwise": make_cbr(keys[8], Cout, Cout, 1, 1),
    }

    out = segnext_block_pallas(image, params, batch_tile=1)
    out = jax.block_until_ready(out)

    ref = segnext_block_ref(image, params)
    assert out.shape == (N, Cout, H, W)
    err = float(jnp.max(jnp.abs(out - ref)))
    assert jnp.allclose(out, ref, atol=1e-2, rtol=1e-2), err
    print("KERNEL_OK")
</pallas_src>

<mosaic_0001>
module attributes {stable_mosaic.version = 11 : i64} {
  func.func @kernel(%arg0: i32, %arg1: memref<1x8x256xf32, #tpu.memory_space<vmem>>, %arg2: memref<8x1536xf32, #tpu.memory_space<vmem>>, %arg3: memref<9x8x256xf32, #tpu.memory_space<vmem>>, %arg4: memref<56x8x256xf32, #tpu.memory_space<vmem>>, %arg5: memref<1x8x256xf32, #tpu.memory_space<vmem>>, %arg6: memref<200x256xf32, #tpu.memory_space<vmem>>) attributes {dimension_semantics = [#tpu.dimension_semantics<parallel>], iteration_bounds = array<i64: 2>, scalar_prefetch = 0 : i64, scratch_operands = 1 : i64, tpu.core_type = #tpu.core_type<tc>, window_params = [{transform_indices = @transform_0, window_bounds = array<i64: 1, 8, 256>}, {pipeline_mode = #tpu.pipeline_mode<synchronous>, transform_indices = @transform_1, window_bounds = array<i64: 8, 1536>}, {pipeline_mode = #tpu.pipeline_mode<synchronous>, transform_indices = @transform_2, window_bounds = array<i64: 9, 8, 256>}, {pipeline_mode = #tpu.pipeline_mode<synchronous>, transform_indices = @transform_3, window_bounds = array<i64: 56, 8, 256>}, {transform_indices = @transform_4, window_bounds = array<i64: 1, 8, 256>}]} {
    %c0 = arith.constant 0 : index
    %c0_0 = arith.constant 0 : index
    %c0_1 = arith.constant 0 : index
    %0 = vector.load %arg1[%c0, %c0_0, %c0_1] : memref<1x8x256xf32, #tpu.memory_space<vmem>>, vector<1x8x256xf32>
    %1 = vector.shape_cast %0 : vector<1x8x256xf32> to vector<8x256xf32>
    %c0_2 = arith.constant 0 : index
    %c0_3 = arith.constant 0 : index
    %2 = vector.load %arg2[%c0_2, %c0_3] : memref<8x1536xf32, #tpu.memory_space<vmem>>, vector<8x8xf32>
    %cst = arith.constant dense<0.000000e+00> : vector<8x256xf32>
    %3 = tpu.matmul %2, %1, %cst {dimension_numbers = #tpu.dot_dimension_numbers<[1], [0], [0], [1], [0, 0, 1, 1], [], []>} : vector<8x8xf32>, vector<8x256xf32>, vector<8x256xf32> -> vector<8x256xf32>
    %c0_4 = arith.constant 0 : index
    %c0_5 = arith.constant 0 : index
    %c0_6 = arith.constant 0 : index
    %4 = vector.load %arg3[%c0_4, %c0_5, %c0_6] : memref<9x8x256xf32, #tpu.memory_space<vmem>>, vector<1x8x256xf32>
    %5 = vector.shape_cast %4 : vector<1x8x256xf32> to vector<8x256xf32>
    %6 = arith.addf %3, %5 : vector<8x256xf32>
    %cst_7 = arith.constant 0.000000e+00 : f32
    %7 = vector.broadcast %cst_7 : f32 to vector<8x256xf32>
    %8 = arith.maximumf %6, %7 : vector<8x256xf32>
    %c0_8 = arith.constant 0 : index
    %c128 = arith.constant 128 : index
    %9 = vector.load %arg2[%c0_8, %c128] : memref<8x1536xf32, #tpu.memory_space<vmem>>, vector<8x200xf32>
    %cst_9 = arith.constant 0.000000e+00 : f32
    %10 = vector.broadcast %cst_9 : f32 to vector<8x34xf32>
    %11 = tpu.concatenate %10, %8, %10 in 1 : vector<8x34xf32>, vector<8x256xf32>, vector<8x34xf32> -> vector<8x324xf32>
    %12 = vector.extract_strided_slice %11 {offsets = [0, 0], sizes = [8, 256], strides = [1, 1]} : vector<8x324xf32> to vector<8x256xf32>
    %c0_10 = arith.constant 0 : index
    %c0_11 = arith.constant 0 : index
    %c0_12 = arith.constant 0 : index
    %13 = vector.load %arg4[%c0_10, %c0_11, %c0_12] : memref<56x8x256xf32, #tpu.memory_space<vmem>>, vector<1x8x256xf32>
    %14 = vector.shape_cast %13 : vector<1x8x256xf32> to vector<8x256xf32>
    %15 = arith.mulf %12, %14 : vector<8x256xf32>
    %c0_13 = arith.constant 0 : index
    %c0_14 = arith.constant 0 : index
    %16 = vector.load %arg6[%c0_13, %c0_14] : memref<200x256xf32, #tpu.memory_space<vmem>>, vector<8x256xf32>
    tpu.vector_store %arg6[%c0_13, %c0_14], %15 {strides = array<i32>} : memref<200x256xf32, #tpu.memory_space<vmem>>, vector<8x256xf32>,
    %17 = vector.extract_strided_slice %11 {offsets = [0, 1], sizes = [8, 256], strides = [1, 1]} : vector<8x324xf32> to vector<8x256xf32>
    %c1 = arith.constant 1 : index
    %c0_15 = arith.constant 0 : index
    %c0_16 = arith.constant 0 : index
    %18 = vector.load %arg4[%c1, %c0_15, %c0_16] : memref<56x8x256xf32, #tpu.memory_space<vmem>>, vector<1x8x256xf32>
    %19 = vector.shape_cast %18 : vector<1x8x256xf32> to vector<8x256xf32>
    %20 = arith.mulf %17, %19 : vector<8x256xf32>
    %c8 = arith.constant 8 : index
    %c0_17 = arith.constant 0 : index
    %21 = vector.load %arg6[%c8, %c0_17] : memref<200x256xf32, #tpu.memory_space<vmem>>, vector<8x256xf32>
    tpu.vector_store %arg6[%c8, %c0_17], %20 {strides = array<i32>} : memref<200x256xf32, #tpu.memory_space<vmem>>, vector<8x256xf32>,
    %22 = vector.extract_strided_slice %11 {offsets = [0, 2], sizes = [8, 256], strides = [1, 1]} : vector<8x324xf32> to vector<8x256xf32>
    %c2 = arith.constant 2 : index
    %c0_18 = arith.constant 0 : index
    %c0_19 = arith.constant 0 : index
    %23 = vector.load %arg4[%c2, %c0_18, %c0_19] : memref<56x8x256xf32, #tpu.memory_space<vmem>>, vector<1x8x256xf32>
    %24 = vector.shape_cast %23 : vector<1x8x256xf32> to vector<8x256xf32>
    %25 = arith.mulf %22, %24 : vector<8x256xf32>
    %c16 = arith.constant 16 : index
    %c0_20 = arith.constant 0 : index
    %26 = vector.load %arg6[%c16, %c0_20] : memref<200x256xf32, #tpu.memory_space<vmem>>, vector<8x256xf32>
    tpu.vector_store %arg6[%c16, %c0_20], %25 {strides = array<i32>} : memref<200x256xf32, #tpu.memory_space<vmem>>, vector<8x256xf32>,
    %27 = vector.extract_strided_slice %11 {offsets = [0, 3], sizes = [8, 256], strides = [1, 1]} : vector<8x324xf32> to vector<8x256xf32>
    %c3 = arith.constant 3 : index
    %c0_21 = arith.constant 0 : index
    %c0_22 = arith.constant 0 : index
    %28 = vector.load %arg4[%c3, %c0_21, %c0_22] : memref<56x8x256xf32, #tpu.memory_space<vmem>>, vector<1x8x256xf32>
    %29 = vector.shape_cast %28 : vector<1x8x256xf32> to vector<8x256xf32>
    %30 = arith.mulf %27, %29 : vector<8x256xf32>
    %c24 = arith.constant 24 : index
    %c0_23 = arith.constant 0 : index
    %31 = vector.load %arg6[%c24, %c0_23] : memref<200x256xf32, #tpu.memory_space<vmem>>, vector<8x256xf32>
    tpu.vector_store %arg6[%c24, %c0_23], %30 {strides = array<i32>} : memref<200x256xf32, #tpu.memory_space<vmem>>, vector<8x256xf32>,
    %32 = vector.extract_strided_slice %11 {offsets = [0, 4], sizes = [8, 256], strides = [1, 1]} : vector<8x324xf32> to vector<8x256xf32>
    %c4 = arith.constant 4 : index
    %c0_24 = arith.constant 0 : index
    %c0_25 = arith.constant 0 : index
    %33 = vector.load %arg4[%c4, %c0_24, %c0_25] : memref<56x8x256xf32, #tpu.memory_space<vmem>>, vector<1x8x256xf32>
    %34 = vector.shape_cast %33 : vector<1x8x256xf32> to vector<8x256xf32>
    %35 = arith.mulf %32, %34 : vector<8x256xf32>
    %c32 = arith.constant 32 : index
    %c0_26 = arith.constant 0 : index
    %36 = vector.load %arg6[%c32, %c0_26] : memref<200x256xf32, #tpu.memory_space<vmem>>, vector<8x256xf32>
    tpu.vector_store %arg6[%c32, %c0_26], %35 {strides = array<i32>} : memref<200x256xf32, #tpu.memory_space<vmem>>, vector<8x256xf32>,
    %37 = vector.extract_strided_slice %11 {offsets = [0, 16], sizes = [8, 256], strides = [1, 1]} : vector<8x324xf32> to vector<8x256xf32>
    %c5 = arith.constant 5 : index
    %c0_27 = arith.constant 0 : index
    %c0_28 = arith.constant 0 : index
    %38 = vector.load %arg4[%c5, %c0_27, %c0_28] : memref<56x8x256xf32, #tpu.memory_space<vmem>>, vector<1x8x256xf32>
    %39 = vector.shape_cast %38 : vector<1x8x256xf32> to vector<8x256xf32>
    %40 = arith.mulf %37, %39 : vector<8x256xf32>
    %c40 = arith.constant 40 : index
    %c0_29 = arith.constant 0 : index
    %41 = vector.load %arg6[%c40, %c0_29] : memref<200x256xf32, #tpu.memory_space<vmem>>, vector<8x256xf32>
    tpu.vector_store %arg6[%c40, %c0_29], %40 {strides = array<i32>} : memref<200x256xf32, #tpu.memory_space<vmem>>, vector<8x256xf32>,
    %42 = vector.extract_strided_slice %11 {offsets = [0, 17], sizes = [8, 256], strides = [1, 1]} : vector<8x324xf32> to vector<8x256xf32>
    %c6 = arith.constant 6 : index
    %c0_30 = arith.constant 0 : index
    %c0_31 = arith.constant 0 : index
    %43 = vector.load %arg4[%c6, %c0_30, %c0_31] : memref<56x8x256xf32, #tpu.memory_space<vmem>>, vector<1x8x256xf32>
    %44 = vector.shape_cast %43 : vector<1x8x256xf32> to vector<8x256xf32>
    %45 = arith.mulf %42, %44 : vector<8x256xf32>
    %c48 = arith.constant 48 : index
    %c0_32 = arith.constant 0 : index
    %46 = vector.load %arg6[%c48, %c0_32] : memref<200x256xf32, #tpu.memory_space<vmem>>, vector<8x256xf32>
    tpu.vector_store %arg6[%c48, %c0_32], %45 {strides = array<i32>} : memref<200x256xf32, #tpu.memory_space<vmem>>, vector<8x256xf32>,
    %47 = vector.extract_strided_slice %11 {offsets = [0, 18], sizes = [8, 256], strides = [1, 1]} : vector<8x324xf32> to vector<8x256xf32>
    %c7 = arith.constant 7 : index
    %c0_33 = arith.constant 0 : index
    %c0_34 = arith.constant 0 : index
    %48 = vector.load %arg4[%c7, %c0_33, %c0_34] : memref<56x8x256xf32, #tpu.memory_space<vmem>>, vector<1x8x256xf32>
    %49 = vector.shape_cast %48 : vector<1x8x256xf32> to vector<8x256xf32>
    %50 = arith.mulf %47, %49 : vector<8x256xf32>
    %c56 = arith.constant 56 : index
    %c0_35 = arith.constant 0 : index
    %51 = vector.load %arg6[%c56, %c0_35] : memref<200x256xf32, #tpu.memory_space<vmem>>, vector<8x256xf32>
    tpu.vector_store %arg6[%c56, %c0_35], %50 {strides = array<i32>} : memref<200x256xf32, #tpu.memory_space<vmem>>, vector<8x256xf32>,
    %52 = vector.extract_strided_slice %11 {offsets = [0, 19], sizes = [8, 256], strides = [1, 1]} : vector<8x324xf32> to vector<8x256xf32>
    %c8_36 = arith.constant 8 : index
    %c0_37 = arith.constant 0 : index
    %c0_38 = arith.constant 0 : index
    %53 = vector.load %arg4[%c8_36, %c0_37, %c0_38] : memref<56x8x256xf32, #tpu.memory_space<vmem>>, vector<1x8x256xf32>
    %54 = vector.shape_cast %53 : vector<1x8x256xf32> to vector<8x256xf32>
    %55 = arith.mulf %52, %54 : vector<8x256xf32>
    %c64 = arith.constant 64 : index
    %c0_39 = arith.constant 0 : index
    %56 = vector.load %arg6[%c64, %c0_39] : memref<200x256xf32, #tpu.memory_space<vmem>>, vector<8x256xf32>
    tpu.vector_store %arg6[%c64, %c0_39], %55 {strides = array<i32>} : memref<200x256xf32, #tpu.memory_space<vmem>>, vector<8x256xf32>,
    %57 = vector.extract_strided_slice %11 {offsets = [0, 20], sizes = [8, 256], strides = [1, 1]} : vector<8x324xf32> to vector<8x256xf32>
    %c9 = arith.constant 9 : index
    %c0_40 = arith.constant 0 : index
    %c0_41 = arith.constant 0 : index
    %58 = vector.load %arg4[%c9, %c0_40, %c0_41] : memref<56x8x256xf32, #tpu.memory_space<vmem>>, vector<1x8x256xf32>
    %59 = vector.shape_cast %58 : vector<1x8x256xf32> to vector<8x256xf32>
    %60 = arith.mulf %57, %59 : vector<8x256xf32>
    %c72 = arith.constant 72 : index
    %c0_42 = arith.constant 0 : index
    %61 = vector.load %arg6[%c72, %c0_42] : memref<200x256xf32, #tpu.memory_space<vmem>>, vector<8x256xf32>
    tpu.vector_store %arg6[%c72, %c0_42], %60 {strides = array<i32>} : memref<200x256xf32, #tpu.memory_space<vmem>>, vector<8x256xf32>,
    %62 = vector.extract_strided_slice %11 {offsets = [0, 32], sizes = [8, 256], strides = [1, 1]} : vector<8x324xf32> to vector<8x256xf32>
    %c10 = arith.constant 10 : index
    %c0_43 = arith.constant 0 : index
    %c0_44 = arith.constant 0 : index
    %63 = vector.load %arg4[%c10, %c0_43, %c0_44] : memref<56x8x256xf32, #tpu.memory_space<vmem>>, vector<1x8x256xf32>
    %64 = vector.shape_cast %63 : vector<1x8x256xf32> to vector<8x256xf32>
    %65 = arith.mulf %62, %64 : vector<8x256xf32>
    %c80 = arith.constant 80 : index
    %c0_45 = arith.constant 0 : index
    %66 = vector.load %arg6[%c80, %c0_45] : memref<200x256xf32, #tpu.memory_space<vmem>>, vector<8x256xf32>
    tpu.vector_store %arg6[%c80, %c0_45], %65 {strides = array<i32>} : memref<200x256xf32, #tpu.memory_space<vmem>>, vector<8x256xf32>,
    %67 = vector.extract_strided_slice %11 {offsets = [0, 33], sizes = [8, 256], strides = [1, 1]} : vector<8x324xf32> to vector<8x256xf32>
    %c11 = arith.constant 11 : index
    %c0_46 = arith.constant 0 : index
    %c0_47 = arith.constant 0 : index
    %68 = vector.load %arg4[%c11, %c0_46, %c0_47] : memref<56x8x256xf32, #tpu.memory_space<vmem>>, vector<1x8x256xf32>
    %69 = vector.shape_cast %68 : vector<1x8x256xf32> to vector<8x256xf32>
    %70 = arith.mulf %67, %69 : vector<8x256xf32>
    %c88 = arith.constant 88 : index
    %c0_48 = arith.constant 0 : index
    %71 = vector.load %arg6[%c88, %c0_48] : memref<200x256xf32, #tpu.memory_space<vmem>>, vector<8x256xf32>
    tpu.vector_store %arg6[%c88, %c0_48], %70 {strides = array<i32>} : memref<200x256xf32, #tpu.memory_space<vmem>>, vector<8x256xf32>,
    %72 = vector.extract_strided_slice %11 {offsets = [0, 34], sizes = [8, 256], strides = [1, 1]} : vector<8x324xf32> to vector<8x256xf32>
    %c96 = arith.constant 96 : index
    %c0_49 = arith.constant 0 : index
    %73 = vector.load %arg6[%c96, %c0_49] : memref<200x256xf32, #tpu.memory_space<vmem>>, vector<8x256xf32>
    tpu.vector_store %arg6[%c96, %c0_49], %72 {strides = array<i32>} : memref<200x256xf32, #tpu.memory_space<vmem>>, vector<8x256xf32>,
    %74 = vector.extract_strided_slice %11 {offsets = [0, 35], sizes = [8, 256], strides = [1, 1]} : vector<8x324xf32> to vector<8x256xf32>
    %c12 = arith.constant 12 : index
    %c0_50 = arith.constant 0 : index
    %c0_51 = arith.constant 0 : index
    %75 = vector.load %arg4[%c12, %c0_50, %c0_51] : memref<56x8x256xf32, #tpu.memory_space<vmem>>, vector<1x8x256xf32>
    %76 = vector.shape_cast %75 : vector<1x8x256xf32> to vector<8x256xf32>
    %77 = arith.mulf %74, %76 : vector<8x256xf32>
    %c104 = arith.constant 104 : index
    %c0_52 = arith.constant 0 : index
    %78 = vector.load %arg6[%c104, %c0_52] : memref<200x256xf32, #tpu.memory_space<vmem>>, vector<8x256xf32>
    tpu.vector_store %arg6[%c104, %c0_52], %77 {strides = array<i32>} : memref<200x256xf32, #tpu.memory_space<vmem>>, vector<8x256xf32>,
    %79 = vector.extract_strided_slice %11 {offsets = [0, 36], sizes = [8, 256], strides = [1, 1]} : vector<8x324xf32> to vector<8x256xf32>
    %c13 = arith.constant 13 : index
    %c0_53 = arith.constant 0 : index
    %c0_54 = arith.constant 0 : index
    %80 = vector.load %arg4[%c13, %c0_53, %c0_54] : memref<56x8x256xf32, #tpu.memory_space<vmem>>, vector<1x8x256xf32>
    %81 = vector.shape_cast %80 : vector<1x8x256xf32> to vector<8x256xf32>
    %82 = arith.mulf %79, %81 : vector<8x256xf32>
    %c112 = arith.constant 112 : index
    %c0_55 = arith.constant 0 : index
    %83 = vector.load %arg6[%c112, %c0_55] : memref<200x256xf32, #tpu.memory_space<vmem>>, vector<8x256xf32>
    tpu.vector_store %arg6[%c112, %c0_55], %82 {strides = array<i32>} : memref<200x256xf32, #tpu.memory_space<vmem>>, vector<8x256xf32>,
    %84 = vector.extract_strided_slice %11 {offsets = [0, 48], sizes = [8, 256], strides = [1, 1]} : vector<8x324xf32> to vector<8x256xf32>
    %c14 = arith.constant 14 : index
    %c0_56 = arith.constant 0 : index
    %c0_57 = arith.constant 0 : index
    %85 = vector.load %arg4[%c14, %c0_56, %c0_57] : memref<56x8x256xf32, #tpu.memory_space<vmem>>, vector<1x8x256xf32>
    %86 = vector.shape_cast %85 : vector<1x8x256xf32> to vector<8x256xf32>
    %87 = arith.mulf %84, %86 : vector<8x256xf32>
    %c120 = arith.constant 120 : index
    %c0_58 = arith.constant 0 : index
    %88 = vector.load %arg6[%c120, %c0_58] : memref<200x256xf32, #tpu.memory_space<vmem>>, vector<8x256xf32>
    tpu.vector_store %arg6[%c120, %c0_58], %87 {strides = array<i32>} : memref<200x256xf32, #tpu.memory_space<vmem>>, vector<8x256xf32>,
    %89 = vector.extract_strided_slice %11 {offsets = [0, 49], sizes = [8, 256], strides = [1, 1]} : vector<8x324xf32> to vector<8x256xf32>
    %c15 = arith.constant 15 : index
    %c0_59 = arith.constant 0 : index
    %c0_60 = arith.constant 0 : index
    %90 = vector.load %arg4[%c15, %c0_59, %c0_60] : memref<56x8x256xf32, #tpu.memory_space<vmem>>, vector<1x8x256xf32>
    %91 = vector.shape_cast %90 : vector<1x8x256xf32> to vector<8x256xf32>
    %92 = arith.mulf %89, %91 : vector<8x256xf32>
    %c128_61 = arith.constant 128 : index
    %c0_62 = arith.constant 0 : index
    %93 = vector.load %arg6[%c128_61, %c0_62] : memref<200x256xf32, #tpu.memory_space<vmem>>, vector<8x256xf32>
    tpu.vector_store %arg6[%c128_61, %c0_62], %92 {strides = array<i32>} : memref<200x256xf32, #tpu.memory_space<vmem>>, vector<8x256xf32>,
    %94 = vector.extract_strided_slice %11 {offsets = [0, 50], sizes = [8, 256], strides = [1, 1]} : vector<8x324xf32> to vector<8x256xf32>
    %c16_63 = arith.constant 16 : index
    %c0_64 = arith.constant 0 : index
    %c0_65 = arith.constant 0 : index
    %95 = vector.load %arg4[%c16_63, %c0_64, %c0_65] : memref<56x8x256xf32, #tpu.memory_space<vmem>>, vector<1x8x256xf32>
    %96 = vector.shape_cast %95 : vector<1x8x256xf32> to vector<8x256xf32>
    %97 = arith.mulf %94, %96 : vector<8x256xf32>
    %c136 = arith.constant 136 : index
    %c0_66 = arith.constant 0 : index
    %98 = vector.load %arg6[%c136, %c0_66] : memref<200x256xf32, #tpu.memory_space<vmem>>, vector<8x256xf32>
    tpu.vector_store %arg6[%c136, %c0_66], %97 {strides = array<i32>} : memref<200x256xf32, #tpu.memory_space<vmem>>, vector<8x256xf32>,
    %99 = vector.extract_strided_slice %11 {offsets = [0, 51], sizes = [8, 256], strides = [1, 1]} : vector<8x324xf32> to vector<8x256xf32>
    %c17 = arith.constant 17 : index
    %c0_67 = arith.constant 0 : index
    %c0_68 = arith.constant 0 : index
    %100 = vector.load %arg4[%c17, %c0_67, %c0_68] : memref<56x8x256xf32, #tpu.memory_space<vmem>>, vector<1x8x256xf32>
    %101 = vector.shape_cast %100 : vector<1x8x256xf32> to vector<8x256xf32>
    %102 = arith.mulf %99, %101 : vector<8x256xf32>
    %c144 = arith.constant 144 : index
    %c0_69 = arith.constant 0 : index
    %103 = vector.load %arg6[%c144, %c0_69] : memref<200x256xf32, #tpu.memory_space<vmem>>, vector<8x256xf32>
    tpu.vector_store %arg6[%c144, %c0_69], %102 {strides = array<i32>} : memref<200x256xf32, #tpu.memory_space<vmem>>, vector<8x256xf32>,
    %104 = vector.extract_strided_slice %11 {offsets = [0, 52], sizes = [8, 256], strides = [1, 1]} : vector<8x324xf32> to vector<8x256xf32>
    %c18 = arith.constant 18 : index
    %c0_70 = arith.constant 0 : index
    %c0_71 = arith.constant 0 : index
    %105 = vector.load %arg4[%c18, %c0_70, %c0_71] : memref<56x8x256xf32, #tpu.memory_space<vmem>>, vector<1x8x256xf32>
    %106 = vector.shape_cast %105 : vector<1x8x256xf32> to vector<8x256xf32>
    %107 = arith.mulf %104, %106 : vector<8x256xf32>
    %c152 = arith.constant 152 : index
    %c0_72 = arith.constant 0 : index
    %108 = vector.load %arg6[%c152, %c0_72] : memref<200x256xf32, #tpu.memory_space<vmem>>, vector<8x256xf32>
    tpu.vector_store %arg6[%c152, %c0_72], %107 {strides = array<i32>} : memref<200x256xf32, #tpu.memory_space<vmem>>, vector<8x256xf32>,
    %109 = vector.extract_strided_slice %11 {offsets = [0, 64], sizes = [8, 256], strides = [1, 1]} : vector<8x324xf32> to vector<8x256xf32>
    %c19 = arith.constant 19 : index
    %c0_73 = arith.constant 0 : index
    %c0_74 = arith.constant 0 : index
    %110 = vector.load %arg4[%c19, %c0_73, %c0_74] : memref<56x8x256xf32, #tpu.memory_space<vmem>>, vector<1x8x256xf32>
    %111 = vector.shape_cast %110 : vector<1x8x256xf32> to vector<8x256xf32>
    %112 = arith.mulf %109, %111 : vector<8x256xf32>
    %c160 = arith.constant 160 : index
    %c0_75 = arith.constant 0 : index
    %113 = vector.load %arg6[%c160, %c0_75] : memref<200x256xf32, #tpu.memory_space<vmem>>, vector<8x256xf32>
    tpu.vector_store %arg6[%c160, %c0_75], %112 {strides = array<i32>} : memref<200x256xf32, #tpu.memory_space<vmem>>, vector<8x256xf32>,
    %114 = vector.extract_strided_slice %11 {offsets = [0, 65], sizes = [8, 256], strides = [1, 1]} : vector<8x324xf32> to vector<8x256xf32>
    %c20 = arith.constant 20 : index
    %c0_76 = arith.constant 0 : index
    %c0_77 = arith.constant 0 : index
    %115 = vector.load %arg4[%c20, %c0_76, %c0_77] : memref<56x8x256xf32, #tpu.memory_space<vmem>>, vector<1x8x256xf32>
    %116 = vector.shape_cast %115 : vector<1x8x256xf32> to vector<8x256xf32>
    %117 = arith.mulf %114, %116 : vector<8x256xf32>
    %c168 = arith.constant 168 : index
    %c0_78 = arith.constant 0 : index
    %118 = vector.load %arg6[%c168, %c0_78] : memref<200x256xf32, #tpu.memory_space<vmem>>, vector<8x256xf32>
    tpu.vector_store %arg6[%c168, %c0_78], %117 {strides = array<i32>} : memref<200x256xf32, #tpu.memory_space<vmem>>, vector<8x256xf32>,
    %119 = vector.extract_strided_slice %11 {offsets = [0, 66], sizes = [8, 256], strides = [1, 1]} : vector<8x324xf32> to vector<8x256xf32>
    %c21 = arith.constant 21 : index
    %c0_79 = arith.constant 0 : index
    %c0_80 = arith.constant 0 : index
    %120 = vector.load %arg4[%c21, %c0_79, %c0_80] : memref<56x8x256xf32, #tpu.memory_space<vmem>>, vector<1x8x256xf32>
    %121 = vector.shape_cast %120 : vector<1x8x256xf32> to vector<8x256xf32>
    %122 = arith.mulf %119, %121 : vector<8x256xf32>
    %c176 = arith.constant 176 : index
    %c0_81 = arith.constant 0 : index
    %123 = vector.load %arg6[%c176, %c0_81] : memref<200x256xf32, #tpu.memory_space<vmem>>, vector<8x256xf32>
    tpu.vector_store %arg6[%c176, %c0_81], %122 {strides = array<i32>} : memref<200x256xf32, #tpu.memory_space<vmem>>, vector<8x256xf32>,
    %124 = vector.extract_strided_slice %11 {offsets = [0, 67], sizes = [8, 256], strides = [1, 1]} : vector<8x324xf32> to vector<8x256xf32>
    %c22 = arith.constant 22 : index
    %c0_82 = arith.constant 0 : index
    %c0_83 = arith.constant 0 : index
    %125 = vector.load %arg4[%c22, %c0_82, %c0_83] : memref<56x8x256xf32, #tpu.memory_space<vmem>>, vector<1x8x256xf32>
    %126 = vector.shape_cast %125 : vector<1x8x256xf32> to vector<8x256xf32>
    %127 = arith.mulf %124, %126 : vector<8x256xf32>
    %c184 = arith.constant 184 : index
    %c0_84 = arith.constant 0 : index
    %128 = vector.load %arg6[%c184, %c0_84] : memref<200x256xf32, #tpu.memory_space<vmem>>, vector<8x256xf32>
    tpu.vector_store %arg6[%c184, %c0_84], %127 {strides = array<i32>} : memref<200x256xf32, #tpu.memory_space<vmem>>, vector<8x256xf32>,
    %129 = vector.extract_strided_slice %11 {offsets = [0, 68], sizes = [8, 256], strides = [1, 1]} : vector<8x324xf32> to vector<8x256xf32>
    %c23 = arith.constant 23 : index
    %c0_85 = arith.constant 0 : index
    %c0_86 = arith.constant 0 : index
    %130 = vector.load %arg4[%c23, %c0_85, %c0_86] : memref<56x8x256xf32, #tpu.memory_space<vmem>>, vector<1x8x256xf32>
    %131 = vector.shape_cast %130 : vector<1x8x256xf32> to vector<8x256xf32>
    %132 = arith.mulf %129, %131 : vector<8x256xf32>
    %c192 = arith.constant 192 : index
    %c0_87 = arith.constant 0 : index
    %133 = vector.load %arg6[%c192, %c0_87] : memref<200x256xf32, #tpu.memory_space<vmem>>, vector<8x256xf32>
    tpu.vector_store %arg6[%c192, %c0_87], %132 {strides = array<i32>} : memref<200x256xf32, #tpu.memory_space<vmem>>, vector<8x256xf32>,
    %c0_88 = arith.constant 0 : index
    %c0_89 = arith.constant 0 : index
    %134 = vector.load %arg6[%c0_88, %c0_89] : memref<200x256xf32, #tpu.memory_space<vmem>>, vector<200x256xf32>
    %cst_90 = arith.constant dense<0.000000e+00> : vector<8x256xf32>
    %135 = tpu.matmul %9, %134, %cst_90 {dimension_numbers = #tpu.dot_dimension_numbers<[1], [0], [0], [1], [0, 0, 1, 1], [], []>} : vector<8x200xf32>, vector<200x256xf32>, vector<8x256xf32> -> vector<8x256xf32>
    %c1_91 = arith.constant 1 : index
    %c0_92 = arith.constant 0 : index
    %c0_93 = arith.constant 0 : index
    %136 = vector.load %arg3[%c1_91, %c0_92, %c0_93] : memref<9x8x256xf32, #tpu.memory_space<vmem>>, vector<1x8x256xf32>
    %137 = vector.shape_cast %136 : vector<1x8x256xf32> to vector<8x256xf32>
    %138 = arith.addf %135, %137 : vector<8x256xf32>
    %cst_94 = arith.constant 0.000000e+00 : f32
    %139 = vector.broadcast %cst_94 : f32 to vector<8x256xf32>
    %140 = arith.maximumf %138, %139 : vector<8x256xf32>
    %c0_95 = arith.constant 0 : index
    %c384 = arith.constant 384 : index
    %141 = vector.load %arg2[%c0_95, %c384] : memref<8x1536xf32, #tpu.memory_space<vmem>>, vector<8x56xf32>
    %cst_96 = arith.constant 0.000000e+00 : f32
    %142 = vector.broadcast %cst_96 : f32 to vector<8x3xf32>
    %143 = tpu.concatenate %142, %140, %142 in 1 : vector<8x3xf32>, vector<8x256xf32>, vector<8x3xf32> -> vector<8x262xf32>
    %144 = vector.extract_strided_slice %143 {offsets = [0, 0], sizes = [8, 256], strides = [1, 1]} : vector<8x262xf32> to vector<8x256xf32>
    %c24_97 = arith.constant 24 : index
    %c0_98 = arith.constant 0 : index
    %c0_99 = arith.constant 0 : index
    %145 = vector.load %arg4[%c24_97, %c0_98, %c0_99] : memref<56x8x256xf32, #tpu.memory_space<vmem>>, vector<1x8x256xf32>
    %146 = vector.shape_cast %145 : vector<1x8x256xf32> to vector<8x256xf32>
    %147 = arith.mulf %144, %146 : vector<8x256xf32>
    %c0_100 = arith.constant 0 : index
    %c0_101 = arith.constant 0 : index
    %148 = vector.load %arg6[%c0_100, %c0_101] : memref<200x256xf32, #tpu.memory_space<vmem>>, vector<8x256xf32>
    tpu.vector_store %arg6[%c0_100, %c0_101], %147 {strides = array<i32>} : memref<200x256xf32, #tpu.memory_space<vmem>>, vector<8x256xf32>,
    %149 = vector.extract_strided_slice %143 {offsets = [0, 1], sizes = [8, 256], strides = [1, 1]} : vector<8x262xf32> to vector<8x256xf32>
    %c10_102 = arith.constant 10 : index
    %c0_103 = arith.constant 0 : index
    %c0_104 = arith.constant 0 : index
    %150 = vector.load %arg4[%c10_102, %c0_103, %c0_104] : memref<56x8x256xf32, #tpu.memory_space<vmem>>, vector<1x8x256xf32>
    %151 = vector.shape_cast %150 : vector<1x8x256xf32> to vector<8x256xf32>
    %152 = arith.mulf %149, %151 : vector<8x256xf32>
    %c8_105 = arith.constant 8 : index
    %c0_106 = arith.constant 0 : index
    %153 = vector.load %arg6[%c8_105, %c0_106] : memref<200x256xf32, #tpu.memory_space<vmem>>, vector<8x256xf32>
    tpu.vector_store %arg6[%c8_105, %c0_106], %152 {strides = array<i32>} : memref<200x256xf32, #tpu.memory_space<vmem>>, vector<8x256xf32>,
    %154 = vector.extract_strided_slice %143 {offsets = [0, 2], sizes = [8, 256], strides = [1, 1]} : vector<8x262xf32> to vector<8x256xf32>
    %c11_107 = arith.constant 11 : index
    %c0_108 = arith.constant 0 : index
    %c0_109 = arith.constant 0 : index
    %155 = vector.load %arg4[%c11_107, %c0_108, %c0_109] : memref<56x8x256xf32, #tpu.memory_space<vmem>>, vector<1x8x256xf32>
    %156 = vector.shape_cast %155 : vector<1x8x256xf32> to vector<8x256xf32>
    %157 = arith.mulf %154, %156 : vector<8x256xf32>
    %c16_110 = arith.constant 16 : index
    %c0_111 = arith.constant 0 : index
    %158 = vector.load %arg6[%c16_110, %c0_111] : memref<200x256xf32, #tpu.memory_space<vmem>>, vector<8x256xf32>
    tpu.vector_store %arg6[%c16_110, %c0_111], %157 {strides = array<i32>} : memref<200x256xf32, #tpu.memory_space<vmem>>, vector<8x256xf32>,
    %159 = vector.extract_strided_slice %143 {offsets = [0, 3], sizes = [8, 256], strides = [1, 1]} : vector<8x262xf32> to vector<8x256xf32>
    %c24_112 = arith.constant 24 : index
    %c0_113 = arith.constant 0 : index
    %160 = vector.load %arg6[%c24_112, %c0_113] : memref<200x256xf32, #tpu.memory_space<vmem>>, vector<8x256xf32>
    tpu.vector_store %arg6[%c24_112, %c0_113], %159 {strides = array<i32>} : memref<200x256xf32, #tpu.memory_space<vmem>>, vector<8x256xf32>,
    %161 = vector.extract_strided_slice %143 {offsets = [0, 4], sizes = [8, 256], strides = [1, 1]} : vector<8x262xf32> to vector<8x256xf32>
    %c12_114 = arith.constant 12 : index
    %c0_115 = arith.constant 0 : index
    %c0_116 = arith.constant 0 : index
    %162 = vector.load %arg4[%c12_114, %c0_115, %c0_116] : memref<56x8x256xf32, #tpu.memory_space<vmem>>, vector<1x8x256xf32>
    %163 = vector.shape_cast %162 : vector<1x8x256xf32> to vector<8x256xf32>
    %164 = arith.mulf %161, %163 : vector<8x256xf32>
    %c32_117 = arith.constant 32 : index
    %c0_118 = arith.constant 0 : index
    %165 = vector.load %arg6[%c32_117, %c0_118] : memref<200x256xf32, #tpu.memory_space<vmem>>, vector<8x256xf32>
    tpu.vector_store %arg6[%c32_117, %c0_118], %164 {strides = array<i32>} : memref<200x256xf32, #tpu.memory_space<vmem>>, vector<8x256xf32>,
    %166 = vector.extract_strided_slice %143 {offsets = [0, 5], sizes = [8, 256], strides = [1, 1]} : vector<8x262xf32> to vector<8x256xf32>
    %c13_119 = arith.constant 13 : index
    %c0_120 = arith.constant 0 : index
    %c0_121 = arith.constant 0 : index
    %167 = vector.load %arg4[%c13_119, %c0_120, %c0_121] : memref<56x8x256xf32, #tpu.memory_space<vmem>>, vector<1x8x256xf32>
    %168 = vector.shape_cast %167 : vector<1x8x256xf32> to vector<8x256xf32>
    %169 = arith.mulf %166, %168 : vector<8x256xf32>
    %c40_122 = arith.constant 40 : index
    %c0_123 = arith.constant 0 : index
    %170 = vector.load %arg6[%c40_122, %c0_123] : memref<200x256xf32, #tpu.memory_space<vmem>>, vector<8x256xf32>
    tpu.vector_store %arg6[%c40_122, %c0_123], %169 {strides = array<i32>} : memref<200x256xf32, #tpu.memory_space<vmem>>, vector<8x256xf32>,
    %171 = vector.extract_strided_slice %143 {offsets = [0, 6], sizes = [8, 256], strides = [1, 1]} : vector<8x262xf32> to vector<8x256xf32>
    %c25 = arith.constant 25 : index
    %c0_124 = arith.constant 0 : index
    %c0_125 = arith.constant 0 : index
    %172 = vector.load %arg4[%c25, %c0_124, %c0_125] : memref<56x8x256xf32, #tpu.memory_space<vmem>>, vector<1x8x256xf32>
    %173 = vector.shape_cast %172 : vector<1x8x256xf32> to vector<8x256xf32>
    %174 = arith.mulf %171, %173 : vector<8x256xf32>
    %c48_126 = arith.constant 48 : index
    %c0_127 = arith.constant 0 : index
    %175 = vector.load %arg6[%c48_126, %c0_127] : memref<200x256xf32, #tpu.memory_space<vmem>>, vector<8x256xf32>
    tpu.vector_store %arg6[%c48_126, %c0_127], %174 {strides = array<i32>} : memref<200x256xf32, #tpu.memory_space<vmem>>, vector<8x256xf32>,
    %c0_128 = arith.constant 0 : index
    %c0_129 = arith.constant 0 : index
    %176 = vector.load %arg6[%c0_128, %c0_129] : memref<200x256xf32, #tpu.memory_space<vmem>>, vector<56x256xf32>
    %cst_130 = arith.constant dense<0.000000e+00> : vector<8x256xf32>
    %177 = tpu.matmul %141, %176, %cst_130 {dimension_numbers = #tpu.dot_dimension_numbers<[1], [0], [0], [1], [0, 0, 1, 1], [], []>} : vector<8x56xf32>, vector<56x256xf32>, vector<8x256xf32> -> vector<8x256xf32>
    %c2_131 = arith.constant 2 : index
    %c0_132 = arith.constant 0 : index
    %c0_133 = arith.constant 0 : index
    %178 = vector.load %arg3[%c2_131, %c0_132, %c0_133] : memref<9x8x256xf32, #tpu.memory_space<vmem>>, vector<1x8x256xf32>
    %179 = vector.shape_cast %178 : vector<1x8x256xf32> to vector<8x256xf32>
    %180 = arith.addf %177, %179 : vector<8x256xf32>
    %cst_134 = arith.constant 0.000000e+00 : f32
    %181 = vector.broadcast %cst_134 : f32 to vector<8x256xf32>
    %182 = arith.maximumf %180, %181 : vector<8x256xf32>
    %c0_135 = arith.constant 0 : index
    %c512 = arith.constant 512 : index
    %183 = vector.load %arg2[%c0_135, %c512] : memref<8x1536xf32, #tpu.memory_space<vmem>>, vector<8x56xf32>
    %cst_136 = arith.constant 0.000000e+00 : f32
    %184 = vector.broadcast %cst_136 : f32 to vector<8x48xf32>
    %185 = tpu.concatenate %184, %182, %184 in 1 : vector<8x48xf32>, vector<8x256xf32>, vector<8x48xf32> -> vector<8x352xf32>
    %186 = vector.extract_strided_slice %185 {offsets = [0, 0], sizes = [8, 256], strides = [1, 1]} : vector<8x352xf32> to vector<8x256xf32>
    %c26 = arith.constant 26 : index
    %c0_137 = arith.constant 0 : index
    %c0_138 = arith.constant 0 : index
    %187 = vector.load %arg4[%c26, %c0_137, %c0_138] : memref<56x8x256xf32, #tpu.memory_space<vmem>>, vector<1x8x256xf32>
    %188 = vector.shape_cast %187 : vector<1x8x256xf32> to vector<8x256xf32>
    %189 = arith.mulf %186, %188 : vector<8x256xf32>
    %c0_139 = arith.constant 0 : index
    %c0_140 = arith.constant 0 : index
    %190 = vector.load %arg6[%c0_139, %c0_140] : memref<200x256xf32, #tpu.memory_space<vmem>>, vector<8x256xf32>
    tpu.vector_store %arg6[%c0_139, %c0_140], %189 {strides = array<i32>} : memref<200x256xf32, #tpu.memory_space<vmem>>, vector<8x256xf32>,
    %191 = vector.extract_strided_slice %185 {offsets = [0, 16], sizes = [8, 256], strides = [1, 1]} : vector<8x352xf32> to vector<8x256xf32>
    %c2_141 = arith.constant 2 : index
    %c0_142 = arith.constant 0 : index
    %c0_143 = arith.constant 0 : index
    %192 = vector.load %arg4[%c2_141, %c0_142, %c0_143] : memref<56x8x256xf32, #tpu.memory_space<vmem>>, vector<1x8x256xf32>
    %193 = vector.shape_cast %192 : vector<1x8x256xf32> to vector<8x256xf32>
    %194 = arith.mulf %191, %193 : vector<8x256xf32>
    %c8_144 = arith.constant 8 : index
    %c0_145 = arith.constant 0 : index
    %195 = vector.load %arg6[%c8_144, %c0_145] : memref<200x256xf32, #tpu.memory_space<vmem>>, vector<8x256xf32>
    tpu.vector_store %arg6[%c8_144, %c0_145], %194 {strides = array<i32>} : memref<200x256xf32, #tpu.memory_space<vmem>>, vector<8x256xf32>,
    %196 = vector.extract_strided_slice %185 {offsets = [0, 32], sizes = [8, 256], strides = [1, 1]} : vector<8x352xf32> to vector<8x256xf32>
    %c7_146 = arith.constant 7 : index
    %c0_147 = arith.constant 0 : index
    %c0_148 = arith.constant 0 : index
    %197 = vector.load %arg4[%c7_146, %c0_147, %c0_148] : memref<56x8x256xf32, #tpu.memory_space<vmem>>, vector<1x8x256xf32>
    %198 = vector.shape_cast %197 : vector<1x8x256xf32> to vector<8x256xf32>
    %199 = arith.mulf %196, %198 : vector<8x256xf32>
    %c16_149 = arith.constant 16 : index
    %c0_150 = arith.constant 0 : index
    %200 = vector.load %arg6[%c16_149, %c0_150] : memref<200x256xf32, #tpu.memory_space<vmem>>, vector<8x256xf32>
    tpu.vector_store %arg6[%c16_149, %c0_150], %199 {strides = array<i32>} : memref<200x256xf32, #tpu.memory_space<vmem>>, vector<8x256xf32>,
    %201 = vector.extract_strided_slice %185 {offsets = [0, 48], sizes = [8, 256], strides = [1, 1]} : vector<8x352xf32> to vector<8x256xf32>
    %c24_151 = arith.constant 24 : index
    %c0_152 = arith.constant 0 : index
    %202 = vector.load %arg6[%c24_151, %c0_152] : memref<200x256xf32, #tpu.memory_space<vmem>>, vector<8x256xf32>
    tpu.vector_store %arg6[%c24_151, %c0_152], %201 {strides = array<i32>} : memref<200x256xf32, #tpu.memory_space<vmem>>, vector<8x256xf32>,
    %203 = vector.extract_strided_slice %185 {offsets = [0, 64], sizes = [8, 256], strides = [1, 1]} : vector<8x352xf32> to vector<8x256xf32>
    %c16_153 = arith.constant 16 : index
    %c0_154 = arith.constant 0 : index
    %c0_155 = arith.constant 0 : index
    %204 = vector.load %arg4[%c16_153, %c0_154, %c0_155] : memref<56x8x256xf32, #tpu.memory_space<vmem>>, vector<1x8x256xf32>
    %205 = vector.shape_cast %204 : vector<1x8x256xf32> to vector<8x256xf32>
    %206 = arith.mulf %203, %205 : vector<8x256xf32>
    %c32_156 = arith.constant 32 : index
    %c0_157 = arith.constant 0 : index
    %207 = vector.load %arg6[%c32_156, %c0_157] : memref<200x256xf32, #tpu.memory_space<vmem>>, vector<8x256xf32>
    tpu.vector_store %arg6[%c32_156, %c0_157], %206 {strides = array<i32>} : memref<200x256xf32, #tpu.memory_space<vmem>>, vector<8x256xf32>,
    %208 = vector.extract_strided_slice %185 {offsets = [0, 80], sizes = [8, 256], strides = [1, 1]} : vector<8x352xf32> to vector<8x256xf32>
    %c21_158 = arith.constant 21 : index
    %c0_159 = arith.constant 0 : index
    %c0_160 = arith.constant 0 : index
    %209 = vector.load %arg4[%c21_158, %c0_159, %c0_160] : memref<56x8x256xf32, #tpu.memory_space<vmem>>, vector<1x8x256xf32>
    %210 = vector.shape_cast %209 : vector<1x8x256xf32> to vector<8x256xf32>
    %211 = arith.mulf %208, %210 : vector<8x256xf32>
    %c40_161 = arith.constant 40 : index
    %c0_162 = arith.constant 0 : index
    %212 = vector.load %arg6[%c40_161, %c0_162] : memref<200x256xf32, #tpu.memory_space<vmem>>, vector<8x256xf32>
    tpu.vector_store %arg6[%c40_161, %c0_162], %211 {strides = array<i32>} : memref<200x256xf32, #tpu.memory_space<vmem>>, vector<8x256xf32>,
    %213 = vector.extract_strided_slice %185 {offsets = [0, 96], sizes = [8, 256], strides = [1, 1]} : vector<8x352xf32> to vector<8x256xf32>
    %c27 = arith.constant 27 : index
    %c0_163 = arith.constant 0 : index
    %c0_164 = arith.constant 0 : index
    %214 = vector.load %arg4[%c27, %c0_163, %c0_164] : memref<56x8x256xf32, #tpu.memory_space<vmem>>, vector<1x8x256xf32>
    %215 = vector.shape_cast %214 : vector<1x8x256xf32> to vector<8x256xf32>
    %216 = arith.mulf %213, %215 : vector<8x256xf32>
    %c48_165 = arith.constant 48 : index
    %c0_166 = arith.constant 0 : index
    %217 = vector.load %arg6[%c48_165, %c0_166] : memref<200x256xf32, #tpu.memory_space<vmem>>, vector<8x256xf32>
    tpu.vector_store %arg6[%c48_165, %c0_166], %216 {strides = array<i32>} : memref<200x256xf32, #tpu.memory_space<vmem>>, vector<8x256xf32>,
    %c0_167 = arith.constant 0 : index
    %c0_168 = arith.constant 0 : index
    %218 = vector.load %arg6[%c0_167, %c0_168] : memref<200x256xf32, #tpu.memory_space<vmem>>, vector<56x256xf32>
    %cst_169 = arith.constant dense<0.000000e+00> : vector<8x256xf32>
    %219 = tpu.matmul %183, %218, %cst_169 {dimension_numbers = #tpu.dot_dimension_numbers<[1], [0], [0], [1], [0, 0, 1, 1], [], []>} : vector<8x56xf32>, vector<56x256xf32>, vector<8x256xf32> -> vector<8x256xf32>
    %c3_170 = arith.constant 3 : index
    %c0_171 = arith.constant 0 : index
    %c0_172 = arith.constant 0 : index
    %220 = vector.load %arg3[%c3_170, %c0_171, %c0_172] : memref<9x8x256xf32, #tpu.memory_space<vmem>>, vector<1x8x256xf32>
    %221 = vector.shape_cast %220 : vector<1x8x256xf32> to vector<8x256xf32>
    %222 = arith.addf %219, %221 : vector<8x256xf32>
    %cst_173 = arith.constant 0.000000e+00 : f32
    %223 = vector.broadcast %cst_173 : f32 to vector<8x256xf32>
    %224 = arith.maximumf %222, %223 : vector<8x256xf32>
    %c0_174 = arith.constant 0 : index
    %c640 = arith.constant 640 : index
    %225 = vector.load %arg2[%c0_174, %c640] : memref<8x1536xf32, #tpu.memory_space<vmem>>, vector<8x88xf32>
    %cst_175 = arith.constant 0.000000e+00 : f32
    %226 = vector.broadcast %cst_175 : f32 to vector<8x5xf32>
    %227 = tpu.concatenate %226, %140, %226 in 1 : vector<8x5xf32>, vector<8x256xf32>, vector<8x5xf32> -> vector<8x266xf32>
    %228 = vector.extract_strided_slice %227 {offsets = [0, 0], sizes = [8, 256], strides = [1, 1]} : vector<8x266xf32> to vector<8x256xf32>
    %c28 = arith.constant 28 : index
    %c0_176 = arith.constant 0 : index
    %c0_177 = arith.constant 0 : index
    %229 = vector.load %arg4[%c28, %c0_176, %c0_177] : memref<56x8x256xf32, #tpu.memory_space<vmem>>, vector<1x8x256xf32>
    %230 = vector.shape_cast %229 : vector<1x8x256xf32> to vector<8x256xf32>
    %231 = arith.mulf %228, %230 : vector<8x256xf32>
    %c0_178 = arith.constant 0 : index
    %c0_179 = arith.constant 0 : index
    %232 = vector.load %arg6[%c0_178, %c0_179] : memref<200x256xf32, #tpu.memory_space<vmem>>, vector<8x256xf32>
    tpu.vector_store %arg6[%c0_178, %c0_179], %231 {strides = array<i32>} : memref<200x256xf32, #tpu.memory_space<vmem>>, vector<8x256xf32>,
    %233 = vector.extract_strided_slice %227 {offsets = [0, 1], sizes = [8, 256], strides = [1, 1]} : vector<8x266xf32> to vector<8x256xf32>
    %c29 = arith.constant 29 : index
    %c0_180 = arith.constant 0 : index
    %c0_181 = arith.constant 0 : index
    %234 = vector.load %arg4[%c29, %c0_180, %c0_181] : memref<56x8x256xf32, #tpu.memory_space<vmem>>, vector<1x8x256xf32>
    %235 = vector.shape_cast %234 : vector<1x8x256xf32> to vector<8x256xf32>
    %236 = arith.mulf %233, %235 : vector<8x256xf32>
    %c8_182 = arith.constant 8 : index
    %c0_183 = arith.constant 0 : index
    %237 = vector.load %arg6[%c8_182, %c0_183] : memref<200x256xf32, #tpu.memory_space<vmem>>, vector<8x256xf32>
    tpu.vector_store %arg6[%c8_182, %c0_183], %236 {strides = array<i32>} : memref<200x256xf32, #tpu.memory_space<vmem>>, vector<8x256xf32>,
    %238 = vector.extract_strided_slice %227 {offsets = [0, 2], sizes = [8, 256], strides = [1, 1]} : vector<8x266xf32> to vector<8x256xf32>
    %c24_184 = arith.constant 24 : index
    %c0_185 = arith.constant 0 : index
    %c0_186 = arith.constant 0 : index
    %239 = vector.load %arg4[%c24_184, %c0_185, %c0_186] : memref<56x8x256xf32, #tpu.memory_space<vmem>>, vector<1x8x256xf32>
    %240 = vector.shape_cast %239 : vector<1x8x256xf32> to vector<8x256xf32>
    %241 = arith.mulf %238, %240 : vector<8x256xf32>
    %c16_187 = arith.constant 16 : index
    %c0_188 = arith.constant 0 : index
    %242 = vector.load %arg6[%c16_187, %c0_188] : memref<200x256xf32, #tpu.memory_space<vmem>>, vector<8x256xf32>
    tpu.vector_store %arg6[%c16_187, %c0_188], %241 {strides = array<i32>} : memref<200x256xf32, #tpu.memory_space<vmem>>, vector<8x256xf32>,
    %243 = vector.extract_strided_slice %227 {offsets = [0, 3], sizes = [8, 256], strides = [1, 1]} : vector<8x266xf32> to vector<8x256xf32>
    %c10_189 = arith.constant 10 : index
    %c0_190 = arith.constant 0 : index
    %c0_191 = arith.constant 0 : index
    %244 = vector.load %arg4[%c10_189, %c0_190, %c0_191] : memref<56x8x256xf32, #tpu.memory_space<vmem>>, vector<1x8x256xf32>
    %245 = vector.shape_cast %244 : vector<1x8x256xf32> to vector<8x256xf32>
    %246 = arith.mulf %243, %245 : vector<8x256xf32>
    %c24_192 = arith.constant 24 : index
    %c0_193 = arith.constant 0 : index
    %247 = vector.load %arg6[%c24_192, %c0_193] : memref<200x256xf32, #tpu.memory_space<vmem>>, vector<8x256xf32>
    tpu.vector_store %arg6[%c24_192, %c0_193], %246 {strides = array<i32>} : memref<200x256xf32, #tpu.memory_space<vmem>>, vector<8x256xf32>,
    %248 = vector.extract_strided_slice %227 {offsets = [0, 4], sizes = [8, 256], strides = [1, 1]} : vector<8x266xf32> to vector<8x256xf32>
    %c11_194 = arith.constant 11 : index
    %c0_195 = arith.constant 0 : index
    %c0_196 = arith.constant 0 : index
    %249 = vector.load %arg4[%c11_194, %c0_195, %c0_196] : memref<56x8x256xf32, #tpu.memory_space<vmem>>, vector<1x8x256xf32>
    %250 = vector.shape_cast %249 : vector<1x8x256xf32> to vector<8x256xf32>
    %251 = arith.mulf %248, %250 : vector<8x256xf32>
    %c32_197 = arith.constant 32 : index
    %c0_198 = arith.constant 0 : index
    %252 = vector.load %arg6[%c32_197, %c0_198] : memref<200x256xf32, #tpu.memory_space<vmem>>, vector<8x256xf32>
    tpu.vector_store %arg6[%c32_197, %c0_198], %251 {strides = array<i32>} : memref<200x256xf32, #tpu.memory_space<vmem>>, vector<8x256xf32>,
    %253 = vector.extract_strided_slice %227 {offsets = [0, 5], sizes = [8, 256], strides = [1, 1]} : vector<8x266xf32> to vector<8x256xf32>
    %c40_199 = arith.constant 40 : index
    %c0_200 = arith.constant 0 : index
    %254 = vector.load %arg6[%c40_199, %c0_200] : memref<200x256xf32, #tpu.memory_space<vmem>>, vector<8x256xf32>
    tpu.vector_store %arg6[%c40_199, %c0_200], %253 {strides = array<i32>} : memref<200x256xf32, #tpu.memory_space<vmem>>, vector<8x256xf32>,
    %255 = vector.extract_strided_slice %227 {offsets = [0, 6], sizes = [8, 256], strides = [1, 1]} : vector<8x266xf32> to vector<8x256xf32>
    %c12_201 = arith.constant 12 : index
    %c0_202 = arith.constant 0 : index
    %c0_203 = arith.constant 0 : index
    %256 = vector.load %arg4[%c12_201, %c0_202, %c0_203] : memref<56x8x256xf32, #tpu.memory_space<vmem>>, vector<1x8x256xf32>
    %257 = vector.shape_cast %256 : vector<1x8x256xf32> to vector<8x256xf32>
    %258 = arith.mulf %255, %257 : vector<8x256xf32>
    %c48_204 = arith.constant 48 : index
    %c0_205 = arith.constant 0 : index
    %259 = vector.load %arg6[%c48_204, %c0_205] : memref<200x256xf32, #tpu.memory_space<vmem>>, vector<8x256xf32>
    tpu.vector_store %arg6[%c48_204, %c0_205], %258 {strides = array<i32>} : memref<200x256xf32, #tpu.memory_space<vmem>>, vector<8x256xf32>,
    %260 = vector.extract_strided_slice %227 {offsets = [0, 7], sizes = [8, 256], strides = [1, 1]} : vector<8x266xf32> to vector<8x256xf32>
    %c13_206 = arith.constant 13 : index
    %c0_207 = arith.constant 0 : index
    %c0_208 = arith.constant 0 : index
    %261 = vector.load %arg4[%c13_206, %c0_207, %c0_208] : memref<56x8x256xf32, #tpu.memory_space<vmem>>, vector<1x8x256xf32>
    %262 = vector.shape_cast %261 : vector<1x8x256xf32> to vector<8x256xf32>
    %263 = arith.mulf %260, %262 : vector<8x256xf32>
    %c56_209 = arith.constant 56 : index
    %c0_210 = arith.constant 0 : index
    %264 = vector.load %arg6[%c56_209, %c0_210] : memref<200x256xf32, #tpu.memory_space<vmem>>, vector<8x256xf32>
    tpu.vector_store %arg6[%c56_209, %c0_210], %263 {strides = array<i32>} : memref<200x256xf32, #tpu.memory_space<vmem>>, vector<8x256xf32>,
    %265 = vector.extract_strided_slice %227 {offsets = [0, 8], sizes = [8, 256], strides = [1, 1]} : vector<8x266xf32> to vector<8x256xf32>
    %c25_211 = arith.constant 25 : index
    %c0_212 = arith.constant 0 : index
    %c0_213 = arith.constant 0 : index
    %266 = vector.load %arg4[%c25_211, %c0_212, %c0_213] : memref<56x8x256xf32, #tpu.memory_space<vmem>>, vector<1x8x256xf32>
    %267 = vector.shape_cast %266 : vector<1x8x256xf32> to vector<8x256xf32>
    %268 = arith.mulf %265, %267 : vector<8x256xf32>
    %c64_214 = arith.constant 64 : index
    %c0_215 = arith.constant 0 : index
    %269 = vector.load %arg6[%c64_214, %c0_215] : memref<200x256xf32, #tpu.memory_space<vmem>>, vector<8x256xf32>
    tpu.vector_store %arg6[%c64_214, %c0_215], %268 {strides = array<i32>} : memref<200x256xf32, #tpu.memory_space<vmem>>, vector<8x256xf32>,
    %270 = vector.extract_strided_slice %227 {offsets = [0, 9], sizes = [8, 256], strides = [1, 1]} : vector<8x266xf32> to vector<8x256xf32>
    %c30 = arith.constant 30 : index
    %c0_216 = arith.constant 0 : index
    %c0_217 = arith.constant 0 : index
    %271 = vector.load %arg4[%c30, %c0_216, %c0_217] : memref<56x8x256xf32, #tpu.memory_space<vmem>>, vector<1x8x256xf32>
    %272 = vector.shape_cast %271 : vector<1x8x256xf32> to vector<8x256xf32>
    %273 = arith.mulf %270, %272 : vector<8x256xf32>
    %c72_218 = arith.constant 72 : index
    %c0_219 = arith.constant 0 : index
    %274 = vector.load %arg6[%c72_218, %c0_219] : memref<200x256xf32, #tpu.memory_space<vmem>>, vector<8x256xf32>
    tpu.vector_store %arg6[%c72_218, %c0_219], %273 {strides = array<i32>} : memref<200x256xf32, #tpu.memory_space<vmem>>, vector<8x256xf32>,
    %275 = vector.extract_strided_slice %227 {offsets = [0, 10], sizes = [8, 256], strides = [1, 1]} : vector<8x266xf32> to vector<8x256xf32>
    %c31 = arith.constant 31 : index
    %c0_220 = arith.constant 0 : index
    %c0_221 = arith.constant 0 : index
    %276 = vector.load %arg4[%c31, %c0_220, %c0_221] : memref<56x8x256xf32, #tpu.memory_space<vmem>>, vector<1x8x256xf32>
    %277 = vector.shape_cast %276 : vector<1x8x256xf32> to vector<8x256xf32>
    %278 = arith.mulf %275, %277 : vector<8x256xf32>
    %c80_222 = arith.constant 80 : index
    %c0_223 = arith.constant 0 : index
    %279 = vector.load %arg6[%c80_222, %c0_223] : memref<200x256xf32, #tpu.memory_space<vmem>>, vector<8x256xf32>
    tpu.vector_store %arg6[%c80_222, %c0_223], %278 {strides = array<i32>} : memref<200x256xf32, #tpu.memory_space<vmem>>, vector<8x256xf32>,
    %c0_224 = arith.constant 0 : index
    %c0_225 = arith.constant 0 : index
    %280 = vector.load %arg6[%c0_224, %c0_225] : memref<200x256xf32, #tpu.memory_space<vmem>>, vector<88x256xf32>
    %cst_226 = arith.constant dense<0.000000e+00> : vector<8x256xf32>
    %281 = tpu.matmul %225, %280, %cst_226 {dimension_numbers = #tpu.dot_dimension_numbers<[1], [0], [0], [1], [0, 0, 1, 1], [], []>} : vector<8x88xf32>, vector<88x256xf32>, vector<8x256xf32> -> vector<8x256xf32>
    %c4_227 = arith.constant 4 : index
    %c0_228 = arith.constant 0 : index
    %c0_229 = arith.constant 0 : index
    %282 = vector.load %arg3[%c4_227, %c0_228, %c0_229] : memref<9x8x256xf32, #tpu.memory_space<vmem>>, vector<1x8x256xf32>
    %283 = vector.shape_cast %282 : vector<1x8x256xf32> to vector<8x256xf32>
    %284 = arith.addf %281, %283 : vector<8x256xf32>
    %cst_230 = arith.constant 0.000000e+00 : f32
    %285 = vector.broadcast %cst_230 : f32 to vector<8x256xf32>
    %286 = arith.maximumf %284, %285 : vector<8x256xf32>
    %c0_231 = arith.constant 0 : index
    %c768 = arith.constant 768 : index
    %287 = vector.load %arg2[%c0_231, %c768] : memref<8x1536xf32, #tpu.memory_space<vmem>>, vector<8x88xf32>
    %cst_232 = arith.constant 0.000000e+00 : f32
    %288 = vector.broadcast %cst_232 : f32 to vector<8x80xf32>
    %289 = tpu.concatenate %288, %286, %288 in 1 : vector<8x80xf32>, vector<8x256xf32>, vector<8x80xf32> -> vector<8x416xf32>
    %290 = vector.extract_strided_slice %289 {offsets = [0, 0], sizes = [8, 256], strides = [1, 1]} : vector<8x416xf32> to vector<8x256xf32>
    %c32_233 = arith.constant 32 : index
    %c0_234 = arith.constant 0 : index
    %c0_235 = arith.constant 0 : index
    %291 = vector.load %arg4[%c32_233, %c0_234, %c0_235] : memref<56x8x256xf32, #tpu.memory_space<vmem>>, vector<1x8x256xf32>
    %292 = vector.shape_cast %291 : vector<1x8x256xf32> to vector<8x256xf32>
    %293 = arith.mulf %290, %292 : vector<8x256xf32>
    %c0_236 = arith.constant 0 : index
    %c0_237 = arith.constant 0 : index
    %294 = vector.load %arg6[%c0_236, %c0_237] : memref<200x256xf32, #tpu.memory_space<vmem>>, vector<8x256xf32>
    tpu.vector_store %arg6[%c0_236, %c0_237], %293 {strides = array<i32>} : memref<200x256xf32, #tpu.memory_space<vmem>>, vector<8x256xf32>,
    %295 = vector.extract_strided_slice %289 {offsets = [0, 16], sizes = [8, 256], strides = [1, 1]} : vector<8x416xf32> to vector<8x256xf32>
    %c33 = arith.constant 33 : index
    %c0_238 = arith.constant 0 : index
    %c0_239 = arith.constant 0 : index
    %296 = vector.load %arg4[%c33, %c0_238, %c0_239] : memref<56x8x256xf32, #tpu.memory_space<vmem>>, vector<1x8x256xf32>
    %297 = vector.shape_cast %296 : vector<1x8x256xf32> to vector<8x256xf32>
    %298 = arith.mulf %295, %297 : vector<8x256xf32>
    %c8_240 = arith.constant 8 : index
    %c0_241 = arith.constant 0 : index
    %299 = vector.load %arg6[%c8_240, %c0_241] : memref<200x256xf32, #tpu.memory_space<vmem>>, vector<8x256xf32>
    tpu.vector_store %arg6[%c8_240, %c0_241], %298 {strides = array<i32>} : memref<200x256xf32, #tpu.memory_space<vmem>>, vector<8x256xf32>,
    %300 = vector.extract_strided_slice %289 {offsets = [0, 32], sizes = [8, 256], strides = [1, 1]} : vector<8x416xf32> to vector<8x256xf32>
    %c26_242 = arith.constant 26 : index
    %c0_243 = arith.constant 0 : index
    %c0_244 = arith.constant 0 : index
    %301 = vector.load %arg4[%c26_242, %c0_243, %c0_244] : memref<56x8x256xf32, #tpu.memory_space<vmem>>, vector<1x8x256xf32>
    %302 = vector.shape_cast %301 : vector<1x8x256xf32> to vector<8x256xf32>
    %303 = arith.mulf %300, %302 : vector<8x256xf32>
    %c16_245 = arith.constant 16 : index
    %c0_246 = arith.constant 0 : index
    %304 = vector.load %arg6[%c16_245, %c0_246] : memref<200x256xf32, #tpu.memory_space<vmem>>, vector<8x256xf32>
    tpu.vector_store %arg6[%c16_245, %c0_246], %303 {strides = array<i32>} : memref<200x256xf32, #tpu.memory_space<vmem>>, vector<8x256xf32>,
    %305 = vector.extract_strided_slice %289 {offsets = [0, 48], sizes = [8, 256], strides = [1, 1]} : vector<8x416xf32> to vector<8x256xf32>
    %c2_247 = arith.constant 2 : index
    %c0_248 = arith.constant 0 : index
    %c0_249 = arith.constant 0 : index
    %306 = vector.load %arg4[%c2_247, %c0_248, %c0_249] : memref<56x8x256xf32, #tpu.memory_space<vmem>>, vector<1x8x256xf32>
    %307 = vector.shape_cast %306 : vector<1x8x256xf32> to vector<8x256xf32>
    %308 = arith.mulf %305, %307 : vector<8x256xf32>
    %c24_250 = arith.constant 24 : index
    %c0_251 = arith.constant 0 : index
    %309 = vector.load %arg6[%c24_250, %c0_251] : memref<200x256xf32, #tpu.memory_space<vmem>>, vector<8x256xf32>
    tpu.vector_store %arg6[%c24_250, %c0_251], %308 {strides = array<i32>} : memref<200x256xf32, #tpu.memory_space<vmem>>, vector<8x256xf32>,
    %310 = vector.extract_strided_slice %289 {offsets = [0, 64], sizes = [8, 256], strides = [1, 1]} : vector<8x416xf32> to vector<8x256xf32>
    %c7_252 = arith.constant 7 : index
    %c0_253 = arith.constant 0 : index
    %c0_254 = arith.constant 0 : index
    %311 = vector.load %arg4[%c7_252, %c0_253, %c0_254] : memref<56x8x256xf32, #tpu.memory_space<vmem>>, vector<1x8x256xf32>
    %312 = vector.shape_cast %311 : vector<1x8x256xf32> to vector<8x256xf32>
    %313 = arith.mulf %310, %312 : vector<8x256xf32>
    %c32_255 = arith.constant 32 : index
    %c0_256 = arith.constant 0 : index
    %314 = vector.load %arg6[%c32_255, %c0_256] : memref<200x256xf32, #tpu.memory_space<vmem>>, vector<8x256xf32>
    tpu.vector_store %arg6[%c32_255, %c0_256], %313 {strides = array<i32>} : memref<200x256xf32, #tpu.memory_space<vmem>>, vector<8x256xf32>,
    %315 = vector.extract_strided_slice %289 {offsets = [0, 80], sizes = [8, 256], strides = [1, 1]} : vector<8x416xf32> to vector<8x256xf32>
    %c40_257 = arith.constant 40 : index
    %c0_258 = arith.constant 0 : index
    %316 = vector.load %arg6[%c40_257, %c0_258] : memref<200x256xf32, #tpu.memory_space<vmem>>, vector<8x256xf32>
    tpu.vector_store %arg6[%c40_257, %c0_258], %315 {strides = array<i32>} : memref<200x256xf32, #tpu.memory_space<vmem>>, vector<8x256xf32>,
    %317 = vector.extract_strided_slice %289 {offsets = [0, 96], sizes = [8, 256], strides = [1, 1]} : vector<8x416xf32> to vector<8x256xf32>
    %c16_259 = arith.constant 16 : index
    %c0_260 = arith.constant 0 : index
    %c0_261 = arith.constant 0 : index
    %318 = vector.load %arg4[%c16_259, %c0_260, %c0_261] : memref<56x8x256xf32, #tpu.memory_space<vmem>>, vector<1x8x256xf32>
    %319 = vector.shape_cast %318 : vector<1x8x256xf32> to vector<8x256xf32>
    %320 = arith.mulf %317, %319 : vector<8x256xf32>
    %c48_262 = arith.constant 48 : index
    %c0_263 = arith.constant 0 : index
    %321 = vector.load %arg6[%c48_262, %c0_263] : memref<200x256xf32, #tpu.memory_space<vmem>>, vector<8x256xf32>
    tpu.vector_store %arg6[%c48_262, %c0_263], %320 {strides = array<i32>} : memref<200x256xf32, #tpu.memory_space<vmem>>, vector<8x256xf32>,
    %322 = vector.extract_strided_slice %289 {offsets = [0, 112], sizes = [8, 256], strides = [1, 1]} : vector<8x416xf32> to vector<8x256xf32>
    %c21_264 = arith.constant 21 : index
    %c0_265 = arith.constant 0 : index
    %c0_266 = arith.constant 0 : index
    %323 = vector.load %arg4[%c21_264, %c0_265, %c0_266] : memref<56x8x256xf32, #tpu.memory_space<vmem>>, vector<1x8x256xf32>
    %324 = vector.shape_cast %323 : vector<1x8x256xf32> to vector<8x256xf32>
    %325 = arith.mulf %322, %324 : vector<8x256xf32>
    %c56_267 = arith.constant 56 : index
    %c0_268 = arith.constant 0 : index
    %326 = vector.load %arg6[%c56_267, %c0_268] : memref<200x256xf32, #tpu.memory_space<vmem>>, vector<8x256xf32>
    tpu.vector_store %arg6[%c56_267, %c0_268], %325 {strides = array<i32>} : memref<200x256xf32, #tpu.memory_space<vmem>>, vector<8x256xf32>,
    %327 = vector.extract_strided_slice %289 {offsets = [0, 128], sizes = [8, 256], strides = [1, 1]} : vector<8x416xf32> to vector<8x256xf32>
    %c27_269 = arith.constant 27 : index
    %c0_270 = arith.constant 0 : index
    %c0_271 = arith.constant 0 : index
    %328 = vector.load %arg4[%c27_269, %c0_270, %c0_271] : memref<56x8x256xf32, #tpu.memory_space<vmem>>, vector<1x8x256xf32>
    %329 = vector.shape_cast %328 : vector<1x8x256xf32> to vector<8x256xf32>
    %330 = arith.mulf %327, %329 : vector<8x256xf32>
    %c64_272 = arith.constant 64 : index
    %c0_273 = arith.constant 0 : index
    %331 = vector.load %arg6[%c64_272, %c0_273] : memref<200x256xf32, #tpu.memory_space<vmem>>, vector<8x256xf32>
    tpu.vector_store %arg6[%c64_272, %c0_273], %330 {strides = array<i32>} : memref<200x256xf32, #tpu.memory_space<vmem>>, vector<8x256xf32>,
    %332 = vector.extract_strided_slice %289 {offsets = [0, 144], sizes = [8, 256], strides = [1, 1]} : vector<8x416xf32> to vector<8x256xf32>
    %c34 = arith.constant 34 : index
    %c0_274 = arith.constant 0 : index
    %c0_275 = arith.constant 0 : index
    %333 = vector.load %arg4[%c34, %c0_274, %c0_275] : memref<56x8x256xf32, #tpu.memory_space<vmem>>, vector<1x8x256xf32>
    %334 = vector.shape_cast %333 : vector<1x8x256xf32> to vector<8x256xf32>
    %335 = arith.mulf %332, %334 : vector<8x256xf32>
    %c72_276 = arith.constant 72 : index
    %c0_277 = arith.constant 0 : index
    %336 = vector.load %arg6[%c72_276, %c0_277] : memref<200x256xf32, #tpu.memory_space<vmem>>, vector<8x256xf32>
    tpu.vector_store %arg6[%c72_276, %c0_277], %335 {strides = array<i32>} : memref<200x256xf32, #tpu.memory_space<vmem>>, vector<8x256xf32>,
    %337 = vector.extract_strided_slice %289 {offsets = [0, 160], sizes = [8, 256], strides = [1, 1]} : vector<8x416xf32> to vector<8x256xf32>
    %c35 = arith.constant 35 : index
    %c0_278 = arith.constant 0 : index
    %c0_279 = arith.constant 0 : index
    %338 = vector.load %arg4[%c35, %c0_278, %c0_279] : memref<56x8x256xf32, #tpu.memory_space<vmem>>, vector<1x8x256xf32>
    %339 = vector.shape_cast %338 : vector<1x8x256xf32> to vector<8x256xf32>
    %340 = arith.mulf %337, %339 : vector<8x256xf32>
    %c80_280 = arith.constant 80 : index
    %c0_281 = arith.constant 0 : index
    %341 = vector.load %arg6[%c80_280, %c0_281] : memref<200x256xf32, #tpu.memory_space<vmem>>, vector<8x256xf32>
    tpu.vector_store %arg6[%c80_280, %c0_281], %340 {strides = array<i32>} : memref<200x256xf32, #tpu.memory_space<vmem>>, vector<8x256xf32>,
    %c0_282 = arith.constant 0 : index
    %c0_283 = arith.constant 0 : index
    %342 = vector.load %arg6[%c0_282, %c0_283] : memref<200x256xf32, #tpu.memory_space<vmem>>, vector<88x256xf32>
    %cst_284 = arith.constant dense<0.000000e+00> : vector<8x256xf32>
    %343 = tpu.matmul %287, %342, %cst_284 {dimension_numbers = #tpu.dot_dimension_numbers<[1], [0], [0], [1], [0, 0, 1, 1], [], []>} : vector<8x88xf32>, vector<88x256xf32>, vector<8x256xf32> -> vector<8x256xf32>
    %c5_285 = arith.constant 5 : index
    %c0_286 = arith.constant 0 : index
    %c0_287 = arith.constant 0 : index
    %344 = vector.load %arg3[%c5_285, %c0_286, %c0_287] : memref<9x8x256xf32, #tpu.memory_space<vmem>>, vector<1x8x256xf32>
    %345 = vector.shape_cast %344 : vector<1x8x256xf32> to vector<8x256xf32>
    %346 = arith.addf %343, %345 : vector<8x256xf32>
    %cst_288 = arith.constant 0.000000e+00 : f32
    %347 = vector.broadcast %cst_288 : f32 to vector<8x256xf32>
    %348 = arith.maximumf %346, %347 : vector<8x256xf32>
    %c0_289 = arith.constant 0 : index
    %c896 = arith.constant 896 : index
    %349 = vector.load %arg2[%c0_289, %c896] : memref<8x1536xf32, #tpu.memory_space<vmem>>, vector<8x168xf32>
    %cst_290 = arith.constant 0.000000e+00 : f32
    %350 = vector.broadcast %cst_290 : f32 to vector<8x10xf32>
    %351 = tpu.concatenate %350, %140, %350 in 1 : vector<8x10xf32>, vector<8x256xf32>, vector<8x10xf32> -> vector<8x276xf32>
    %352 = vector.extract_strided_slice %351 {offsets = [0, 0], sizes = [8, 256], strides = [1, 1]} : vector<8x276xf32> to vector<8x256xf32>
    %c36 = arith.constant 36 : index
    %c0_291 = arith.constant 0 : index
    %c0_292 = arith.constant 0 : index
    %353 = vector.load %arg4[%c36, %c0_291, %c0_292] : memref<56x8x256xf32, #tpu.memory_space<vmem>>, vector<1x8x256xf32>
    %354 = vector.shape_cast %353 : vector<1x8x256xf32> to vector<8x256xf32>
    %355 = arith.mulf %352, %354 : vector<8x256xf32>
    %c0_293 = arith.constant 0 : index
    %c0_294 = arith.constant 0 : index
    %356 = vector.load %arg6[%c0_293, %c0_294] : memref<200x256xf32, #tpu.memory_space<vmem>>, vector<8x256xf32>
    tpu.vector_store %arg6[%c0_293, %c0_294], %355 {strides = array<i32>} : memref<200x256xf32, #tpu.memory_space<vmem>>, vector<8x256xf32>,
    %357 = vector.extract_strided_slice %351 {offsets = [0, 1], sizes = [8, 256], strides = [1, 1]} : vector<8x276xf32> to vector<8x256xf32>
    %c37 = arith.constant 37 : index
    %c0_295 = arith.constant 0 : index
    %c0_296 = arith.constant 0 : index
    %358 = vector.load %arg4[%c37, %c0_295, %c0_296] : memref<56x8x256xf32, #tpu.memory_space<vmem>>, vector<1x8x256xf32>
    %359 = vector.shape_cast %358 : vector<1x8x256xf32> to vector<8x256xf32>
    %360 = arith.mulf %357, %359 : vector<8x256xf32>
    %c8_297 = arith.constant 8 : index
    %c0_298 = arith.constant 0 : index
    %361 = vector.load %arg6[%c8_297, %c0_298] : memref<200x256xf32, #tpu.memory_space<vmem>>, vector<8x256xf32>
    tpu.vector_store %arg6[%c8_297, %c0_298], %360 {strides = array<i32>} : memref<200x256xf32, #tpu.memory_space<vmem>>, vector<8x256xf32>,
    %362 = vector.extract_strided_slice %351 {offsets = [0, 2], sizes = [8, 256], strides = [1, 1]} : vector<8x276xf32> to vector<8x256xf32>
    %c38 = arith.constant 38 : index
    %c0_299 = arith.constant 0 : index
    %c0_300 = arith.constant 0 : index
    %363 = vector.load %arg4[%c38, %c0_299, %c0_300] : memref<56x8x256xf32, #tpu.memory_space<vmem>>, vector<1x8x256xf32>
    %364 = vector.shape_cast %363 : vector<1x8x256xf32> to vector<8x256xf32>
    %365 = arith.mulf %362, %364 : vector<8x256xf32>
    %c16_301 = arith.constant 16 : index
    %c0_302 = arith.constant 0 : index
    %366 = vector.load %arg6[%c16_301, %c0_302] : memref<200x256xf32, #tpu.memory_space<vmem>>, vector<8x256xf32>
    tpu.vector_store %arg6[%c16_301, %c0_302], %365 {strides = array<i32>} : memref<200x256xf32, #tpu.memory_space<vmem>>, vector<8x256xf32>,
    %367 = vector.extract_strided_slice %351 {offsets = [0, 3], sizes = [8, 256], strides = [1, 1]} : vector<8x276xf32> to vector<8x256xf32>
    %c39 = arith.constant 39 : index
    %c0_303 = arith.constant 0 : index
    %c0_304 = arith.constant 0 : index
    %368 = vector.load %arg4[%c39, %c0_303, %c0_304] : memref<56x8x256xf32, #tpu.memory_space<vmem>>, vector<1x8x256xf32>
    %369 = vector.shape_cast %368 : vector<1x8x256xf32> to vector<8x256xf32>
    %370 = arith.mulf %367, %369 : vector<8x256xf32>
    %c24_305 = arith.constant 24 : index
    %c0_306 = arith.constant 0 : index
    %371 = vector.load %arg6[%c24_305, %c0_306] : memref<200x256xf32, #tpu.memory_space<vmem>>, vector<8x256xf32>
    tpu.vector_store %arg6[%c24_305, %c0_306], %370 {strides = array<i32>} : memref<200x256xf32, #tpu.memory_space<vmem>>, vector<8x256xf32>,
    %372 = vector.extract_strided_slice %351 {offsets = [0, 4], sizes = [8, 256], strides = [1, 1]} : vector<8x276xf32> to vector<8x256xf32>
    %c40_307 = arith.constant 40 : index
    %c0_308 = arith.constant 0 : index
    %c0_309 = arith.constant 0 : index
    %373 = vector.load %arg4[%c40_307, %c0_308, %c0_309] : memref<56x8x256xf32, #tpu.memory_space<vmem>>, vector<1x8x256xf32>
    %374 = vector.shape_cast %373 : vector<1x8x256xf32> to vector<8x256xf32>
    %375 = arith.mulf %372, %374 : vector<8x256xf32>
    %c32_310 = arith.constant 32 : index
    %c0_311 = arith.constant 0 : index
    %376 = vector.load %arg6[%c32_310, %c0_311] : memref<200x256xf32, #tpu.memory_space<vmem>>, vector<8x256xf32>
    tpu.vector_store %arg6[%c32_310, %c0_311], %375 {strides = array<i32>} : memref<200x256xf32, #tpu.memory_space<vmem>>, vector<8x256xf32>,
    %377 = vector.extract_strided_slice %351 {offsets = [0, 5], sizes = [8, 256], strides = [1, 1]} : vector<8x276xf32> to vector<8x256xf32>
    %c28_312 = arith.constant 28 : index
    %c0_313 = arith.constant 0 : index
    %c0_314 = arith.constant 0 : index
    %378 = vector.load %arg4[%c28_312, %c0_313, %c0_314] : memref<56x8x256xf32, #tpu.memory_space<vmem>>, vector<1x8x256xf32>
    %379 = vector.shape_cast %378 : vector<1x8x256xf32> to vector<8x256xf32>
    %380 = arith.mulf %377, %379 : vector<8x256xf32>
    %c40_315 = arith.constant 40 : index
    %c0_316 = arith.constant 0 : index
    %381 = vector.load %arg6[%c40_315, %c0_316] : memref<200x256xf32, #tpu.memory_space<vmem>>, vector<8x256xf32>
    tpu.vector_store %arg6[%c40_315, %c0_316], %380 {strides = array<i32>} : memref<200x256xf32, #tpu.memory_space<vmem>>, vector<8x256xf32>,
    %382 = vector.extract_strided_slice %351 {offsets = [0, 6], sizes = [8, 256], strides = [1, 1]} : vector<8x276xf32> to vector<8x256xf32>
    %c29_317 = arith.constant 29 : index
    %c0_318 = arith.constant 0 : index
    %c0_319 = arith.constant 0 : index
    %383 = vector.load %arg4[%c29_317, %c0_318, %c0_319] : memref<56x8x256xf32, #tpu.memory_space<vmem>>, vector<1x8x256xf32>
    %384 = vector.shape_cast %383 : vector<1x8x256xf32> to vector<8x256xf32>
    %385 = arith.mulf %382, %384 : vector<8x256xf32>
    %c48_320 = arith.constant 48 : index
    %c0_321 = arith.constant 0 : index
    %386 = vector.load %arg6[%c48_320, %c0_321] : memref<200x256xf32, #tpu.memory_space<vmem>>, vector<8x256xf32>
    tpu.vector_store %arg6[%c48_320, %c0_321], %385 {strides = array<i32>} : memref<200x256xf32, #tpu.memory_space<vmem>>, vector<8x256xf32>,
    %387 = vector.extract_strided_slice %351 {offsets = [0, 7], sizes = [8, 256], strides = [1, 1]} : vector<8x276xf32> to vector<8x256xf32>
    %c24_322 = arith.constant 24 : index
    %c0_323 = arith.constant 0 : index
    %c0_324 = arith.constant 0 : index
    %388 = vector.load %arg4[%c24_322, %c0_323, %c0_324] : memref<56x8x256xf32, #tpu.memory_space<vmem>>, vector<1x8x256xf32>
    %389 = vector.shape_cast %388 : vector<1x8x256xf32> to vector<8x256xf32>
    %390 = arith.mulf %387, %389 : vector<8x256xf32>
    %c56_325 = arith.constant 56 : index
    %c0_326 = arith.constant 0 : index
    %391 = vector.load %arg6[%c56_325, %c0_326] : memref<200x256xf32, #tpu.memory_space<vmem>>, vector<8x256xf32>
    tpu.vector_store %arg6[%c56_325, %c0_326], %390 {strides = array<i32>} : memref<200x256xf32, #tpu.memory_space<vmem>>, vector<8x256xf32>,
    %392 = vector.extract_strided_slice %351 {offsets = [0, 8], sizes = [8, 256], strides = [1, 1]} : vector<8x276xf32> to vector<8x256xf32>
    %c10_327 = arith.constant 10 : index
    %c0_328 = arith.constant 0 : index
    %c0_329 = arith.constant 0 : index
    %393 = vector.load %arg4[%c10_327, %c0_328, %c0_329] : memref<56x8x256xf32, #tpu.memory_space<vmem>>, vector<1x8x256xf32>
    %394 = vector.shape_cast %393 : vector<1x8x256xf32> to vector<8x256xf32>
    %395 = arith.mulf %392, %394 : vector<8x256xf32>
    %c64_330 = arith.constant 64 : index
    %c0_331 = arith.constant 0 : index
    %396 = vector.load %arg6[%c64_330, %c0_331] : memref<200x256xf32, #tpu.memory_space<vmem>>, vector<8x256xf32>
    tpu.vector_store %arg6[%c64_330, %c0_331], %395 {strides = array<i32>} : memref<200x256xf32, #tpu.memory_space<vmem>>, vector<8x256xf32>,
    %397 = vector.extract_strided_slice %351 {offsets = [0, 9], sizes = [8, 256], strides = [1, 1]} : vector<8x276xf32> to vector<8x256xf32>
    %c11_332 = arith.constant 11 : index
    %c0_333 = arith.constant 0 : index
    %c0_334 = arith.constant 0 : index
    %398 = vector.load %arg4[%c11_332, %c0_333, %c0_334] : memref<56x8x256xf32, #tpu.memory_space<vmem>>, vector<1x8x256xf32>
    %399 = vector.shape_cast %398 : vector<1x8x256xf32> to vector<8x256xf32>
    %400 = arith.mulf %397, %399 : vector<8x256xf32>
    %c72_335 = arith.constant 72 : index
    %c0_336 = arith.constant 0 : index
    %401 = vector.load %arg6[%c72_335, %c0_336] : memref<200x256xf32, #tpu.memory_space<vmem>>, vector<8x256xf32>
    tpu.vector_store %arg6[%c72_335, %c0_336], %400 {strides = array<i32>} : memref<200x256xf32, #tpu.memory_space<vmem>>, vector<8x256xf32>,
    %402 = vector.extract_strided_slice %351 {offsets = [0, 10], sizes = [8, 256], strides = [1, 1]} : vector<8x276xf32> to vector<8x256xf32>
    %c80_337 = arith.constant 80 : index
    %c0_338 = arith.constant 0 : index
    %403 = vector.load %arg6[%c80_337, %c0_338] : memref<200x256xf32, #tpu.memory_space<vmem>>, vector<8x256xf32>
    tpu.vector_store %arg6[%c80_337, %c0_338], %402 {strides = array<i32>} : memref<200x256xf32, #tpu.memory_space<vmem>>, vector<8x256xf32>,
    %404 = vector.extract_strided_slice %351 {offsets = [0, 11], sizes = [8, 256], strides = [1, 1]} : vector<8x276xf32> to vector<8x256xf32>
    %c12_339 = arith.constant 12 : index
    %c0_340 = arith.constant 0 : index
    %c0_341 = arith.constant 0 : index
    %405 = vector.load %arg4[%c12_339, %c0_340, %c0_341] : memref<56x8x256xf32, #tpu.memory_space<vmem>>, vector<1x8x256xf32>
    %406 = vector.shape_cast %405 : vector<1x8x256xf32> to vector<8x256xf32>
    %407 = arith.mulf %404, %406 : vector<8x256xf32>
    %c88_342 = arith.constant 88 : index
    %c0_343 = arith.constant 0 : index
    %408 = vector.load %arg6[%c88_342, %c0_343] : memref<200x256xf32, #tpu.memory_space<vmem>>, vector<8x256xf32>
    tpu.vector_store %arg6[%c88_342, %c0_343], %407 {strides = array<i32>} : memref<200x256xf32, #tpu.memory_space<vmem>>, vector<8x256xf32>,
    %409 = vector.extract_strided_slice %351 {offsets = [0, 12], sizes = [8, 256], strides = [1, 1]} : vector<8x276xf32> to vector<8x256xf32>
    %c13_344 = arith.constant 13 : index
    %c0_345 = arith.constant 0 : index
    %c0_346 = arith.constant 0 : index
    %410 = vector.load %arg4[%c13_344, %c0_345, %c0_346] : memref<56x8x256xf32, #tpu.memory_space<vmem>>, vector<1x8x256xf32>
    %411 = vector.shape_cast %410 : vector<1x8x256xf32> to vector<8x256xf32>
    %412 = arith.mulf %409, %411 : vector<8x256xf32>
    %c96_347 = arith.constant 96 : index
    %c0_348 = arith.constant 0 : index
    %413 = vector.load %arg6[%c96_347, %c0_348] : memref<200x256xf32, #tpu.memory_space<vmem>>, vector<8x256xf32>
    tpu.vector_store %arg6[%c96_347, %c0_348], %412 {strides = array<i32>} : memref<200x256xf32, #tpu.memory_space<vmem>>, vector<8x256xf32>,
    %414 = vector.extract_strided_slice %351 {offsets = [0, 13], sizes = [8, 256], strides = [1, 1]} : vector<8x276xf32> to vector<8x256xf32>
    %c25_349 = arith.constant 25 : index
    %c0_350 = arith.constant 0 : index
    %c0_351 = arith.constant 0 : index
    %415 = vector.load %arg4[%c25_349, %c0_350, %c0_351] : memref<56x8x256xf32, #tpu.memory_space<vmem>>, vector<1x8x256xf32>
    %416 = vector.shape_cast %415 : vector<1x8x256xf32> to vector<8x256xf32>
    %417 = arith.mulf %414, %416 : vector<8x256xf32>
    %c104_352 = arith.constant 104 : index
    %c0_353 = arith.constant 0 : index
    %418 = vector.load %arg6[%c104_352, %c0_353] : memref<200x256xf32, #tpu.memory_space<vmem>>, vector<8x256xf32>
    tpu.vector_store %arg6[%c104_352, %c0_353], %417 {strides = array<i32>} : memref<200x256xf32, #tpu.memory_space<vmem>>, vector<8x256xf32>,
    %419 = vector.extract_strided_slice %351 {offsets = [0, 14], sizes = [8, 256], strides = [1, 1]} : vector<8x276xf32> to vector<8x256xf32>
    %c30_354 = arith.constant 30 : index
    %c0_355 = arith.constant 0 : index
    %c0_356 = arith.constant 0 : index
    %420 = vector.load %arg4[%c30_354, %c0_355, %c0_356] : memref<56x8x256xf32, #tpu.memory_space<vmem>>, vector<1x8x256xf32>
    %421 = vector.shape_cast %420 : vector<1x8x256xf32> to vector<8x256xf32>
    %422 = arith.mulf %419, %421 : vector<8x256xf32>
    %c112_357 = arith.constant 112 : index
    %c0_358 = arith.constant 0 : index
    %423 = vector.load %arg6[%c112_357, %c0_358] : memref<200x256xf32, #tpu.memory_space<vmem>>, vector<8x256xf32>
    tpu.vector_store %arg6[%c112_357, %c0_358], %422 {strides = array<i32>} : memref<200x256xf32, #tpu.memory_space<vmem>>, vector<8x256xf32>,
    %424 = vector.extract_strided_slice %351 {offsets = [0, 15], sizes = [8, 256], strides = [1, 1]} : vector<8x276xf32> to vector<8x256xf32>
    %c31_359 = arith.constant 31 : index
    %c0_360 = arith.constant 0 : index
    %c0_361 = arith.constant 0 : index
    %425 = vector.load %arg4[%c31_359, %c0_360, %c0_361] : memref<56x8x256xf32, #tpu.memory_space<vmem>>, vector<1x8x256xf32>
    %426 = vector.shape_cast %425 : vector<1x8x256xf32> to vector<8x256xf32>
    %427 = arith.mulf %424, %426 : vector<8x256xf32>
    %c120_362 = arith.constant 120 : index
    %c0_363 = arith.constant 0 : index
    %428 = vector.load %arg6[%c120_362, %c0_363] : memref<200x256xf32, #tpu.memory_space<vmem>>, vector<8x256xf32>
    tpu.vector_store %arg6[%c120_362, %c0_363], %427 {strides = array<i32>} : memref<200x256xf32, #tpu.memory_space<vmem>>, vector<8x256xf32>,
    %429 = vector.extract_strided_slice %351 {offsets = [0, 16], sizes = [8, 256], strides = [1, 1]} : vector<8x276xf32> to vector<8x256xf32>
    %c41 = arith.constant 41 : index
    %c0_364 = arith.constant 0 : index
    %c0_365 = arith.constant 0 : index
    %430 = vector.load %arg4[%c41, %c0_364, %c0_365] : memref<56x8x256xf32, #tpu.memory_space<vmem>>, vector<1x8x256xf32>
    %431 = vector.shape_cast %430 : vector<1x8x256xf32> to vector<8x256xf32>
    %432 = arith.mulf %429, %431 : vector<8x256xf32>
    %c128_366 = arith.constant 128 : index
    %c0_367 = arith.constant 0 : index
    %433 = vector.load %arg6[%c128_366, %c0_367] : memref<200x256xf32, #tpu.memory_space<vmem>>, vector<8x256xf32>
    tpu.vector_store %arg6[%c128_366, %c0_367], %432 {strides = array<i32>} : memref<200x256xf32, #tpu.memory_space<vmem>>, vector<8x256xf32>,
    %434 = vector.extract_strided_slice %351 {offsets = [0, 17], sizes = [8, 256], strides = [1, 1]} : vector<8x276xf32> to vector<8x256xf32>
    %c42 = arith.constant 42 : index
    %c0_368 = arith.constant 0 : index
    %c0_369 = arith.constant 0 : index
    %435 = vector.load %arg4[%c42, %c0_368, %c0_369] : memref<56x8x256xf32, #tpu.memory_space<vmem>>, vector<1x8x256xf32>
    %436 = vector.shape_cast %435 : vector<1x8x256xf32> to vector<8x256xf32>
    %437 = arith.mulf %434, %436 : vector<8x256xf32>
    %c136_370 = arith.constant 136 : index
    %c0_371 = arith.constant 0 : index
    %438 = vector.load %arg6[%c136_370, %c0_371] : memref<200x256xf32, #tpu.memory_space<vmem>>, vector<8x256xf32>
    tpu.vector_store %arg6[%c136_370, %c0_371], %437 {strides = array<i32>} : memref<200x256xf32, #tpu.memory_space<vmem>>, vector<8x256xf32>,
    %439 = vector.extract_strided_slice %351 {offsets = [0, 18], sizes = [8, 256], strides = [1, 1]} : vector<8x276xf32> to vector<8x256xf32>
    %c43 = arith.constant 43 : index
    %c0_372 = arith.constant 0 : index
    %c0_373 = arith.constant 0 : index
    %440 = vector.load %arg4[%c43, %c0_372, %c0_373] : memref<56x8x256xf32, #tpu.memory_space<vmem>>, vector<1x8x256xf32>
    %441 = vector.shape_cast %440 : vector<1x8x256xf32> to vector<8x256xf32>
    %442 = arith.mulf %439, %441 : vector<8x256xf32>
    %c144_374 = arith.constant 144 : index
    %c0_375 = arith.constant 0 : index
    %443 = vector.load %arg6[%c144_374, %c0_375] : memref<200x256xf32, #tpu.memory_space<vmem>>, vector<8x256xf32>
    tpu.vector_store %arg6[%c144_374, %c0_375], %442 {strides = array<i32>} : memref<200x256xf32, #tpu.memory_space<vmem>>, vector<8x256xf32>,
    %444 = vector.extract_strided_slice %351 {offsets = [0, 19], sizes = [8, 256], strides = [1, 1]} : vector<8x276xf32> to vector<8x256xf32>
    %c44 = arith.constant 44 : index
    %c0_376 = arith.constant 0 : index
    %c0_377 = arith.constant 0 : index
    %445 = vector.load %arg4[%c44, %c0_376, %c0_377] : memref<56x8x256xf32, #tpu.memory_space<vmem>>, vector<1x8x256xf32>
    %446 = vector.shape_cast %445 : vector<1x8x256xf32> to vector<8x256xf32>
    %447 = arith.mulf %444, %446 : vector<8x256xf32>
    %c152_378 = arith.constant 152 : index
    %c0_379 = arith.constant 0 : index
    %448 = vector.load %arg6[%c152_378, %c0_379] : memref<200x256xf32, #tpu.memory_space<vmem>>, vector<8x256xf32>
    tpu.vector_store %arg6[%c152_378, %c0_379], %447 {strides = array<i32>} : memref<200x256xf32, #tpu.memory_space<vmem>>, vector<8x256xf32>,
    %449 = vector.extract_strided_slice %351 {offsets = [0, 20], sizes = [8, 256], strides = [1, 1]} : vector<8x276xf32> to vector<8x256xf32>
    %c45 = arith.constant 45 : index
    %c0_380 = arith.constant 0 : index
    %c0_381 = arith.constant 0 : index
    %450 = vector.load %arg4[%c45, %c0_380, %c0_381] : memref<56x8x256xf32, #tpu.memory_space<vmem>>, vector<1x8x256xf32>
    %451 = vector.shape_cast %450 : vector<1x8x256xf32> to vector<8x256xf32>
    %452 = arith.mulf %449, %451 : vector<8x256xf32>
    %c160_382 = arith.constant 160 : index
    %c0_383 = arith.constant 0 : index
    %453 = vector.load %arg6[%c160_382, %c0_383] : memref<200x256xf32, #tpu.memory_space<vmem>>, vector<8x256xf32>
    tpu.vector_store %arg6[%c160_382, %c0_383], %452 {strides = array<i32>} : memref<200x256xf32, #tpu.memory_space<vmem>>, vector<8x256xf32>,
    %c0_384 = arith.constant 0 : index
    %c0_385 = arith.constant 0 : index
    %454 = vector.load %arg6[%c0_384, %c0_385] : memref<200x256xf32, #tpu.memory_space<vmem>>, vector<168x256xf32>
    %cst_386 = arith.constant dense<0.000000e+00> : vector<8x256xf32>
    %455 = tpu.matmul %349, %454, %cst_386 {dimension_numbers = #tpu.dot_dimension_numbers<[1], [0], [0], [1], [0, 0, 1, 1], [], []>} : vector<8x168xf32>, vector<168x256xf32>, vector<8x256xf32> -> vector<8x256xf32>
    %c6_387 = arith.constant 6 : index
    %c0_388 = arith.constant 0 : index
    %c0_389 = arith.constant 0 : index
    %456 = vector.load %arg3[%c6_387, %c0_388, %c0_389] : memref<9x8x256xf32, #tpu.memory_space<vmem>>, vector<1x8x256xf32>
    %457 = vector.shape_cast %456 : vector<1x8x256xf32> to vector<8x256xf32>
    %458 = arith.addf %455, %457 : vector<8x256xf32>
    %cst_390 = arith.constant 0.000000e+00 : f32
    %459 = vector.broadcast %cst_390 : f32 to vector<8x256xf32>
    %460 = arith.maximumf %458, %459 : vector<8x256xf32>
    %c0_391 = arith.constant 0 : index
    %c1152 = arith.constant 1152 : index
    %461 = vector.load %arg2[%c0_391, %c1152] : memref<8x1536xf32, #tpu.memory_space<vmem>>, vector<8x168xf32>
    %cst_392 = arith.constant 0.000000e+00 : f32
    %462 = vector.broadcast %cst_392 : f32 to vector<8x160xf32>
    %463 = tpu.concatenate %462, %460, %462 in 1 : vector<8x160xf32>, vector<8x256xf32>, vector<8x160xf32> -> vector<8x576xf32>
    %464 = vector.extract_strided_slice %463 {offsets = [0, 0], sizes = [8, 256], strides = [1, 1]} : vector<8x576xf32> to vector<8x256xf32>
    %c46 = arith.constant 46 : index
    %c0_393 = arith.constant 0 : index
    %c0_394 = arith.constant 0 : index
    %465 = vector.load %arg4[%c46, %c0_393, %c0_394] : memref<56x8x256xf32, #tpu.memory_space<vmem>>, vector<1x8x256xf32>
    %466 = vector.shape_cast %465 : vector<1x8x256xf32> to vector<8x256xf32>
    %467 = arith.mulf %464, %466 : vector<8x256xf32>
    %c0_395 = arith.constant 0 : index
    %c0_396 = arith.constant 0 : index
    %468 = vector.load %arg6[%c0_395, %c0_396] : memref<200x256xf32, #tpu.memory_space<vmem>>, vector<8x256xf32>
    tpu.vector_store %arg6[%c0_395, %c0_396], %467 {strides = array<i32>} : memref<200x256xf32, #tpu.memory_space<vmem>>, vector<8x256xf32>,
    %469 = vector.extract_strided_slice %463 {offsets = [0, 16], sizes = [8, 256], strides = [1, 1]} : vector<8x576xf32> to vector<8x256xf32>
    %c47 = arith.constant 47 : index
    %c0_397 = arith.constant 0 : index
    %c0_398 = arith.constant 0 : index
    %470 = vector.load %arg4[%c47, %c0_397, %c0_398] : memref<56x8x256xf32, #tpu.memory_space<vmem>>, vector<1x8x256xf32>
    %471 = vector.shape_cast %470 : vector<1x8x256xf32> to vector<8x256xf32>
    %472 = arith.mulf %469, %471 : vector<8x256xf32>
    %c8_399 = arith.constant 8 : index
    %c0_400 = arith.constant 0 : index
    %473 = vector.load %arg6[%c8_399, %c0_400] : memref<200x256xf32, #tpu.memory_space<vmem>>, vector<8x256xf32>
    tpu.vector_store %arg6[%c8_399, %c0_400], %472 {strides = array<i32>} : memref<200x256xf32, #tpu.memory_space<vmem>>, vector<8x256xf32>,
    %474 = vector.extract_strided_slice %463 {offsets = [0, 32], sizes = [8, 256], strides = [1, 1]} : vector<8x576xf32> to vector<8x256xf32>
    %c48_401 = arith.constant 48 : index
    %c0_402 = arith.constant 0 : index
    %c0_403 = arith.constant 0 : index
    %475 = vector.load %arg4[%c48_401, %c0_402, %c0_403] : memref<56x8x256xf32, #tpu.memory_space<vmem>>, vector<1x8x256xf32>
    %476 = vector.shape_cast %475 : vector<1x8x256xf32> to vector<8x256xf32>
    %477 = arith.mulf %474, %476 : vector<8x256xf32>
    %c16_404 = arith.constant 16 : index
    %c0_405 = arith.constant 0 : index
    %478 = vector.load %arg6[%c16_404, %c0_405] : memref<200x256xf32, #tpu.memory_space<vmem>>, vector<8x256xf32>
    tpu.vector_store %arg6[%c16_404, %c0_405], %477 {strides = array<i32>} : memref<200x256xf32, #tpu.memory_space<vmem>>, vector<8x256xf32>,
    %479 = vector.extract_strided_slice %463 {offsets = [0, 48], sizes = [8, 256], strides = [1, 1]} : vector<8x576xf32> to vector<8x256xf32>
    %c49 = arith.constant 49 : index
    %c0_406 = arith.constant 0 : index
    %c0_407 = arith.constant 0 : index
    %480 = vector.load %arg4[%c49, %c0_406, %c0_407] : memref<56x8x256xf32, #tpu.memory_space<vmem>>, vector<1x8x256xf32>
    %481 = vector.shape_cast %480 : vector<1x8x256xf32> to vector<8x256xf32>
    %482 = arith.mulf %479, %481 : vector<8x256xf32>
    %c24_408 = arith.constant 24 : index
    %c0_409 = arith.constant 0 : index
    %483 = vector.load %arg6[%c24_408, %c0_409] : memref<200x256xf32, #tpu.memory_space<vmem>>, vector<8x256xf32>
    tpu.vector_store %arg6[%c24_408, %c0_409], %482 {strides = array<i32>} : memref<200x256xf32, #tpu.memory_space<vmem>>, vector<8x256xf32>,
    %484 = vector.extract_strided_slice %463 {offsets = [0, 64], sizes = [8, 256], strides = [1, 1]} : vector<8x576xf32> to vector<8x256xf32>
    %c50 = arith.constant 50 : index
    %c0_410 = arith.constant 0 : index
    %c0_411 = arith.constant 0 : index
    %485 = vector.load %arg4[%c50, %c0_410, %c0_411] : memref<56x8x256xf32, #tpu.memory_space<vmem>>, vector<1x8x256xf32>
    %486 = vector.shape_cast %485 : vector<1x8x256xf32> to vector<8x256xf32>
    %487 = arith.mulf %484, %486 : vector<8x256xf32>
    %c32_412 = arith.constant 32 : index
    %c0_413 = arith.constant 0 : index
    %488 = vector.load %arg6[%c32_412, %c0_413] : memref<200x256xf32, #tpu.memory_space<vmem>>, vector<8x256xf32>
    tpu.vector_store %arg6[%c32_412, %c0_413], %487 {strides = array<i32>} : memref<200x256xf32, #tpu.memory_space<vmem>>, vector<8x256xf32>,
    %489 = vector.extract_strided_slice %463 {offsets = [0, 80], sizes = [8, 256], strides = [1, 1]} : vector<8x576xf32> to vector<8x256xf32>
    %c32_414 = arith.constant 32 : index
    %c0_415 = arith.constant 0 : index
    %c0_416 = arith.constant 0 : index
    %490 = vector.load %arg4[%c32_414, %c0_415, %c0_416] : memref<56x8x256xf32, #tpu.memory_space<vmem>>, vector<1x8x256xf32>
    %491 = vector.shape_cast %490 : vector<1x8x256xf32> to vector<8x256xf32>
    %492 = arith.mulf %489, %491 : vector<8x256xf32>
    %c40_417 = arith.constant 40 : index
    %c0_418 = arith.constant 0 : index
    %493 = vector.load %arg6[%c40_417, %c0_418] : memref<200x256xf32, #tpu.memory_space<vmem>>, vector<8x256xf32>
    tpu.vector_store %arg6[%c40_417, %c0_418], %492 {strides = array<i32>} : memref<200x256xf32, #tpu.memory_space<vmem>>, vector<8x256xf32>,
    %494 = vector.extract_strided_slice %463 {offsets = [0, 96], sizes = [8, 256], strides = [1, 1]} : vector<8x576xf32> to vector<8x256xf32>
    %c33_419 = arith.constant 33 : index
    %c0_420 = arith.constant 0 : index
    %c0_421 = arith.constant 0 : index
    %495 = vector.load %arg4[%c33_419, %c0_420, %c0_421] : memref<56x8x256xf32, #tpu.memory_space<vmem>>, vector<1x8x256xf32>
    %496 = vector.shape_cast %495 : vector<1x8x256xf32> to vector<8x256xf32>
    %497 = arith.mulf %494, %496 : vector<8x256xf32>
    %c48_422 = arith.constant 48 : index
    %c0_423 = arith.constant 0 : index
    %498 = vector.load %arg6[%c48_422, %c0_423] : memref<200x256xf32, #tpu.memory_space<vmem>>, vector<8x256xf32>
    tpu.vector_store %arg6[%c48_422, %c0_423], %497 {strides = array<i32>} : memref<200x256xf32, #tpu.memory_space<vmem>>, vector<8x256xf32>,
    %499 = vector.extract_strided_slice %463 {offsets = [0, 112], sizes = [8, 256], strides = [1, 1]} : vector<8x576xf32> to vector<8x256xf32>
    %c26_424 = arith.constant 26 : index
    %c0_425 = arith.constant 0 : index
    %c0_426 = arith.constant 0 : index
    %500 = vector.load %arg4[%c26_424, %c0_425, %c0_426] : memref<56x8x256xf32, #tpu.memory_space<vmem>>, vector<1x8x256xf32>
    %501 = vector.shape_cast %500 : vector<1x8x256xf32> to vector<8x256xf32>
    %502 = arith.mulf %499, %501 : vector<8x256xf32>
    %c56_427 = arith.constant 56 : index
    %c0_428 = arith.constant 0 : index
    %503 = vector.load %arg6[%c56_427, %c0_428] : memref<200x256xf32, #tpu.memory_space<vmem>>, vector<8x256xf32>
    tpu.vector_store %arg6[%c56_427, %c0_428], %502 {strides = array<i32>} : memref<200x256xf32, #tpu.memory_space<vmem>>, vector<8x256xf32>,
    %504 = vector.extract_strided_slice %463 {offsets = [0, 128], sizes = [8, 256], strides = [1, 1]} : vector<8x576xf32> to vector<8x256xf32>
    %c2_429 = arith.constant 2 : index
    %c0_430 = arith.constant 0 : index
    %c0_431 = arith.constant 0 : index
    %505 = vector.load %arg4[%c2_429, %c0_430, %c0_431] : memref<56x8x256xf32, #tpu.memory_space<vmem>>, vector<1x8x256xf32>
    %506 = vector.shape_cast %505 : vector<1x8x256xf32> to vector<8x256xf32>
    %507 = arith.mulf %504, %506 : vector<8x256xf32>
    %c64_432 = arith.constant 64 : index
    %c0_433 = arith.constant 0 : index
    %508 = vector.load %arg6[%c64_432, %c0_433] : memref<200x256xf32, #tpu.memory_space<vmem>>, vector<8x256xf32>
    tpu.vector_store %arg6[%c64_432, %c0_433], %507 {strides = array<i32>} : memref<200x256xf32, #tpu.memory_space<vmem>>, vector<8x256xf32>,
    %509 = vector.extract_strided_slice %463 {offsets = [0, 144], sizes = [8, 256], strides = [1, 1]} : vector<8x576xf32> to vector<8x256xf32>
    %c7_434 = arith.constant 7 : index
    %c0_435 = arith.constant 0 : index
    %c0_436 = arith.constant 0 : index
    %510 = vector.load %arg4[%c7_434, %c0_435, %c0_436] : memref<56x8x256xf32, #tpu.memory_space<vmem>>, vector<1x8x256xf32>
    %511 = vector.shape_cast %510 : vector<1x8x256xf32> to vector<8x256xf32>
    %512 = arith.mulf %509, %511 : vector<8x256xf32>
    %c72_437 = arith.constant 72 : index
    %c0_438 = arith.constant 0 : index
    %513 = vector.load %arg6[%c72_437, %c0_438] : memref<200x256xf32, #tpu.memory_space<vmem>>, vector<8x256xf32>
    tpu.vector_store %arg6[%c72_437, %c0_438], %512 {strides = array<i32>} : memref<200x256xf32, #tpu.memory_space<vmem>>, vector<8x256xf32>,
    %514 = vector.extract_strided_slice %463 {offsets = [0, 160], sizes = [8, 256], strides = [1, 1]} : vector<8x576xf32> to vector<8x256xf32>
    %c80_439 = arith.constant 80 : index
    %c0_440 = arith.constant 0 : index
    %515 = vector.load %arg6[%c80_439, %c0_440] : memref<200x256xf32, #tpu.memory_space<vmem>>, vector<8x256xf32>
    tpu.vector_store %arg6[%c80_439, %c0_440], %514 {strides = array<i32>} : memref<200x256xf32, #tpu.memory_space<vmem>>, vector<8x256xf32>,
    %516 = vector.extract_strided_slice %463 {offsets = [0, 176], sizes = [8, 256], strides = [1, 1]} : vector<8x576xf32> to vector<8x256xf32>
    %c16_441 = arith.constant 16 : index
    %c0_442 = arith.constant 0 : index
    %c0_443 = arith.constant 0 : index
    %517 = vector.load %arg4[%c16_441, %c0_442, %c0_443] : memref<56x8x256xf32, #tpu.memory_space<vmem>>, vector<1x8x256xf32>
    %518 = vector.shape_cast %517 : vector<1x8x256xf32> to vector<8x256xf32>
    %519 = arith.mulf %516, %518 : vector<8x256xf32>
    %c88_444 = arith.constant 88 : index
    %c0_445 = arith.constant 0 : index
    %520 = vector.load %arg6[%c88_444, %c0_445] : memref<200x256xf32, #tpu.memory_space<vmem>>, vector<8x256xf32>
    tpu.vector_store %arg6[%c88_444, %c0_445], %519 {strides = array<i32>} : memref<200x256xf32, #tpu.memory_space<vmem>>, vector<8x256xf32>,
    %521 = vector.extract_strided_slice %463 {offsets = [0, 192], sizes = [8, 256], strides = [1, 1]} : vector<8x576xf32> to vector<8x256xf32>
    %c21_446 = arith.constant 21 : index
    %c0_447 = arith.constant 0 : index
    %c0_448 = arith.constant 0 : index
    %522 = vector.load %arg4[%c21_446, %c0_447, %c0_448] : memref<56x8x256xf32, #tpu.memory_space<vmem>>, vector<1x8x256xf32>
    %523 = vector.shape_cast %522 : vector<1x8x256xf32> to vector<8x256xf32>
    %524 = arith.mulf %521, %523 : vector<8x256xf32>
    %c96_449 = arith.constant 96 : index
    %c0_450 = arith.constant 0 : index
    %525 = vector.load %arg6[%c96_449, %c0_450] : memref<200x256xf32, #tpu.memory_space<vmem>>, vector<8x256xf32>
    tpu.vector_store %arg6[%c96_449, %c0_450], %524 {strides = array<i32>} : memref<200x256xf32, #tpu.memory_space<vmem>>, vector<8x256xf32>,
    %526 = vector.extract_strided_slice %463 {offsets = [0, 208], sizes = [8, 256], strides = [1, 1]} : vector<8x576xf32> to vector<8x256xf32>
    %c27_451 = arith.constant 27 : index
    %c0_452 = arith.constant 0 : index
    %c0_453 = arith.constant 0 : index
    %527 = vector.load %arg4[%c27_451, %c0_452, %c0_453] : memref<56x8x256xf32, #tpu.memory_space<vmem>>, vector<1x8x256xf32>
    %528 = vector.shape_cast %527 : vector<1x8x256xf32> to vector<8x256xf32>
    %529 = arith.mulf %526, %528 : vector<8x256xf32>
    %c104_454 = arith.constant 104 : index
    %c0_455 = arith.constant 0 : index
    %530 = vector.load %arg6[%c104_454, %c0_455] : memref<200x256xf32, #tpu.memory_space<vmem>>, vector<8x256xf32>
    tpu.vector_store %arg6[%c104_454, %c0_455], %529 {strides = array<i32>} : memref<200x256xf32, #tpu.memory_space<vmem>>, vector<8x256xf32>,
    %531 = vector.extract_strided_slice %463 {offsets = [0, 224], sizes = [8, 256], strides = [1, 1]} : vector<8x576xf32> to vector<8x256xf32>
    %c34_456 = arith.constant 34 : index
    %c0_457 = arith.constant 0 : index
    %c0_458 = arith.constant 0 : index
    %532 = vector.load %arg4[%c34_456, %c0_457, %c0_458] : memref<56x8x256xf32, #tpu.memory_space<vmem>>, vector<1x8x256xf32>
    %533 = vector.shape_cast %532 : vector<1x8x256xf32> to vector<8x256xf32>
    %534 = arith.mulf %531, %533 : vector<8x256xf32>
    %c112_459 = arith.constant 112 : index
    %c0_460 = arith.constant 0 : index
    %535 = vector.load %arg6[%c112_459, %c0_460] : memref<200x256xf32, #tpu.memory_space<vmem>>, vector<8x256xf32>
    tpu.vector_store %arg6[%c112_459, %c0_460], %534 {strides = array<i32>} : memref<200x256xf32, #tpu.memory_space<vmem>>, vector<8x256xf32>,
    %536 = vector.extract_strided_slice %463 {offsets = [0, 240], sizes = [8, 256], strides = [1, 1]} : vector<8x576xf32> to vector<8x256xf32>
    %c35_461 = arith.constant 35 : index
    %c0_462 = arith.constant 0 : index
    %c0_463 = arith.constant 0 : index
    %537 = vector.load %arg4[%c35_461, %c0_462, %c0_463] : memref<56x8x256xf32, #tpu.memory_space<vmem>>, vector<1x8x256xf32>
    %538 = vector.shape_cast %537 : vector<1x8x256xf32> to vector<8x256xf32>
    %539 = arith.mulf %536, %538 : vector<8x256xf32>
    %c120_464 = arith.constant 120 : index
    %c0_465 = arith.constant 0 : index
    %540 = vector.load %arg6[%c120_464, %c0_465] : memref<200x256xf32, #tpu.memory_space<vmem>>, vector<8x256xf32>
    tpu.vector_store %arg6[%c120_464, %c0_465], %539 {strides = array<i32>} : memref<200x256xf32, #tpu.memory_space<vmem>>, vector<8x256xf32>,
    %541 = vector.extract_strided_slice %463 {offsets = [0, 256], sizes = [8, 256], strides = [1, 1]} : vector<8x576xf32> to vector<8x256xf32>
    %c51 = arith.constant 51 : index
    %c0_466 = arith.constant 0 : index
    %c0_467 = arith.constant 0 : index
    %542 = vector.load %arg4[%c51, %c0_466, %c0_467] : memref<56x8x256xf32, #tpu.memory_space<vmem>>, vector<1x8x256xf32>
    %543 = vector.shape_cast %542 : vector<1x8x256xf32> to vector<8x256xf32>
    %544 = arith.mulf %541, %543 : vector<8x256xf32>
    %c128_468 = arith.constant 128 : index
    %c0_469 = arith.constant 0 : index
    %545 = vector.load %arg6[%c128_468, %c0_469] : memref<200x256xf32, #tpu.memory_space<vmem>>, vector<8x256xf32>
    tpu.vector_store %arg6[%c128_468, %c0_469], %544 {strides = array<i32>} : memref<200x256xf32, #tpu.memory_space<vmem>>, vector<8x256xf32>,
    %546 = vector.extract_strided_slice %463 {offsets = [0, 272], sizes = [8, 256], strides = [1, 1]} : vector<8x576xf32> to vector<8x256xf32>
    %c52 = arith.constant 52 : index
    %c0_470 = arith.constant 0 : index
    %c0_471 = arith.constant 0 : index
    %547 = vector.load %arg4[%c52, %c0_470, %c0_471] : memref<56x8x256xf32, #tpu.memory_space<vmem>>, vector<1x8x256xf32>
    %548 = vector.shape_cast %547 : vector<1x8x256xf32> to vector<8x256xf32>
    %549 = arith.mulf %546, %548 : vector<8x256xf32>
    %c136_472 = arith.constant 136 : index
    %c0_473 = arith.constant 0 : index
    %550 = vector.load %arg6[%c136_472, %c0_473] : memref<200x256xf32, #tpu.memory_space<vmem>>, vector<8x256xf32>
    tpu.vector_store %arg6[%c136_472, %c0_473], %549 {strides = array<i32>} : memref<200x256xf32, #tpu.memory_space<vmem>>, vector<8x256xf32>,
    %551 = vector.extract_strided_slice %463 {offsets = [0, 288], sizes = [8, 256], strides = [1, 1]} : vector<8x576xf32> to vector<8x256xf32>
    %c53 = arith.constant 53 : index
    %c0_474 = arith.constant 0 : index
    %c0_475 = arith.constant 0 : index
    %552 = vector.load %arg4[%c53, %c0_474, %c0_475] : memref<56x8x256xf32, #tpu.memory_space<vmem>>, vector<1x8x256xf32>
    %553 = vector.shape_cast %552 : vector<1x8x256xf32> to vector<8x256xf32>
    %554 = arith.mulf %551, %553 : vector<8x256xf32>
    %c144_476 = arith.constant 144 : index
    %c0_477 = arith.constant 0 : index
    %555 = vector.load %arg6[%c144_476, %c0_477] : memref<200x256xf32, #tpu.memory_space<vmem>>, vector<8x256xf32>
    tpu.vector_store %arg6[%c144_476, %c0_477], %554 {strides = array<i32>} : memref<200x256xf32, #tpu.memory_space<vmem>>, vector<8x256xf32>,
    %556 = vector.extract_strided_slice %463 {offsets = [0, 304], sizes = [8, 256], strides = [1, 1]} : vector<8x576xf32> to vector<8x256xf32>
    %c54 = arith.constant 54 : index
    %c0_478 = arith.constant 0 : index
    %c0_479 = arith.constant 0 : index
    %557 = vector.load %arg4[%c54, %c0_478, %c0_479] : memref<56x8x256xf32, #tpu.memory_space<vmem>>, vector<1x8x256xf32>
    %558 = vector.shape_cast %557 : vector<1x8x256xf32> to vector<8x256xf32>
    %559 = arith.mulf %556, %558 : vector<8x256xf32>
    %c152_480 = arith.constant 152 : index
    %c0_481 = arith.constant 0 : index
    %560 = vector.load %arg6[%c152_480, %c0_481] : memref<200x256xf32, #tpu.memory_space<vmem>>, vector<8x256xf32>
    tpu.vector_store %arg6[%c152_480, %c0_481], %559 {strides = array<i32>} : memref<200x256xf32, #tpu.memory_space<vmem>>, vector<8x256xf32>,
    %561 = vector.extract_strided_slice %463 {offsets = [0, 320], sizes = [8, 256], strides = [1, 1]} : vector<8x576xf32> to vector<8x256xf32>
    %c55 = arith.constant 55 : index
    %c0_482 = arith.constant 0 : index
    %c0_483 = arith.constant 0 : index
    %562 = vector.load %arg4[%c55, %c0_482, %c0_483] : memref<56x8x256xf32, #tpu.memory_space<vmem>>, vector<1x8x256xf32>
    %563 = vector.shape_cast %562 : vector<1x8x256xf32> to vector<8x256xf32>
    %564 = arith.mulf %561, %563 : vector<8x256xf32>
    %c160_484 = arith.constant 160 : index
    %c0_485 = arith.constant 0 : index
    %565 = vector.load %arg6[%c160_484, %c0_485] : memref<200x256xf32, #tpu.memory_space<vmem>>, vector<8x256xf32>
    tpu.vector_store %arg6[%c160_484, %c0_485], %564 {strides = array<i32>} : memref<200x256xf32, #tpu.memory_space<vmem>>, vector<8x256xf32>,
    %c0_486 = arith.constant 0 : index
    %c0_487 = arith.constant 0 : index
    %566 = vector.load %arg6[%c0_486, %c0_487] : memref<200x256xf32, #tpu.memory_space<vmem>>, vector<168x256xf32>
    %cst_488 = arith.constant dense<0.000000e+00> : vector<8x256xf32>
    %567 = tpu.matmul %461, %566, %cst_488 {dimension_numbers = #tpu.dot_dimension_numbers<[1], [0], [0], [1], [0, 0, 1, 1], [], []>} : vector<8x168xf32>, vector<168x256xf32>, vector<8x256xf32> -> vector<8x256xf32>
    %c7_489 = arith.constant 7 : index
    %c0_490 = arith.constant 0 : index
    %c0_491 = arith.constant 0 : index
    %568 = vector.load %arg3[%c7_489, %c0_490, %c0_491] : memref<9x8x256xf32, #tpu.memory_space<vmem>>, vector<1x8x256xf32>
    %569 = vector.shape_cast %568 : vector<1x8x256xf32> to vector<8x256xf32>
    %570 = arith.addf %567, %569 : vector<8x256xf32>
    %cst_492 = arith.constant 0.000000e+00 : f32
    %571 = vector.broadcast %cst_492 : f32 to vector<8x256xf32>
    %572 = arith.maximumf %570, %571 : vector<8x256xf32>
    %573 = arith.addf %224, %348 : vector<8x256xf32>
    %574 = arith.addf %573, %572 : vector<8x256xf32>
    %c0_493 = arith.constant 0 : index
    %c1408 = arith.constant 1408 : index
    %575 = vector.load %arg2[%c0_493, %c1408] : memref<8x1536xf32, #tpu.memory_space<vmem>>, vector<8x8xf32>
    %cst_494 = arith.constant dense<0.000000e+00> : vector<8x256xf32>
    %576 = tpu.matmul %575, %574, %cst_494 {dimension_numbers = #tpu.dot_dimension_numbers<[1], [0], [0], [1], [0, 0, 1, 1], [], []>} : vector<8x8xf32>, vector<8x256xf32>, vector<8x256xf32> -> vector<8x256xf32>
    %c8_495 = arith.constant 8 : index
    %c0_496 = arith.constant 0 : index
    %c0_497 = arith.constant 0 : index
    %577 = vector.load %arg3[%c8_495, %c0_496, %c0_497] : memref<9x8x256xf32, #tpu.memory_space<vmem>>, vector<1x8x256xf32>
    %578 = vector.shape_cast %577 : vector<1x8x256xf32> to vector<8x256xf32>
    %579 = arith.addf %576, %578 : vector<8x256xf32>
    %cst_498 = arith.constant 0.000000e+00 : f32
    %580 = vector.broadcast %cst_498 : f32 to vector<8x256xf32>
    %581 = arith.maximumf %579, %580 : vector<8x256xf32>
    %582 = arith.mulf %581, %8 : vector<8x256xf32>
    %c0_499 = arith.constant 0 : index
    %c0_500 = arith.constant 0 : index
    %c0_501 = arith.constant 0 : index
    %583 = vector.load %arg5[%c0_499, %c0_500, %c0_501] : memref<1x8x256xf32, #tpu.memory_space<vmem>>, vector<1x8x256xf32>
    %584 = vector.shape_cast %583 : vector<1x8x256xf32> to vector<8x256xf32>
    %585 = vector.shape_cast %582 : vector<8x256xf32> to vector<1x8x256xf32>
    tpu.vector_store %arg5[%c0_499, %c0_500, %c0_501], %585 {strides = array<i32>} : memref<1x8x256xf32, #tpu.memory_space<vmem>>, vector<1x8x256xf32>,
    return
  }
  func.func @transform_0(%arg0: i32) -> (i32, i32, i32) {
    %c0_i32 = arith.constant 0 : i32
    %c0_i32_0 = arith.constant 0 : i32
    %c0_i32_1 = arith.constant 0 : i32
    return %arg0, %c0_i32, %c0_i32_0 : i32, i32, i32
  }
  func.func @transform_1(%arg0: i32) -> (i32, i32) {
    %c0_i32 = arith.constant 0 : i32
    %c0_i32_0 = arith.constant 0 : i32
    %c0_i32_1 = arith.constant 0 : i32
    return %c0_i32, %c0_i32_0 : i32, i32
  }
  func.func @transform_2(%arg0: i32) -> (i32, i32, i32) {
    %c0_i32 = arith.constant 0 : i32
    %c0_i32_0 = arith.constant 0 : i32
    %c0_i32_1 = arith.constant 0 : i32
    %c0_i32_2 = arith.constant 0 : i32
    return %c0_i32, %c0_i32_0, %c0_i32_1 : i32, i32, i32
  }
  func.func @transform_3(%arg0: i32) -> (i32, i32, i32) {
    %c0_i32 = arith.constant 0 : i32
    %c0_i32_0 = arith.constant 0 : i32
    %c0_i32_1 = arith.constant 0 : i32
    %c0_i32_2 = arith.constant 0 : i32
    return %c0_i32, %c0_i32_0, %c0_i32_1 : i32, i32, i32
  }
  func.func @transform_4(%arg0: i32) -> (i32, i32, i32) {
    %c0_i32 = arith.constant 0 : i32
    %c0_i32_0 = arith.constant 0 : i32
    %c0_i32_1 = arith.constant 0 : i32
    return %arg0, %c0_i32, %c0_i32_0 : i32, i32, i32
  }
}

</mosaic_0001>

<bundles_post_ra>
// kernel: tpu_custom_call.1
= control target key start
LH: loop header
LB: loop body
LE: loop exit
PB: predicated region body
PF: predicated region fallthrough
CT: control target
= control target key end

     0   :  { %s7537_s0 = inlined_call_operand.hbm [shape: f32[2,8,256], index: 0, kind: input, shape index: {}]   ;;  %s7538_s1 = inlined_call_operand.hbm [shape: f32[8,1536], index: 1, kind: input, shape index: {}]   ;;  %s7539_s2 = inlined_call_operand.hbm [shape: f32[9,8,256], index: 2, kind: input, shape index: {}]   ;;  %s7540_s3 = inlined_call_operand.hbm [shape: f32[56,8,256], index: 3, kind: input, shape index: {}]   ;;  %s7541_s4 = inlined_call_operand.hbm [shape: f32[2,8,256], index: 4, kind: output, shape index: {}]  }
   0x1   :  { %7677 = sst [smem:[#allocation41_spill]] %s7537_s0 }
   0x2   :  { %7678 = sst [smem:[#allocation42_spill]] %s7538_s1 }
   0x3   :  { %9 = vsyncpa [#allocation4], 0 }
   0x4   :  { %11 = vsyncpa [#allocation4 + $0x1], 0 }
   0x5   :  { %12 = vsyncpa [#allocation7], 0 }
   0x6   :  { %13 = vsyncpa [#allocation10], 0 }
   0x7   :  { %14 = vsyncpa [#allocation5], 0 }
   0x8   :  { %16 = vsyncpa [#allocation5 + $0x1], 0  ;;  %s5098_s15 = smov 0   ;;  %s5100_s16 = smov 0  }
   0x9   :  { %s5102_s17 = smov 0   ;;  %s5104_s18 = smov 0  }
   0xa LB: > { %s5119_s19 = sadd.s32 4294967295, %s4997_s18   ;;  %s4105_s20 = sadd.s32 4294967294, %s4997_s18   ;;  %s4997_s18 = sphi %s5104_s18, %s7927_s18   ;;  %s4993_s17 = sphi %s5102_s17, %s7926_s17   ;;  %s4989_s16 = sphi %s5100_s16, %s7925_s16   ;;  %s4985_s15 = sphi %s5098_s15, %s7924_s15  }
   0xb   : > { %p42_p0 = scmp.ne.s32.totalorder %s4989_s16, %s4985_s15  ;;  %p43_p1 = scmp.eq.s32.totalorder %s5119_s19, 0 }
   0xc   : > { %p129_p2 = scmp.eq.s32.totalorder %s5119_s19, 1  ;;  %p135_p3 = scmp.eq.s32.totalorder %s4105_s20, 1 }
   0xd   : > { %p5128_p4 = por %p43_p1, %p42_p0  ;;  %p4106_p5 = scmp.ge.s32.totalorder %s4997_s18, 1 }
   0xe   : > { %p5133_p6 = por %p135_p3, %p42_p0  ;;  %p142_p7 = scmp.lt.s32.totalorder %s4997_s18, 3 }
   0xf   : > { %s7681_s1 = sld [smem:[#allocation42_spill]]  ;;  %s4999_s27 = smov [#allocation6]  }
  0x10   : > { %p5141_p8 = pnand %p4106_p5, %p142_p7  ;;  %s156_s28 = sshll.u32 %s4999_s27, 4  ;;  %s157_s28 = int_to_ptr.vmem [resolvable:$true] %s156_s28 }
  0x11   : > { %s165_s5 = sshll.u32 %s7539_s2, 4  ;;  %s5000_s7 = smov [#allocation8]   ;;  %s166_s5 = int_to_ptr.hbm [resolvable:$true] %s165_s5 }
  0x12   : > { %p4161_p10 = pneg %p5141_p8  ;;  %s167_s8 = sshll.u32 %s5000_s7, 4  ;;  %s168_s8 = int_to_ptr.vmem [resolvable:$true] %s167_s8 }
  0x13   : > { %s5001_s9 = smov 256   ;;  %s5002_s10 = smov 16  }
  0x14   : > { %p5153_p11 = pnand %p4161_p10, %p43_p1  ;;  %s179_s13 = sshll.u32 %s7540_s3, 4  ;;  %s180_s13 = int_to_ptr.hbm [resolvable:$true] %s179_s13 }
  0x15   : > { %s154_s25 = sshll.u32 %s7681_s1, 4  ;;  %s5003_s14 = smov [#allocation9]   ;;  %s155_s25 = int_to_ptr.hbm [resolvable:$true] %s154_s25 }
  0x16   : > { %4164 = dma.hbm_to_vmem [thread:$0]  (!%p5153_p11), %s155_s25, 1536, %s157_s28, [#allocation7]  }
  0x17   : > { %4167 = dma.hbm_to_vmem [thread:$0]  (!%p5153_p11), %s166_s5, 2304, %s168_s8, [#allocation7], %s5001_s9, %s5001_s9, %s5002_s10  }
  0x18   : > { %s181_s20 = sshll.u32 %s5003_s14, 4  ;;  %s5167_s23 = sadd.s32 1, %s4997_s18   ;;  %s182_s20 = int_to_ptr.vmem [resolvable:$true] %s181_s20 }
  0x19   : > { %4170 = dma.hbm_to_vmem [thread:$0]  (!%p5153_p11), %s180_s13, 14336, %s182_s20, [#allocation10], %s5001_s9, %s5001_s9, %s5002_s10  }
  0x1a   : > { %s26_s24 = ssub.s32 %s4997_s18, %s5167_s23  ;;  %s29_s25 = sadd.s32 1, %s4993_s17 }
  0x1b   : > { %p27_p12 = scmp.eq.s32.totalorder %s26_s24, 0  ;;  %p36_p13 = scmp.ne.s32.totalorder %s4993_s17, %s4989_s16 }
  0x1c   : > { %p37_p0 = scmp.eq.s32.totalorder %s4997_s18, 0  ;;  %p4182_p5 = scmp.lt.s32.totalorder %s4997_s18, 2 }
  0x1d   : > { %s5176_s27 = scalar_select %p27_p12, %s4993_s17, %s29_s25  }
  0x1e   : > { %p5180_p3 = por %p129_p2, %p36_p13  ;;  %s195_s29 = sand.u32 1, %s4993_s17  }
  0x1f   : > { %s4143_s30 = sshll.u32 %s4997_s18, 4  ;;  %p38_p7 = por %p37_p0, %p36_p13 }
  0x20   : > { %s4111_s5 = sshll.u32 %s195_s29, 4  ;;  %s7685_s0 = sld [smem:[#allocation41_spill]] }
  0x21   : > { %s199_s10 = scalar_lea.vmem [#allocation3], %s4111_s5  ;;  %p5190_p10 = pnand %p4182_p5, %p38_p7 }
  0x22   : > { %s208_s11 = sshll.u32 %s199_s10, 4  ;;  %s196_s13 = scalar_lea.sflag [#allocation4], %s195_s29  ;;  %s209_s11 = int_to_ptr.vmem [resolvable:$true] %s208_s11 }
  0x23   : > { %p4897_p11 = pneg %p5190_p10 }
  0x26   : > { %s204_s8 = scalar_lea.hbm %s7685_s0, %s4143_s30  ;;  %s4900_s30 = scalar_lea.hbm %s7685_s0, 32 }
  0x27   : > { %s206_s9 = sshll.u32 %s204_s8, 4  ;;  %s207_s9 = int_to_ptr.hbm [resolvable:$true] %s206_s9 }
  0x28   : > { %s4893_s14 = sshra.s32 %s207_s9, 4  ;;  %s4894_s14 = int_to_ptr.hbm [resolvable:$true] %s4893_s14 }
  0x29   : > { %s4895_s20 = scalar_lea.hbm %s4894_s14, 16  ;;  %p4901_p0 = scmp.lt.s32.totalorder %s4894_s14, %s7685_s0 }
  0x2a   : > { %p4896_p2 = scmp.ne.s32.totalorder %s4894_s14, %s4895_s20  ;;  %p4902_p5 = scmp.lt.s32.totalorder %s4900_s30, %s4895_s20 }
  0x2c   : > { %p4898_p12 = pnand %p4897_p11, %p4896_p2  ;;  %p4903_p7 = por %p4902_p5, %p4901_p0 }
  0x2e   : > { %p4899_p13 = pneg %p4898_p12 }
  0x30   : > { %p4904_p9 = pnand %p4903_p7, %p4899_p13 }
  0x32   : > { %4907 = shalt.err (!%p4904_p9)
}
  0x33   : > { %4174 = dma.hbm_to_vmem [thread:$0]  (!%p5190_p10), %s207_s9, 256, %s209_s11, %s196_s13  }
  0x34   : > { %217 = sbr.rel (%p5141_p8) target bundleno = 2339 (0x923), region = 36 }
  0x39   : > { %s5207_s29 = sand.u32 1, %s4989_s16  }
  0x3a   : > { %s7542_s7 = sshll.u32 %s5207_s29, 4  ;;  %s220_s8 = scalar_lea.sflag [#allocation4], %s5207_s29 }
  0x3b   : > { %s223_s10 = scalar_lea.vmem [#allocation3], %s7542_s7 }
  0x3c   : > { %4968 = dma.done.wait (%p5128_p4), %s220_s8, 256  }
  0x3d   : > { %4970 = vsyncadd (%p5128_p4), %s220_s8, 4294967040 }
  0x3e   : > { %4972 = dma.done.wait (%p43_p1), [#allocation7], 3840  }
  0x3f   : > { %4974 = vsyncadd (%p43_p1), [#allocation7], 4294963456 }
  0x40   : > { %4976 = dma.done.wait (%p43_p1), [#allocation10], 14336  }
  0x41   : > { %4978 = vsyncadd (%p43_p1), [#allocation10], 4294952960  ;;  %vm7670_vm0 = vcmask 64512   ;;  %v337_v0 = vld [vmem:[#allocation9 + $0x10] sm:$0xff]  ;;  %v265_v1 = vld [vmem:[%s223_s10 + $0x8] sm:$0xff]  ;;  %s7562_s26 = smov 1  }
  0x42   : > { %v266_v2 = vld [vmem:[#allocation6] sm:$0xff]  ;;  %341 = vrot.lane.b32.xlu1 %v337_v0, %s7562_s26  ;;  %308 = vmatpush.msra.mxu1 %v265_v1  ;;  %v370_v4 = vld [vmem:[#allocation9 + $0x20] sm:$0xff]  ;;  %s7573_s21 = smov 2   ;;  %v404_v5 = vld [vmem:[#allocation9 + $0x38] sm:$0xff]  ;;  %s7565_s9 = smov 3   ;;  %vm323_vm1 = vcmask 277504  }
  0x43   : > { %v264_v3 = vld [vmem:[%s223_s10] sm:$0xff]  ;;  %4121 = vmatmul.msk.f32.vlgmr.msra.gmra.mxu1 %vm7670_vm0, %v266_v2  ;;  %374 = vrot.lane.b32.xlu0 %v370_v4, %s7573_s21  ;;  %v338_v6 = vld [vmem:[#allocation9 + $0x18] sm:$0xff]  ;;  %v437_v7 = vld [vmem:[#allocation9 + $0x48] sm:$0xff]  ;;  %s7571_s11 = smov 4   ;;  %s7569_s12 = smov 16   ;;  %vm822_vm2 = vcmask 400384  }
  0x44   : > { %288 = vmatpush.msra.mxu3 %v264_v3  ;;  %409 = vrot.lane.b32.xlu2 %v404_v5, %s7565_s9  ;;  %v436_v8 = vld [vmem:[#allocation9 + $0x40] sm:$0xff]  ;;  %v5233_v9 = vld [vmem:[#allocation9 + $0x28] sm:$0xff]  ;;  %v469_v10 = vld [vmem:[#allocation9 + $0x50] sm:$0xff]  ;;  %s7543_s13 = smov 17   ;;  %s7545_s14 = smov 18   ;;  %vm921_vm3 = vcmask 424960  }
  0x45   : > { %4120 = vmatmul.msk.f32.vlgmr.msra.gmra.mxu3 %vm7670_vm0, %v266_v2  ;;  %7687 = vst [vmem:[#allocation16_spill] sm:$0xff] %v5233_v9  ;;  %v503_v11 = vld [vmem:[#allocation9 + $0x68] sm:$0xff]  ;;  %v403_v12 = vld [vmem:[#allocation9 + $0x30] sm:$0xff]  ;;  %v536_v13 = vld [vmem:[#allocation9 + $0x78] sm:$0xff]  ;;  %s7547_s20 = smov 19   ;;  %s7550_s24 = smov 20  }
  0x46   : > { %v5240_v14 = vld [vmem:[#allocation9 + $0x70] sm:$0xff]  ;;  %v470_v15 = vld [vmem:[#allocation9 + $0x58] sm:$0xff]  ;;  %v568_v16 = vld [vmem:[#allocation9 + $0x80] sm:$0xff]  ;;  %s7567_s25 = smov 32   ;;  %s5014_s30 = smov 33   ;;  %vm1019_vm4 = vcmask 539648  }
  0x47   : > { %7688 = vst [vmem:[#allocation17_spill] sm:$0xff] %v5240_v14  ;;  %v602_v17 = vld [vmem:[#allocation9 + $0x98] sm:$0xff]  ;;  %v502_v18 = vld [vmem:[#allocation9 + $0x60] sm:$0xff]  ;;  %v5248_v19 = vld [vmem:[#allocation9 + $0xa8] sm:$0xff]  ;;  %s5015_s5 = smov 36   ;;  %s5016_s6 = smov 35  }
  0x48   : > { %v5251_v20 = vld [vmem:[#allocation9 + $0xa0] sm:$0xff]  ;;  %v569_v21 = vld [vmem:[#allocation9 + $0x88] sm:$0xff]  ;;  %v5257_v22 = vld [vmem:[#allocation9 + $0xb0] sm:$0xff]  ;;  %s7552_s8 = smov 48   ;;  %s5018_s10 = smov 50   ;;  %vm1052_vm5 = vcmask 547840  }
  0x49   : > { %v5260_v23 = vld [vmem:[#allocation9 + $0xd8] sm:$0xff]  ;;  %v601_v24 = vld [vmem:[#allocation9 + $0x90] sm:$0xff]  ;;  %v5264_v25 = vld [vmem:[#allocation9 + $0xc0] sm:$0xff]  ;;  %s5019_s7 = smov 49   ;;  %vm7667_vm6 = vcmask 31744   ;;  %vm7668_vm7 = vcmask 146432  }
  0x4a   : > { %343 = vrot.lane.b32.xlu1 %v338_v6, %s7562_s26  ;;  %7689 = vst [vmem:[#allocation18_spill] sm:$0xff] %v5260_v23  ;;  %v781_v26 = vld [vmem:[#allocation9 + $0xe0] sm:$0xff]  ;;  %v5269_v27 = vld [vmem:[#allocation9 + $0xb8] sm:$0xff]  ;;  %v782_v28 = vld [vmem:[#allocation9 + $0xe8] sm:$0xff]  ;;  %vm7656_vm8 = vcmask 7168   ;;  %vm7658_vm9 = vcmask 23552  }
  0x4b   : > { %442 = vrot.lane.b32.xlu0 %v437_v7, %s7571_s11  ;;  %v5272_v29 = vld [vmem:[#allocation9 + $0x108] sm:$0xff]  ;;  %v814_v31 = vld [vmem:[#allocation9 + $0xf0] sm:$0xff]  ;;  %v881_v34 = vld [vmem:[#allocation9 + $0x118] sm:$0xff]  ;;  %vm7589_vm10 = vcmask 261120   ;;  %vm7657_vm11 = vcmask 15360   ;;  %vm7602_vm12 = vcmask 138240  }
  0x4c   : > { %440 = vrot.lane.b32.xlu2 %v436_v8, %s7571_s11  ;;  %7690 = vst [vmem:[#allocation19_spill] sm:$0xff] %v5272_v29  ;;  %v5276_v30 = vld [vmem:[#allocation9 + $0xc8] sm:$0xff]  ;;  %v880_v32 = vld [vmem:[#allocation9 + $0x110] sm:$0xff]  ;;  %v947_v35 = vld [vmem:[#allocation9 + $0x138] sm:$0xff]  ;;  %s7580_s11 = smov 78   ;;  %vm7593_vm13 = vcmask 392192  }
  0x4d   : > { %v5279_v33 = vld [vmem:[#allocation9 + $0xd0] sm:$0xff]  ;;  %v815_v36 = vld [vmem:[#allocation9 + $0xf8] sm:$0xff]  ;;  %v913_v37 = vld [vmem:[#allocation9 + $0x120] sm:$0xff]  ;;  %vm7601_vm14 = vcmask 130048   ;;  %vm609_vm15 = vcmask 162816   ;;  %s7650_s0 = smov 120  }
  0x4e   : > { %v1078_v38 = vld [vmem:[#allocation9 + $0x178] sm:$0xff]  ;;  %v847_v39 = vld [vmem:[#allocation9 + $0x100] sm:$0xff]  ;;  %v5283_v41 = vld [vmem:[#allocation9 + $0x150] sm:$0xff]  ;;  %s7750_s1 = smov 18  }
  0x4f   : > { %v1044_v40 = vld [vmem:[#allocation9 + $0x160] sm:$0xff]  ;;  %7691 = vst [vmem:[#allocation20_spill] sm:$0xff] %v5283_v41  ;;  %v914_v42 = vld [vmem:[#allocation9 + $0x128] sm:$0xff]  ;;  %v1012_v43 = vld [vmem:[#allocation9 + $0x158] sm:$0xff] }
  0x50   : > { %v979_v44 = vld [vmem:[#allocation9 + $0x148] sm:$0xff]  ;;  %v946_v45 = vld [vmem:[#allocation9 + $0x130] sm:$0xff]  ;;  %v268_v50 = vld [vmem:[#allocation8 + $0x8] sm:$0xff] }
  0x51   : > { %v1077_v48 = vld [vmem:[#allocation9 + $0x170] sm:$0xff]  ;;  %v1045_v52 = vld [vmem:[#allocation9 + $0x168] sm:$0xff]  ;;  %v978_v60 = vld [vmem:[#allocation9 + $0x140] sm:$0xff] }
  0x52   : > { %376 = vrot.lane.b32.xlu1 %v5233_v9, %s7573_s21  ;;  %v267_v57 = vld [vmem:[#allocation8] sm:$0xff]  ;;  %s7579_s21 = smov 93  }
  0x53   : > { %473 = vrot.lane.b32.xlu0 %v469_v10, %s7569_s12 }
  0x54   : > { %508 = vrot.lane.b32.xlu2 %v503_v11, %s7543_s13 }
  0x5a   : > { %407 = vrot.lane.b32.xlu1 %v403_v12, %s7565_s9  ;;  %s7576_s9 = smov 92  }
  0x5b   : > { %541 = vrot.lane.b32.xlu0 %v536_v13, %s7545_s14 }
  0x5c   : > { %539 = vrot.lane.b32.xlu2 %v5240_v14, %s7545_s14  ;;  %s5022_s14 = smov 52  }
  0x62   : > { %475 = vrot.lane.b32.xlu1 %v470_v15, %s7569_s12  ;;  %s7630_s12 = smov 96  }
  0x63   : > { %572 = vrot.lane.b32.xlu0 %v568_v16, %s7547_s20 }
  0x64   : > { %607 = vrot.lane.b32.xlu2 %v602_v17, %s7550_s24 }
  0x6a   : > { %506 = vrot.lane.b32.xlu1 %v502_v18, %s7543_s13  ;;  %s5020_s13 = smov 51  }
  0x6b   : > { %640 = vrot.lane.b32.xlu0 %v5248_v19, %s7567_s25 }
  0x6c   : > { %638 = vrot.lane.b32.xlu2 %v5251_v20, %s7567_s25  ;;  %s7575_s25 = smov 95  }
  0x72   : > { %574 = vrot.lane.b32.xlu1 %v569_v21, %s7547_s20  ;;  %s5024_s20 = smov 67  }
  0x73   : > { %671 = vrot.lane.b32.xlu0 %v5257_v22, %s5014_s30 }
  0x74   : > { %754 = vrot.lane.b32.xlu2 %v5260_v23, %s5015_s5 }
  0x7a   : > { %605 = vrot.lane.b32.xlu1 %v601_v24, %s7550_s24  ;;  %s7590_s24 = smov 108  }
  0x7b   : > { %719 = vrot.lane.b32.xlu0 %v5264_v25, %s5016_s6 }
  0x7c   : > { %785 = vrot.lane.b32.xlu2 %v781_v26, %s7552_s8 }
  0x82   : > { %673 = vrot.lane.b32.xlu1 %v5269_v27, %s5014_s30  ;;  %s7614_s30 = smov 64  }
  0x83   : > { %787 = vrot.lane.b32.xlu0 %v782_v28, %s7552_s8  ;;  %s7577_s8 = smov 109  }
  0x84   : > { %853 = vrot.lane.b32.xlu2 %v5272_v29, %s5018_s10 }
  0x8a   : > { %721 = vrot.lane.b32.xlu1 %v5276_v30, %s5016_s6  ;;  %s5023_s6 = smov 68  }
  0x8b   : > { %818 = vrot.lane.b32.xlu0 %v814_v31, %s5019_s7 }
  0x8c   : > { %884 = vrot.lane.b32.xlu2 %v880_v32, %s5020_s13 }
  0x92   : > { %752 = vrot.lane.b32.xlu1 %v5279_v33, %s5015_s5  ;;  %s7616_s5 = smov 125  }
  0x93   : > { %886 = vrot.lane.b32.xlu0 %v881_v34, %s5020_s13  ;;  %s5025_s13 = smov 66  }
  0x94   : > { %952 = vrot.lane.b32.xlu2 %v947_v35, %s7614_s30 }
  0x9a   : > { %820 = vrot.lane.b32.xlu1 %v815_v36, %s5019_s7  ;;  %s5026_s7 = smov 65  }
  0x9b   : > { %917 = vrot.lane.b32.xlu0 %v913_v37, %s5022_s14 }
  0x9c   : > { %1083 = vrot.lane.b32.xlu2 %v1078_v38, %s5023_s6 }
  0x9e   : > { %v5319_v2 = vpop.permute.xlu2 %409 }
  0xa2   : > { %851 = vrot.lane.b32.xlu1 %v847_v39, %s5018_s10  ;;  %s7608_s10 = smov 126  }
  0xa3   : > { %1048 = vrot.lane.b32.xlu0 %v1044_v40, %s5024_s20 }
  0xa4   : > { %1015 = vrot.lane.b32.xlu2 %v5283_v41, %s5025_s13 }
  0xa6   : > { %v5327_v6 = vpop.permute.xlu2 %440 }
  0xaa   : > { %919 = vrot.lane.b32.xlu1 %v914_v42, %s5022_s14  ;;  %s5027_s14 = smov 34  }
  0xab   : > { %1017 = vrot.lane.b32.xlu0 %v1012_v43, %s5025_s13  ;;  %s7584_s13 = smov 111  }
  0xac   : > { %984 = vrot.lane.b32.xlu2 %v979_v44, %s5026_s7 }
  0xae   : > { %v5333_v10 = vpop.permute.xlu2 %508 }
  0xb2   : > { %950 = vrot.lane.b32.xlu1 %v946_v45, %s7614_s30 }
  0xb3   : > { %1274 = vrot.lane.b32.xlu0 %v5248_v19, %s7562_s26 }
  0xb4   : > { %v5287_v46 = vpop.permute.xlu1 %341  ;;  %1272 = vrot.lane.b32.xlu2 %v5251_v20, %s7562_s26  ;;  %s7586_s26 = smov 110  }
  0xb5   : > { %v5293_v47 = vpop.permute.xlu0 %374 }
  0xb6   : > { %v5339_v13 = vpop.permute.xlu2 %539 }
  0xba   : > { %1081 = vrot.lane.b32.xlu1 %v1077_v48, %s5023_s6  ;;  %s7606_s6 = smov 127  }
  0xbc   : > { %v5295_v49 = vpop.permute.xlu1 %343 }
  0xbd   : > { %v5297_v51 = vpop.permute.xlu0 %442 }
  0xbe   : > { %v5345_v17 = vpop.permute.xlu2 %607 }
  0xc0   : > { %v310_v53 = vpop.f32.mrf.mxu1 }
  0xc1   : > { %v5299_v54 = vadd.f32 %v310_v53, %v268_v50 }
  0xc2   : > { %1050 = vrot.lane.b32.xlu1 %v1045_v52, %s5024_s20  ;;  %s5028_s20 = smov 94  }
  0xc3   : > { %7692 = vst [vmem:[#allocation21_spill] sm:$0xff] %v5299_v54  ;;  %v7549_v55 = vmax.f32 %v5299_v54, 0.0 }
  0xc4   : > { %v5302_v56 = vpop.permute.xlu1 %376 }
  0xc5   : > { %321 = vrot.lane.b32.xlu0 %v7549_v55, %s5027_s14  ;;  %v5306_v58 = vpop.permute.xlu0 %473 }
  0xc6   : > { %v5353_v21 = vpop.permute.xlu2 %638 }
  0xc8   : > { %v290_v59 = vpop.f32.mrf.mxu3 }
  0xc9   : > { %v5308_v61 = vadd.f32 %v290_v59, %v267_v57 }
  0xca   : > { %982 = vrot.lane.b32.xlu1 %v978_v60, %s5026_s7  ;;  %s7620_s7 = smov 112  }
  0xcb   : > { %7693 = vst [vmem:[#allocation22_spill] sm:$0xff] %v5308_v61  ;;  %v7554_v62 = vmax.f32 %v5308_v61, 0.0 }
  0xcc   : > { %v5311_v63 = vpop.permute.xlu1 %407 }
  0xcd   : > { %319 = vrot.lane.b32.xlu0 %v7554_v62, %s5027_s14  ;;  %v5315_v0 = vpop.permute.xlu0 %541  ;;  %s7582_s14 = smov 124  }
  0xce   : > { %v5359_v28 = vpop.permute.xlu2 %754 }
  0xd4   : > { %v5317_v1 = vpop.permute.xlu1 %475 }
  0xd5   : > { %v5321_v3 = vpop.permute.xlu0 %572 }
  0xd6   : > { %v5365_v34 = vpop.permute.xlu2 %785 }
  0xdc   : > { %v5323_v4 = vpop.permute.xlu1 %506 }
  0xdd   : > { %v5325_v5 = vpop.permute.xlu0 %640 }
  0xde   : > { %v5371_v37 = vpop.permute.xlu2 %853 }
  0xe4   : > { %v5331_v8 = vpop.permute.xlu1 %574 }
  0xe5   : > { %v5329_v7 = vpop.permute.xlu0 %671 }
  0xe6   : > { %v5377_v40 = vpop.permute.xlu2 %884 }
  0xec   : > { %v5337_v12 = vpop.permute.xlu1 %605 }
  0xed   : > { %v5335_v11 = vpop.permute.xlu0 %719 }
  0xee   : > { %v5384_v45 = vpop.permute.xlu2 %952 }
  0xf4   : > { %v5343_v16 = vpop.permute.xlu1 %673 }
  0xf5   : > { %v5341_v15 = vpop.permute.xlu0 %787 }
  0xf6   : > { %v5403_v60 = vpop.permute.xlu2 %1083 }
  0xfc   : > { %v5349_v19 = vpop.permute.xlu1 %721 }
  0xfd   : > { %v5347_v18 = vpop.permute.xlu0 %818 }
  0xfe   : > { %v1016_v62 = vpop.permute.xlu2 %1015 }
 0x104   : > { %v5357_v26 = vpop.permute.xlu1 %752 }
 0x105   : > { %v5351_v20 = vpop.permute.xlu0 %886 }
 0x10c   : > { %v5363_v32 = vpop.permute.xlu1 %820 }
 0x10d   : > { %v5355_v24 = vpop.permute.xlu0 %917  ;;  %v823_v54 = vsel %vm822_vm2, %v5347_v18, %v5363_v32  ;;  %vm576_vm2 = vcmask 154624  }
 0x114   : > { %v5369_v36 = vpop.permute.xlu1 %851 }
 0x115   : > { %v5361_v31 = vpop.permute.xlu0 %1048 }
 0x11c   : > { %v5375_v39 = vpop.permute.xlu1 %919 }
 0x11d   : > { %v5367_v35 = vpop.permute.xlu0 %1017  ;;  %v922_v61 = vsel %vm921_vm3, %v5355_v24, %v5375_v39  ;;  %vm986_vm3 = vcmask 531456  }
 0x124   : > { %v5379_v43 = vpop.permute.xlu1 %950 }
 0x125   : > { %v5373_v38 = vpop.permute.xlu0 %1274 }
 0x126   : > { %7694 = vst [vmem:[#allocation23_spill] sm:$0xff] %v5373_v38 }
 0x12c   : > { %v5401_v59 = vpop.permute.xlu1 %1081 }
 0x137   : > { %v322_v42 = vpop.permute.xlu0 %321 }
 0x138   : > { %v5382_v44 = vsel %vm323_vm1, %v322_v42, 0.0 }
 0x139   : > { %705 = vrot.lane.b32.xlu2 %v5382_v44, %s5028_s20  ;;  %v418_v48 = vmul.f32 %v5319_v2, %v5382_v44  ;;  %v385_v50 = vmul.f32 %v5302_v56, %v5382_v44  ;;  %v352_v52 = vmul.f32 %v5295_v49, %v5382_v44  ;;  %v517_v53 = vmul.f32 %v5333_v10, %v5382_v44 }
 0x13a   : > { %v484_v57 = vmul.f32 %v5317_v1, %v5382_v44  ;;  %v583_v55 = vmul.f32 %v5331_v8, %v5382_v44  ;;  %v763_v41 = vmul.f32 %v5359_v28, %v5382_v44 }
 0x13b   : > { %426 = vrot.lane.b32.xlu1 %v418_v48, %s7616_s5  ;;  %393 = vrot.lane.b32.xlu0 %v385_v50, %s7608_s10  ;;  %v451_v48 = vmul.f32 %v5297_v51, %v5382_v44 }
 0x13f   : > { %v320_v50 = vpop.permute.xlu0 %319 }
 0x141   : > { %360 = vrot.lane.b32.xlu2 %v352_v52, %s7606_s6  ;;  %v616_v52 = vmul.f32 %v5345_v17, %v5382_v44 }
 0x143   : > { %525 = vrot.lane.b32.xlu1 %v517_v53, %s7584_s13  ;;  %492 = vrot.lane.b32.xlu0 %v484_v57, %s7620_s7  ;;  %v1051_v53 = vpop.permute.xlu1 %1050  ;;  %v5417_v57 = vsel %vm323_vm1, %v320_v50, %v322_v42 }
 0x144   : > { %v1053_v38 = vsel %vm1052_vm5, %v5361_v31, %v1051_v53  ;;  %v5455_v23 = vmul.f32 %v922_v61, %v5417_v57  ;;  %vm675_vm5 = vcmask 269312  }
 0x149   : > { %459 = vrot.lane.b32.xlu2 %v451_v48, %s7582_s14  ;;  %v5420_v48 = vsel %vm323_vm1, 0.0, %v320_v50  ;;  %v5435_v50 = vmul.f32 %v823_v54, %v5417_v57  ;;  %v682_v54 = vmul.f32 %v5343_v16, %v5382_v44  ;;  %vm888_vm1 = vcmask 416768  }
 0x14a   : > { %v5432_v42 = vmul.f32 %v5347_v18, %v5420_v48  ;;  %v5440_v29 = vmul.f32 %v1016_v62, %v5420_v48  ;;  %v5447_v9 = vmul.f32 %v5355_v24, %v5420_v48 }
 0x14b   : > { %624 = vrot.lane.b32.xlu1 %v616_v52, %s7590_s24  ;;  %591 = vrot.lane.b32.xlu0 %v583_v55, %s7577_s8  ;;  %v1020_v52 = vsel %vm1019_vm4, %v1016_v62, %v5367_v35  ;;  %v550_v55 = vmul.f32 %v5315_v0, %v5382_v44  ;;  %v5459_v62 = vmul.f32 %v5361_v31, %v5420_v48  ;;  %s5045_s8 = smov 79   ;;  %vm756_vm4 = vcmask 293888  }
 0x14c   : > { %v5443_v14 = vmul.f32 %v1020_v52, %v5417_v57  ;;  %v4368_v18 = vpack.i.bf16 %v5435_v50, %v5432_v42  ;;  %v5464_v52 = vmul.f32 %v1053_v38, %v5417_v57  ;;  %v4383_v61 = vpack.i.bf16 %v5455_v23, %v5447_v9  ;;  %v7704_v23 = vld [vmem:[#allocation18_spill] sm:$0xff] }
 0x14d   : > { %v649_v31 = vmul.f32 %v5325_v5, %v5382_v44  ;;  %v862_v38 = vmul.f32 %v5371_v37, %v5382_v44 }
 0x14e   : > { %v4398_v24 = vpack.i.bf16 %v5443_v14, %v5440_v29 }
 0x151   : > { %558 = vrot.lane.b32.xlu2 %v550_v55, %s7586_s26  ;;  %v829_v55 = vmul.f32 %v5363_v32, %v5382_v44  ;;  %v445_v32 = vsel %vm7667_vm6, %v5327_v6, %v5297_v51  ;;  %v544_v51 = vsel %vm7668_vm7, %v5339_v13, %v5315_v0  ;;  %v346_v0 = vsel %vm7656_vm8, %v5287_v46, %v5295_v49 }
 0x152   : > { %v647_v49 = vmul.f32 %v5353_v21, %v5420_v48  ;;  %vm1454_vm7 = vcmask 457728  }
 0x153   : > { %771 = vrot.lane.b32.xlu1 %v763_v41, %s7576_s9  ;;  %690 = vrot.lane.b32.xlu0 %v682_v54, %s7575_s25  ;;  %v730_v41 = vmul.f32 %v5349_v19, %v5382_v44  ;;  %v796_v54 = vmul.f32 %v5341_v15, %v5382_v44  ;;  %s7596_s25 = smov 80   ;;  %s7581_s9 = smov 61  }
 0x159   : > { %657 = vrot.lane.b32.xlu2 %v649_v31, %s7630_s12  ;;  %v1059_v31 = vmul.f32 %v1051_v53, %v5382_v44  ;;  %v4293_v53 = vpack.i.bf16 %v5417_v57, %v5420_v48 }
 0x15b   : > { %870 = vrot.lane.b32.xlu1 %v862_v38, %s7580_s11  ;;  %738 = vrot.lane.b32.xlu0 %v730_v41, %s7579_s21  ;;  %v895_v38 = vmul.f32 %v5351_v20, %v5382_v44  ;;  %s5046_s21 = smov 77   ;;  %v928_v41 = vmul.f32 %v5375_v39, %v5382_v44  ;;  %s5047_s11 = smov 76  }
 0x161   : > { %804 = vrot.lane.b32.xlu2 %v796_v54, %s7596_s25  ;;  %v450_v54 = vmul.f32 %v445_v32, %v5417_v57  ;;  %v1026_v32 = vmul.f32 %v5367_v35, %v5382_v44  ;;  %v351_v35 = vmul.f32 %v346_v0, %v5417_v57 }
 0x163   : > { %1067 = vrot.lane.b32.xlu1 %v1059_v31, %s7581_s9  ;;  %837 = vrot.lane.b32.xlu0 %v829_v55, %s5045_s8  ;;  %v449_v55 = vmul.f32 %v5327_v6, %v5420_v48  ;;  %v5504_v31 = vpop.permute.xlu2 %984  ;;  %s5048_s9 = smov 63   ;;  %v548_v6 = vmul.f32 %v5339_v13, %v5420_v48  ;;  %v350_v13 = vmul.f32 %v5287_v46, %v5420_v48 }
 0x164   : > { %v993_v39 = vmul.f32 %v5504_v31, %v5382_v44 }
 0x169   : > { %903 = vrot.lane.b32.xlu2 %v895_v38, %s5046_s21  ;;  %v961_v38 = vmul.f32 %v5384_v45, %v5382_v44 }
 0x16b   : > { %936 = vrot.lane.b32.xlu0 %v928_v41, %s5047_s11  ;;  %4294 = vrot.lane.b32.xlu1 %v4293_v53, %s5028_s20  ;;  %v4313_v41 = vpack.i.bf16 %v450_v54, %v449_v55  ;;  %v549_v53 = vmul.f32 %v544_v51, %v5417_v57  ;;  %s5049_s20 = smov 62   ;;  %v1092_v55 = vmul.f32 %v5403_v60, %v5382_v44 }
 0x16c   : > { %v643_v44 = vsel %vm7589_vm10, %v5353_v21, %v5325_v5  ;;  %v4298_v51 = vpack.i.bf16 %v351_v35, %v350_v13  ;;  %v379_v5 = vsel %vm7657_vm11, %v5293_v47, %v5302_v56  ;;  %v794_v56 = vmul.f32 %v5365_v34, %v5420_v48 }
 0x16d   : > { %v4328_v54 = vpack.i.bf16 %v549_v53, %v548_v6  ;;  %v384_v21 = vmul.f32 %v379_v5, %v5417_v57  ;;  %v511_v53 = vsel %vm7602_vm12, %v5323_v4, %v5333_v10  ;;  %v757_v5 = vsel %vm756_vm4, %v5357_v26, %v5359_v28 }
 0x16e   : > { %vm7603_vm4 = vcmask 523264   ;;  %vm7595_vm10 = vcmask 883712   ;;  %vm872_vm12 = vcmask 637952  }
 0x171   : > { %1001 = vrot.lane.b32.xlu2 %v993_v39, %s5048_s9  ;;  %v412_v39 = vsel %vm7658_vm9, %v5311_v63, %v5319_v2 }
 0x172   : > { %v417_v46 = vmul.f32 %v412_v39, %v5417_v57  ;;  %v610_v39 = vsel %vm609_vm15, %v5337_v12, %v5345_v17 }
 0x173   : > { %969 = vrot.lane.b32.xlu0 %v961_v38, %s7614_s30  ;;  %4314 = vrot.lane.b32.xlu1 %v4313_v41, %s7582_s14  ;;  %s5050_s14 = smov 60   ;;  %v648_v38 = vmul.f32 %v643_v44, %v5417_v57  ;;  %v416_v41 = vmul.f32 %v5311_v63, %v5420_v48  ;;  %v383_v63 = vmul.f32 %v5293_v47, %v5420_v48 }
 0x174   : > { %v516_v47 = vmul.f32 %v511_v53, %v5417_v57  ;;  %v889_v44 = vsel %vm888_vm1, %v5377_v40, %v5351_v20  ;;  %v577_v20 = vsel %vm576_vm2, %v5321_v3, %v5331_v8  ;;  %vm855_vm1 = vcmask 408576  }
 0x175   : > { %v4343_v2 = vpack.i.bf16 %v648_v38, %v647_v49  ;;  %v4308_v6 = vpack.i.bf16 %v417_v46, %v416_v41  ;;  %v4303_v0 = vpack.i.bf16 %v384_v21, %v383_v63  ;;  %v894_v49 = vmul.f32 %v889_v44, %v5417_v57 }
 0x176   : > { %v614_v38 = vmul.f32 %v5337_v12, %v5420_v48  ;;  %v615_v41 = vmul.f32 %v610_v39, %v5417_v57  ;;  %v581_v12 = vmul.f32 %v5321_v3, %v5420_v48  ;;  %v762_v21 = vmul.f32 %v757_v5, %v5417_v57 }
 0x177   : > { %v856_v28 = vsel %vm855_vm1, %v5369_v36, %v5371_v37  ;;  %vm7588_vm1 = vcmask 654336  }
 0x179   : > { %1034 = vrot.lane.b32.xlu2 %v1026_v32, %s5049_s20  ;;  %v790_v32 = vsel %vm7593_vm13, %v5365_v34, %v5341_v15  ;;  %v478_v15 = vsel %vm7601_vm14, %v5306_v58, %v5317_v1  ;;  %v5569_v34 = vpop.permute.xlu2 %1272  ;;  %v893_v1 = vmul.f32 %v5377_v40, %v5420_v48  ;;  %vm1102_vm13 = vcmask 490496  }
 0x17a   : > { %v483_v35 = vmul.f32 %v478_v15, %v5417_v57  ;;  %v728_v15 = vmul.f32 %v5335_v11, %v5420_v48  ;;  %vm1003_vm14 = vcmask 515072  }
 0x17b   : > { %1100 = vrot.lane.b32.xlu0 %v1092_v55, %s5050_s14  ;;  %4329 = vrot.lane.b32.xlu1 %v4328_v54, %s7586_s26  ;;  %v795_v55 = vmul.f32 %v790_v32, %v5417_v57  ;;  %v515_v54 = vmul.f32 %v5323_v4, %v5420_v48  ;;  %v482_v4 = vmul.f32 %v5306_v58, %v5420_v48  ;;  %v983_v58 = vpop.permute.xlu1 %982  ;;  %s7697_s26 = smov 95  }
 0x17c   : > { %v4378_v17 = vpack.i.bf16 %v894_v49, %v893_v1  ;;  %v987_v40 = vsel %vm986_vm3, %v983_v58, %v5504_v31  ;;  %v991_v63 = vmul.f32 %v983_v58, %v5420_v48  ;;  %v761_v31 = vmul.f32 %v5357_v26, %v5420_v48 }
 0x17d   : > { %v4363_v10 = vpack.i.bf16 %v795_v55, %v794_v56  ;;  %v4323_v13 = vpack.i.bf16 %v516_v47, %v515_v54  ;;  %v4318_v46 = vpack.i.bf16 %v483_v35, %v482_v4  ;;  %v992_v8 = vmul.f32 %v987_v40, %v5417_v57 }
 0x17e   : > { %v4358_v32 = vpack.i.bf16 %v762_v21, %v761_v31  ;;  %v676_v56 = vsel %vm675_vm5, %v5329_v7, %v5343_v16  ;;  %v680_v26 = vmul.f32 %v5329_v7, %v5420_v48  ;;  %v860_v47 = vmul.f32 %v5369_v36, %v5420_v48  ;;  %v7706_v31 = vld [vmem:[#allocation16_spill] sm:$0xff] }
 0x17f   : > { %v4393_v3 = vpack.i.bf16 %v992_v8, %v991_v63  ;;  %v681_v54 = vmul.f32 %v676_v56, %v5417_v57  ;;  %vm723_vm3 = vcmask 285696   ;;  %vm1085_vm5 = vcmask 556032  }
 0x180   : > { %v955_v7 = vsel %vm7603_vm4, %v5379_v43, %v5384_v45 }
 0x181   : > { %4299 = vrot.lane.b32.xlu2 %v4298_v51, %s7606_s6  ;;  %v4338_v51 = vpack.i.bf16 %v615_v41, %v614_v38  ;;  %v4348_v16 = vpack.i.bf16 %v681_v54, %v680_v26  ;;  %v960_v35 = vmul.f32 %v955_v7, %v5417_v57  ;;  %v7708_v26 = vld [vmem:[#allocation17_spill] sm:$0xff]  ;;  %v5750_v7 = vld [vmem:[#allocation9 + $0x100] sm:$0xff]  ;;  %s7711_s6 = smov 3  }
 0x183   : > { %4344 = vrot.lane.b32.xlu1 %v4343_v2, %s7630_s12  ;;  %4309 = vrot.lane.b32.xlu0 %v4308_v6, %s7616_s5  ;;  %v582_v6 = vmul.f32 %v577_v20, %v5417_v57  ;;  %s5059_s5 = smov 13  }
 0x185   : > { %v4333_v53 = vpack.i.bf16 %v582_v6, %v581_v12  ;;  %v5722_v6 = vld [vmem:[#allocation9 + $0x198] sm:$0xff] }
 0x189   : > { %4304 = vrot.lane.b32.xlu2 %v4303_v0, %s7608_s10  ;;  %v861_v0 = vmul.f32 %v856_v28, %v5417_v57  ;;  %v5736_v28 = vld [vmem:[#allocation9 + $0x78] sm:$0xff]  ;;  %s7712_s10 = smov 1  }
 0x18b   : > { %4364 = vrot.lane.b32.xlu1 %v4363_v10, %s7596_s25  ;;  %4324 = vrot.lane.b32.xlu0 %v4323_v13, %s7584_s13  ;;  %s7696_s13 = smov 92   ;;  %v4373_v37 = vpack.i.bf16 %v861_v0, %v860_v47  ;;  %v724_v10 = vsel %vm723_vm3, %v5335_v11, %v5349_v19  ;;  %v1086_v13 = vsel %vm1085_vm5, %v5401_v59, %v5403_v60  ;;  %vm773_vm3 = vcmask 752640  }
 0x18c   : > { %v729_v4 = vmul.f32 %v724_v10, %v5417_v57  ;;  %v1090_v19 = vmul.f32 %v5401_v59, %v5420_v48  ;;  %v1091_v45 = vmul.f32 %v1086_v13, %v5417_v57  ;;  %v959_v60 = vmul.f32 %v5379_v43, %v5420_v48  ;;  %v7709_v10 = vld [vmem:[#allocation19_spill] sm:$0xff]  ;;  %v5752_v13 = vld [vmem:[#allocation9 + $0x190] sm:$0xff] }
 0x18d   : > { %vm740_vm5 = vcmask 760832  }
 0x18e   : > { %v4353_v39 = vpack.i.bf16 %v729_v4, %v728_v15  ;;  %v4388_v44 = vpack.i.bf16 %v960_v35, %v959_v60 }
 0x191   : > { %4319 = vrot.lane.b32.xlu2 %v4318_v46, %s7620_s7 }
 0x193   : > { %v5592_v2 = vpop.permute.xlu2 %705  ;;  %4379 = vrot.lane.b32.xlu1 %v4378_v17, %s5046_s21  ;;  %4339 = vrot.lane.b32.xlu0 %v4338_v51, %s7590_s24  ;;  %s7695_s21 = smov 109   ;;  %s7618_s24 = smov 10  }
 0x199   : > { %4334 = vrot.lane.b32.xlu2 %v4333_v53, %s7695_s21 }
 0x19b   : > { %v5611_v55 = vpop.permute.xlu2 %360  ;;  %4394 = vrot.lane.b32.xlu1 %v4393_v3, %s5048_s9  ;;  %4359 = vrot.lane.b32.xlu0 %v4358_v32, %s7696_s13  ;;  %s7698_s9 = smov 2   ;;  %s7699_s13 = smov 78  }
 0x1a1   : > { %4349 = vrot.lane.b32.xlu2 %v4348_v16, %s7697_s26  ;;  %s7700_s26 = smov 93  }
 0x1a3   : > { %v5629_v36 = vpop.permute.xlu2 %459  ;;  %1304 = vrot.lane.b32.xlu1 %v5269_v27, %s7698_s9  ;;  %4374 = vrot.lane.b32.xlu0 %v4373_v37, %s7699_s13  ;;  %v4403_v27 = vpack.i.bf16 %v1091_v45, %v1090_v19  ;;  %s7701_s13 = smov 4  }
 0x1a9   : > { %4354 = vrot.lane.b32.xlu2 %v4353_v39, %s7700_s26  ;;  %s7707_s26 = smov 32  }
 0x1ab   : > { %v5644_v1 = vpop.permute.xlu2 %558  ;;  %4404 = vrot.lane.b32.xlu1 %v4403_v27, %s5050_s14  ;;  %4389 = vrot.lane.b32.xlu0 %v4388_v44, %s7614_s30  ;;  %s7702_s14 = smov 61  }
 0x1ad   : > { %v5648_v11 = vpop.permute.xlu1 %426  ;;  %v5650_v59 = vpop.permute.xlu0 %393 }
 0x1b1   : > { %4369 = vrot.lane.b32.xlu2 %v4368_v18, %s5045_s8  ;;  %s7635_s8 = smov 5  }
 0x1b3   : > { %v5656_v43 = vpop.permute.xlu2 %657  ;;  %4399 = vrot.lane.b32.xlu0 %v4398_v24, %s5049_s20  ;;  %1348 = vrot.lane.b32.xlu1 %v5276_v30, %s7701_s13  ;;  %v7703_v30 = vpack.i.bf16 %v5464_v52, %v5459_v62  ;;  %s7705_s20 = smov 16  }
 0x1b5   : > { %v5664_v49 = vpop.permute.xlu1 %525  ;;  %v5666_v38 = vpop.permute.xlu0 %492 }
 0x1b9   : > { %4384 = vrot.lane.b32.xlu2 %v4383_v61, %s5047_s11  ;;  %s7612_s11 = smov 6  }
 0x1bb   : > { %v805_v42 = vpop.permute.xlu2 %804  ;;  %1302 = vrot.lane.b32.xlu0 %v5257_v22, %s7698_s9  ;;  %1376 = vrot.lane.b32.xlu1 %v5279_v33, %s7635_s8 }
 0x1bd   : > { %v5676_v14 = vpop.permute.xlu1 %624  ;;  %v5678_v29 = vpop.permute.xlu0 %591 }
 0x1c1   : > { %4409 = vrot.lane.b32.xlu2 %v7703_v30, %s7702_s14  ;;  %s5053_s14 = smov 9  }
 0x1c3   : > { %v5684_v50 = vpop.permute.xlu2 %903  ;;  %1346 = vrot.lane.b32.xlu0 %v5264_v25, %s7701_s13  ;;  %1556 = vrot.lane.b32.xlu1 %v5736_v28, %s7707_s26 }
 0x1c5   : > { %v772_v9 = vpop.permute.xlu1 %771  ;;  %v5688_v22 = vpop.permute.xlu0 %690 }
 0x1c9   : > { %1378 = vrot.lane.b32.xlu2 %v7704_v23, %s7635_s8  ;;  %v7710_v23 = vld [vmem:[#allocation20_spill] sm:$0xff] }
 0x1cb   : > { %v5692_v33 = vpop.permute.xlu2 %1001  ;;  %1411 = vrot.lane.b32.xlu0 %v5722_v6, %s7612_s11  ;;  %1600 = vrot.lane.b32.xlu1 %v7709_v10, %s7614_s30 }
 0x1cd   : > { %v5694_v18 = vpop.permute.xlu1 %870  ;;  %v5696_v24 = vpop.permute.xlu0 %738 }
 0x1d1   : > { %1409 = vrot.lane.b32.xlu2 %v5752_v13, %s7612_s11 }
 0x1d3   : > { %v5698_v61 = vpop.permute.xlu2 %1034  ;;  %1526 = vrot.lane.b32.xlu0 %v7706_v31, %s7705_s20  ;;  %1628 = vrot.lane.b32.xlu1 %v7710_v23, %s7596_s25  ;;  %v5766_v31 = vld [vmem:[#allocation9 + $0x20] sm:$0xff] }
 0x1d5   : > { %v5700_v62 = vpop.permute.xlu1 %1067  ;;  %v5702_v52 = vpop.permute.xlu0 %837 }
 0x1d9   : > { %1524 = vrot.lane.b32.xlu2 %v5766_v31, %s7705_s20 }
 0x1db   : > { %v5704_v41 = vpop.permute.xlu2 %4299  ;;  %1554 = vrot.lane.b32.xlu0 %v7708_v26, %s7707_s26 }
 0x1dd   : > { %v5706_v25 = vpop.permute.xlu1 %4294  ;;  %v5708_v58 = vpop.permute.xlu0 %936 }
 0x1de   : > { %v4297_v27 = vunpack.i.h.bf16 %v5706_v25  ;;  %v4296_v44 = vunpack.i.l.bf16 %v5706_v25 }
 0x1e3   : > { %v5710_v46 = vpop.permute.xlu2 %4304  ;;  %1598 = vrot.lane.b32.xlu0 %v5750_v7, %s7614_s30 }
 0x1e5   : > { %v5712_v17 = vpop.permute.xlu1 %4314  ;;  %v5714_v51 = vpop.permute.xlu0 %969 }
 0x1eb   : > { %v5716_v20 = vpop.permute.xlu2 %4319 }
 0x1ec   : > { %v4321_v23 = vunpack.i.l.bf16 %v5716_v20 }
 0x1ed   : > { %v5718_v40 = vpop.permute.xlu1 %4329  ;;  %v5720_v12 = vpop.permute.xlu0 %1100 }
 0x1f3   : > { %v5726_v5 = vpop.permute.xlu2 %4334 }
 0x1f5   : > { %v5728_v63 = vpop.permute.xlu1 %4344  ;;  %v5730_v8 = vpop.permute.xlu0 %4309 }
 0x1f6   : > { %v4346_v25 = vunpack.i.l.bf16 %v5728_v63 }
 0x1fb   : > { %v4350_v21 = vpop.permute.xlu2 %4349 }
 0x1fd   : > { %v4365_v53 = vpop.permute.xlu1 %4364  ;;  %v5734_v3 = vpop.permute.xlu0 %4324 }
 0x1fe   : > { %v4367_v32 = vunpack.i.h.bf16 %v4365_v53  ;;  %v4366_v56 = vunpack.i.l.bf16 %v4365_v53  ;;  %v4352_v53 = vunpack.i.h.bf16 %v4350_v21 }
 0x200   : > { %v807_v54 = vsel %vm7588_vm1, %v4366_v56, %v4367_v32  ;;  %v808_v47 = vsel %vm7588_vm1, %v4367_v32, %v805_v42  ;;  %vm707_vm1 = vcmask 769024   ;;  %v4351_v32 = vunpack.i.l.bf16 %v4350_v21 }
 0x201   : > { %1166 = vmatpush.msra.mxu2 %v807_v54  ;;  %1206 = vmatpush.msra.mxu0 %v808_v47  ;;  %v708_v47 = vsel %vm707_vm1, %v4296_v44, %v4297_v27 }
 0x203   : > { %v4355_v0 = vpop.permute.xlu2 %4354 }
 0x204   : > { %v4357_v45 = vunpack.i.h.bf16 %v4355_v0  ;;  %v4356_v60 = vunpack.i.l.bf16 %v4355_v0  ;;  %v709_v0 = vsel %vm707_vm1, %v4297_v27, %v5592_v2  ;;  %v5785_v2 = vld [vmem:[#allocation9 + $0x1f8] sm:$0xff]  ;;  %v4336_v27 = vunpack.i.l.bf16 %v5726_v5 }
 0x205   : > { %v5744_v16 = vpop.permute.xlu1 %4379  ;;  %v5746_v37 = vpop.permute.xlu0 %4339  ;;  %2033 = vrot.lane.b32.xlu0 %v5785_v2, %s7618_s24  ;;  %vm7594_vm1 = vcmask 891904  }
 0x206   : > { %v741_v56 = vsel %vm740_vm5, %v4356_v60, %v4357_v45  ;;  %v742_v26 = vsel %vm740_vm5, %v4357_v45, %v5696_v24  ;;  %vm7592_vm5 = vcmask 785408   ;;  %v4342_v24 = vunpack.i.h.bf16 %v5746_v37 }
 0x20b   : > { %v5758_v15 = vpop.permute.xlu2 %4369 }
 0x20d   : > { %v5760_v4 = vpop.permute.xlu1 %4394  ;;  %v4360_v19 = vpop.permute.xlu0 %4359 }
 0x20e   : > { %v4362_v35 = vunpack.i.h.bf16 %v4360_v19  ;;  %v4361_v39 = vunpack.i.l.bf16 %v4360_v19  ;;  %v4341_v19 = vunpack.i.l.bf16 %v5746_v37 }
 0x210   : > { %v774_v42 = vsel %vm773_vm3, %v4361_v39, %v4362_v35  ;;  %v775_v30 = vsel %vm773_vm3, %v4362_v35, %v772_v9  ;;  %vm692_vm3 = vcmask 777216   ;;  %v4347_v9 = vunpack.i.h.bf16 %v5728_v63  ;;  %v5783_v63 = vld [vmem:[#allocation9 + $0x1e0] sm:$0xff]  ;;  %v5787_v35 = vld [vmem:[#allocation9 + $0x158] sm:$0xff] }
 0x211   : > { %1167 = vmatpush.msra.mxu2 %v774_v42  ;;  %1207 = vmatpush.msra.mxu0 %v775_v30  ;;  %v693_v45 = vsel %vm692_vm3, %v4351_v32, %v4352_v53  ;;  %v694_v60 = vsel %vm692_vm3, %v4352_v53, %v5688_v22  ;;  %v4337_v39 = vunpack.i.h.bf16 %v5726_v5  ;;  %v4332_v22 = vunpack.i.h.bf16 %v5718_v40 }
 0x212   : > { %v660_v44 = vsel %vm7592_vm5, %v4346_v25, %v4347_v9  ;;  %v661_v37 = vsel %vm7592_vm5, %v4347_v9, %v5656_v43  ;;  %1998 = vrot.lane.b32.xlu1 %v5783_v63, %s5053_s14  ;;  %v4331_v42 = vunpack.i.l.bf16 %v5718_v40  ;;  %v627_v5 = vsel %vm7595_vm10, %v4341_v19, %v4342_v24  ;;  %1630 = vrot.lane.b32.xlu2 %v5787_v35, %s7596_s25  ;;  %s7604_s25 = smov 8  }
 0x213   : > { %v5771_v54 = vpop.permute.xlu2 %4384  ;;  %1168 = vmatpush.msra.mxu2 %v741_v56  ;;  %1208 = vmatpush.msra.mxu0 %v742_v26  ;;  %v628_v43 = vsel %vm7595_vm10, %v4342_v24, %v5676_v14  ;;  %vm7598_vm3 = vcmask 900096   ;;  %v4322_v30 = vunpack.i.h.bf16 %v5716_v20  ;;  %v4327_v40 = vunpack.i.h.bf16 %v5734_v3 }
 0x214   : > { %v4326_v32 = vunpack.i.l.bf16 %v5734_v3  ;;  %v594_v56 = vsel %vm7594_vm1, %v4336_v27, %v4337_v39  ;;  %v595_v14 = vsel %vm7594_vm1, %v4337_v39, %v5678_v29  ;;  %v561_v25 = vsel %vm7598_vm3, %v4331_v42, %v4332_v22  ;;  %v1655_v42 = vld [vmem:[#allocation9 + $0x1b0] sm:$0xff]  ;;  %1966 = vrot.lane.b32.xlu0 %v5752_v13, %s7604_s25 }
 0x215   : > { %v5776_v10 = vpop.permute.xlu1 %1304  ;;  %v5778_v21 = vpop.permute.xlu0 %4374  ;;  %1169 = vmatpush.msra.mxu2 %v708_v47  ;;  %1209 = vmatpush.msra.mxu0 %v709_v0  ;;  %v562_v20 = vsel %vm7598_vm3, %v4332_v22, %v5644_v1  ;;  %vm7599_vm5 = vcmask 908288   ;;  %v4317_v19 = vunpack.i.h.bf16 %v5712_v17  ;;  %vm7600_vm1 = vcmask 916480  }
 0x216   : > { %vm1069_vm10 = vcmask 498688   ;;  %v4316_v29 = vunpack.i.l.bf16 %v5712_v17  ;;  %v4312_v1 = vunpack.i.h.bf16 %v5730_v8  ;;  %v4311_v27 = vunpack.i.l.bf16 %v5730_v8 }
 0x217   : > { %1170 = vmatpush.msra.mxu2 %v693_v45  ;;  %1210 = vmatpush.msra.mxu0 %v694_v60  ;;  %v528_v45 = vsel %vm7599_vm5, %v4326_v32, %v4327_v40  ;;  %vm461_vm3 = vcmask 1014784   ;;  %v495_v17 = vsel %vm7600_vm1, %v4321_v23, %v4322_v30  ;;  %v4306_v22 = vunpack.i.l.bf16 %v5710_v46 }
 0x218   : > { %v496_v8 = vsel %vm7600_vm1, %v4322_v30, %v5666_v38  ;;  %v4301_v23 = vunpack.i.l.bf16 %v5704_v41  ;;  %vm1036_vm1 = vcmask 506880   ;;  %v4397_v30 = vunpack.i.h.bf16 %v5760_v4 }
 0x219   : > { %1171 = vmatpush.msra.mxu2 %v660_v44  ;;  %1211 = vmatpush.msra.mxu0 %v661_v37  ;;  %v529_v44 = vsel %vm7599_vm5, %v4327_v40, %v5664_v49  ;;  %v4307_v37 = vunpack.i.h.bf16 %v5710_v46  ;;  %vm395_vm5 = vcmask 1031168   ;;  %v463_v46 = vsel %vm461_vm3, %v4317_v19, %v5629_v36 }
 0x21a   : > { %1968 = vrot.lane.b32.xlu1 %v5722_v6, %s7604_s25  ;;  %v4396_v40 = vunpack.i.l.bf16 %v5760_v4  ;;  %1659 = vrot.lane.b32.xlu2 %v1655_v42, %s7630_s12  ;;  %s7610_s25 = smov 7   ;;  %v5903_v42 = vld [vmem:[#allocation9 + $0x180] sm:$0xff] }
 0x21b   : > { %v4410_v53 = vpop.permute.xlu2 %4409  ;;  %1172 = vmatpush.msra.mxu2 %v627_v5  ;;  %1212 = vmatpush.msra.mxu0 %v628_v43  ;;  %v4302_v5 = vunpack.i.h.bf16 %v5704_v41  ;;  %v462_v43 = vsel %vm461_vm3, %v4316_v29, %v4317_v19  ;;  %v396_v41 = vsel %vm395_vm5, %v4306_v22, %v4307_v37  ;;  %v1005_v19 = vsel %vm1003_vm14, %v4397_v30, %v5692_v33 }
 0x21c   : > { %v4412_v47 = vunpack.i.h.bf16 %v4410_v53  ;;  %v4411_v0 = vunpack.i.l.bf16 %v4410_v53  ;;  %v4382_v29 = vunpack.i.h.bf16 %v5744_v16  ;;  %v4376_v33 = vunpack.i.l.bf16 %v5778_v21 }
 0x21d   : > { %v4405_v26 = vpop.permute.xlu1 %4404  ;;  %v5812_v9 = vpop.permute.xlu0 %4389  ;;  %1173 = vmatpush.msra.mxu2 %v594_v56  ;;  %1213 = vmatpush.msra.mxu0 %v595_v14 }
 0x21e   : > { %v4407_v3 = vunpack.i.h.bf16 %v4405_v26  ;;  %v4406_v24 = vunpack.i.l.bf16 %v4405_v26  ;;  %v1071_v49 = vsel %vm1069_vm10, %v4412_v47, %v5700_v62  ;;  %v5843_v62 = vld [vmem:[#allocation9 + $0xc0] sm:$0xff]  ;;  %v4392_v14 = vunpack.i.h.bf16 %v5812_v9 }
 0x21f   : > { %1174 = vmatpush.msra.mxu2 %v561_v25  ;;  %1214 = vmatpush.msra.mxu0 %v562_v20  ;;  %v4391_v26 = vunpack.i.l.bf16 %v5812_v9  ;;  %v330_v20 = vld [vmem:[#allocation9] sm:$0xff]  ;;  %v4386_v9 = vunpack.i.l.bf16 %v5771_v54 }
 0x220   : > { %v1103_v60 = vsel %vm1102_vm13, %v4406_v24, %v4407_v3  ;;  %v1104_v39 = vsel %vm1102_vm13, %v4407_v3, %v5720_v12  ;;  %v1070_v12 = vsel %vm1069_vm10, %v4411_v0, %v4412_v47  ;;  %vm428_vm13 = vcmask 1022976   ;;  %v331_v47 = vld [vmem:[#allocation9 + $0x8] sm:$0xff] }
 0x221   : > { %1175 = vmatpush.msra.mxu2 %v528_v45  ;;  %1193 = vmatpush.msrb.mxu3 %v1103_v60  ;;  %v429_v38 = vsel %vm428_vm13, %v4311_v27, %v4312_v1  ;;  %v430_v36 = vsel %vm428_vm13, %v4312_v1, %v5648_v11  ;;  %vm362_vm10 = vcmask 1039360   ;;  %v397_v11 = vsel %vm395_vm5, %v4307_v37, %v5650_v59  ;;  %v5878_v1 = vld [vmem:[#allocation9 + $0xd8] sm:$0xff]  ;;  %v5882_v27 = vld [vmem:[#allocation9 + $0x1f0] sm:$0xff]  ;;  %v316_v37 = vld [vmem:[#allocation6 + $0x10] sm:$0xff] }
 0x222   : > { %1215 = vmatpush.msra.mxu0 %v529_v44  ;;  %1233 = vmatpush.msrb.mxu1 %v1104_v39  ;;  %v4387_v0 = vunpack.i.h.bf16 %v5771_v54  ;;  %v363_v3 = vsel %vm362_vm10, %v4301_v23, %v4302_v5  ;;  %v364_v24 = vsel %vm362_vm10, %v4302_v5, %v5611_v55  ;;  %v332_v59 = vmul.f32 %v330_v20, %v5420_v48  ;;  %v315_v39 = vld [vmem:[#allocation6 + $0x8] sm:$0xff]  ;;  %v1930_v5 = vld [vmem:[#allocation9 + $0xd0] sm:$0xff]  ;;  %v1901_v23 = vld [vmem:[#allocation9 + $0xc8] sm:$0xff] }
 0x223   : > { %1176 = vmatpush.msra.mxu2 %v495_v17  ;;  %1194 = vmatpush.msrb.mxu3 %v1070_v12  ;;  %v4381_v54 = vunpack.i.l.bf16 %v5744_v16  ;;  %v971_v45 = vsel %vm7603_vm4, %v4391_v26, %v4392_v14  ;;  %v333_v60 = vmul.f32 %v331_v47, %v5417_v57  ;;  %v972_v55 = vsel %vm7603_vm4, %v4392_v14, %v5714_v51  ;;  %v5887_v17 = vld [vmem:[#allocation9 + $0xb8] sm:$0xff]  ;;  %v2182_v14 = vld [vmem:[#allocation9 + $0x1a8] sm:$0xff]  ;;  %v2383_v20 = vld [vmem:[#allocation9 + $0x230] sm:$0xff] }
 0x224   : > { %1216 = vmatpush.msra.mxu0 %v496_v8  ;;  %1234 = vmatpush.msrb.mxu1 %v1071_v49  ;;  %v4377_v48 = vunpack.i.h.bf16 %v5778_v21  ;;  %v4372_v51 = vunpack.i.h.bf16 %v5758_v15  ;;  %v4371_v44 = vunpack.i.l.bf16 %v5758_v15  ;;  %vm839_vm4 = vcmask 646144   ;;  %v5901_v8 = vld [vmem:[#allocation9 + $0xb0] sm:$0xff]  ;;  %v1995_v49 = vld [vmem:[#allocation9 + $0x1e8] sm:$0xff]  ;;  %v2384_v26 = vld [vmem:[#allocation9 + $0x238] sm:$0xff] }
 0x225   : > { %v4400_v53 = vpop.permute.xlu0 %4399  ;;  %1177 = vmatpush.msra.mxu2 %v462_v43  ;;  %1904 = vrot.lane.b32.xlu1 %v5843_v62, %s7612_s11  ;;  %v5919_v43 = vld [vmem:[#allocation9 + $0x1d0] sm:$0xff]  ;;  %v2353_v47 = vld [vmem:[#allocation9 + $0x228] sm:$0xff] }
 0x226   : > { %v4402_v32 = vunpack.i.h.bf16 %v4400_v53  ;;  %v4401_v56 = vunpack.i.l.bf16 %v4400_v53  ;;  %1217 = vmatpush.msra.mxu0 %v463_v46  ;;  %1936 = vrot.lane.b32.xlu0 %v5878_v1, %s7610_s25  ;;  %v874_v15 = vsel %vm872_vm12, %v4377_v48, %v5694_v18  ;;  %v841_v22 = vsel %vm839_vm4, %v4372_v51, %v5702_v52  ;;  %v5910_v18 = vld [vmem:[#allocation9 + $0xa8] sm:$0xff]  ;;  %v5912_v52 = vld [vmem:[#allocation9 + $0x1d8] sm:$0xff]  ;;  %v2151_v46 = vld [vmem:[#allocation9 + $0x210] sm:$0xff] }
 0x227   : > { %1178 = vmatpush.msra.mxu2 %v429_v38  ;;  %2031 = vrot.lane.b32.xlu2 %v5882_v27, %s7618_s24  ;;  %v1656_v53 = vld [vmem:[#allocation9 + $0x1b8] sm:$0xff]  ;;  %v5925_v38 = vld [vmem:[#allocation9 + $0xa0] sm:$0xff]  ;;  %s5060_s24 = smov 12  }
 0x228   : > { %1218 = vmatpush.msra.mxu0 %v430_v36  ;;  %v1037_v4 = vsel %vm1036_vm1, %v4401_v56, %v4402_v32  ;;  %v1038_v25 = vsel %vm1036_vm1, %v4402_v32, %v5698_v61  ;;  %v1004_v61 = vsel %vm1003_vm14, %v4396_v40, %v4397_v30  ;;  %vm938_vm1 = vcmask 621568   ;;  %v2152_v30 = vld [vmem:[#allocation9 + $0x218] sm:$0xff]  ;;  %v2212_v40 = vld [vmem:[#allocation9 + $0x28] sm:$0xff]  ;;  %v2181_v56 = vld [vmem:[#allocation9 + $0x1a0] sm:$0xff] }
 0x229   : > { %1179 = vmatpush.msra.mxu2 %v396_v41  ;;  %1195 = vmatpush.msrb.mxu3 %v1037_v4  ;;  %vm905_vm14 = vcmask 629760   ;;  %v939_v16 = vsel %vm938_vm1, %v4386_v9, %v4387_v0  ;;  %v940_v57 = vsel %vm938_vm1, %v4387_v0, %v5708_v58  ;;  %v873_v58 = vsel %vm872_vm12, %v4376_v33, %v4377_v48  ;;  %v5931_v32 = vld [vmem:[#allocation9 + $0x188] sm:$0xff]  ;;  %v2241_v36 = vld [vmem:[#allocation9 + $0x70] sm:$0xff]  ;;  %v5937_v41 = vpop.permute.xlu1 %1348  ;;  %v2352_v4 = vld [vmem:[#allocation9 + $0x220] sm:$0xff] }
 0x22a   : > { %1219 = vmatpush.msra.mxu0 %v397_v11  ;;  %1235 = vmatpush.msrb.mxu1 %v1038_v25  ;;  %v906_v21 = vsel %vm905_vm14, %v4381_v54, %v4382_v29  ;;  %v907_v12 = vsel %vm905_vm14, %v4382_v29, %v5684_v50  ;;  %vm1162_vm1 = vcmask 588800   ;;  %v840_v50 = vsel %vm839_vm4, %v4371_v44, %v4372_v51 }
 0x22b   : > { %1180 = vmatpush.msra.mxu2 %v363_v3  ;;  %1196 = vmatpush.msrb.mxu3 %v1004_v61  ;;  %vm7647_vm12 = vcmask 39936   ;;  %vm7669_vm4 = vcmask 48128   ;;  %vm7666_vm14 = vcmask 72704  }
 0x22c   : > { %1220 = vmatpush.msra.mxu0 %v364_v24  ;;  %1236 = vmatpush.msrb.mxu1 %v1005_v19 }
 0x22d   : > { %1181 = vmatpush.msra.mxu2 %v332_v59  ;;  %1197 = vmatpush.msrb.mxu3 %v971_v45  ;;  %v1160_v45 = vld [vmem:[#allocation8 + $0x10] sm:$0xff] }
 0x22e   : > { %1221 = vmatpush.msra.mxu0 %v333_v60  ;;  %1237 = vmatpush.msrb.mxu1 %v972_v55 }
 0x22f   : > { %1198 = vmatpush.msrb.mxu3 %v939_v16  ;;  %1182 = vmatmul.f32.vlgmr.msra.gmra.mxu2 %v315_v39  ;;  %v5996_v16 = vpop.permute.xlu2 %1378 }
 0x230   : > { %1238 = vmatpush.msrb.mxu1 %v940_v57  ;;  %1222 = vmatmul.f32.vlgmr.msra.gmra.mxu0 %v315_v39 }
 0x231   : > { %1199 = vmatpush.msrb.mxu3 %v906_v21  ;;  %1862 = vrot.lane.b32.xlu1 %v5887_v17, %s7701_s13  ;;  %v5943_v25 = vpop.permute.xlu1 %1376 }
 0x232   : > { %1239 = vmatpush.msrb.mxu1 %v907_v12  ;;  %1860 = vrot.lane.b32.xlu0 %v5901_v8, %s7701_s13 }
 0x233   : > { %1200 = vmatpush.msrb.mxu3 %v873_v58  ;;  %2000 = vrot.lane.b32.xlu2 %v1995_v49, %s5053_s14 }
 0x234   : > { %1240 = vmatpush.msrb.mxu1 %v874_v15 }
 0x235   : > { %1201 = vmatpush.msrb.mxu3 %v840_v50 }
 0x236   : > { %1241 = vmatpush.msrb.mxu1 %v841_v22  ;;  %4122 = vmatmul.msk.f32.vlgmr.msrb.gmra.mxu3 %vm1162_vm1, %v316_v37 }
 0x237   : > { %4123 = vmatmul.msk.f32.vlgmr.msrb.gmra.mxu1 %vm1162_vm1, %v316_v37  ;;  %v6005_v21 = vpop.permute.xlu2 %1409  ;;  %vm2035_vm1 = vcmask 80896  }
 0x239   : > { %1800 = vrot.lane.b32.xlu1 %v5903_v42, %s7698_s9  ;;  %v5951_v11 = vpop.permute.xlu1 %1556 }
 0x23a   : > { %1832 = vrot.lane.b32.xlu0 %v5910_v18, %s7711_s6 }
 0x23b   : > { %1934 = vrot.lane.b32.xlu2 %v1930_v5, %s7610_s25  ;;  %s7713_s25 = smov 48  }
 0x23f   : > { %v6013_v58 = vpop.permute.xlu2 %1524 }
 0x240   : > { %7720 = vst [vmem:[#allocation24_spill] sm:$0xff] %v6013_v58 }
 0x241   : > { %1772 = vrot.lane.b32.xlu1 %v5912_v52, %s7712_s10 }
 0x242   : > { %1770 = vrot.lane.b32.xlu0 %v5919_v43, %s7712_s10 }
 0x243   : > { %1906 = vrot.lane.b32.xlu2 %v1901_v23, %s7612_s11  ;;  %s5057_s11 = smov 15  }
 0x249   : > { %1661 = vrot.lane.b32.xlu1 %v1656_v53, %s7630_s12 }
 0x24a   : > { %2155 = vrot.lane.b32.xlu0 %v2151_v46, %s7705_s20 }
 0x24b   : > { %1830 = vrot.lane.b32.xlu2 %v5925_v38, %s7711_s6 }
 0x251   : > { %2157 = vrot.lane.b32.xlu1 %v2152_v30, %s7705_s20 }
 0x252   : > { %2217 = vrot.lane.b32.xlu0 %v2212_v40, %s7713_s25 }
 0x253   : > { %1802 = vrot.lane.b32.xlu2 %v5931_v32, %s7698_s9 }
 0x259   : > { %2185 = vrot.lane.b32.xlu1 %v2181_v56, %s7707_s26 }
 0x25a   : > { %2245 = vrot.lane.b32.xlu0 %v2241_v36, %s7614_s30 }
 0x25b   : > { %2187 = vrot.lane.b32.xlu2 %v2182_v14, %s7707_s26 }
 0x261   : > { %2247 = vrot.lane.b32.xlu1 %v5736_v28, %s7614_s30  ;;  %s5058_s30 = smov 14   ;;  %v2315_v28 = vld [vmem:[#allocation9 + $0x150] sm:$0xff] }
 0x262   : > { %2389 = vrot.lane.b32.xlu0 %v2384_v26, %s7707_s26 }
 0x263   : > { %2215 = vrot.lane.b32.xlu2 %v5766_v31, %s7713_s25  ;;  %v5956_v31 = vpop.permute.xlu1 %1600 }
 0x264   : > { %7714 = vst [vmem:[#allocation18_spill] sm:$0xff] %v5956_v31 }
 0x269   : > { %2356 = vrot.lane.b32.xlu1 %v2352_v4, %s7705_s20 }
 0x26a   : > { %2924 = vrot.lane.b32.xlu0 %v5785_v2, %s5057_s11  ;;  %v5961_v2 = vpop.permute.xlu0 %1302 }
 0x26b   : > { %2387 = vrot.lane.b32.xlu2 %v2383_v20, %s7707_s26  ;;  %v5964_v0 = vpop.permute.xlu1 %1628 }
 0x26c   : > { %7715 = vst [vmem:[#allocation16_spill] sm:$0xff] %v5964_v0  ;;  %v6020_v50 = vpop.permute.xlu2 %1630 }
 0x271   : > { %2890 = vrot.lane.b32.xlu1 %v5783_v63, %s5058_s30 }
 0x272   : > { %2319 = vrot.lane.b32.xlu0 %v2315_v28, %s7620_s7  ;;  %v5968_v63 = vpop.permute.xlu0 %1346 }
 0x273   : > { %2358 = vrot.lane.b32.xlu2 %v2353_v47, %s7705_s20 }
 0x279   : > { %2321 = vrot.lane.b32.xlu1 %v5787_v35, %s7620_s7  ;;  %s5061_s7 = smov 11  }
 0x27a   : > { %2860 = vrot.lane.b32.xlu0 %v5722_v6, %s5059_s5  ;;  %v5976_v6 = vpop.permute.xlu0 %1411 }
 0x27b   : > { %2922 = vrot.lane.b32.xlu2 %v5882_v27, %s5057_s11  ;;  %s7637_s11 = smov 123  }
 0x281   : > { %2289 = vrot.lane.b32.xlu1 %v5750_v7, %s7630_s12  ;;  %v2286_v7 = vld [vmem:[#allocation9 + $0x108] sm:$0xff] }
 0x282   : > { %2826 = vrot.lane.b32.xlu0 %v1930_v5, %s5060_s24  ;;  %v5981_v3 = vpop.permute.xlu0 %1526 }
 0x283   : > { %2892 = vrot.lane.b32.xlu2 %v1995_v49, %s5058_s30  ;;  %v6026_v49 = vpop.permute.xlu2 %1659  ;;  %s7734_s30 = smov 125  }
 0x284   : > { %v5971_v35 = vpop.permute.xlu1 %1998  ;;  %7723 = vst [vmem:[#allocation27_spill] sm:$0xff] %v6026_v49 }
 0x289   : > { %2828 = vrot.lane.b32.xlu1 %v5878_v1, %s5060_s24  ;;  %s7719_s24 = smov 10  }
 0x28a   : > { %2796 = vrot.lane.b32.xlu0 %v1901_v23, %s5061_s7  ;;  %v5986_v24 = vpop.permute.xlu0 %1554 }
 0x28b   : > { %2858 = vrot.lane.b32.xlu2 %v5752_v13, %s5059_s5  ;;  %7716 = vst [vmem:[#allocation17_spill] sm:$0xff] %v5986_v24  ;;  %v1161_v13 = vld [vmem:[#allocation8 + $0x18] sm:$0xff]  ;;  %v6032_v53 = vpop.permute.xlu2 %2031  ;;  %s7736_s5 = smov 126  }
 0x28c   : > { %v5978_v9 = vpop.permute.xlu1 %1968 }
 0x291   : > { %2750 = vrot.lane.b32.xlu1 %v5901_v8, %s5053_s14 }
 0x292   : > { %v5992_v54 = vpop.permute.xlu0 %1598 }
 0x293   : > { %2291 = vrot.lane.b32.xlu2 %v2286_v7, %s7630_s12  ;;  %7717 = vst [vmem:[#allocation19_spill] sm:$0xff] %v5992_v54  ;;  %v6038_v40 = vpop.permute.xlu2 %2000  ;;  %s7654_s12 = smov 118  }
 0x297   : > { %v5983_v61 = vpop.permute.xlu1 %1904 }
 0x29a   : > { %v5999_v27 = vpop.permute.xlu0 %2033 }
 0x29b   : > { %2794 = vrot.lane.b32.xlu2 %v5843_v62, %s5061_s7  ;;  %v6044_v14 = vpop.permute.xlu2 %1934  ;;  %s7738_s7 = smov 127  }
 0x2a3   : > { %v5988_v19 = vpop.permute.xlu1 %1862  ;;  %2752 = vrot.lane.b32.xlu2 %v5887_v17, %s5053_s14  ;;  %v6007_v17 = vpop.permute.xlu0 %1966  ;;  %s7739_s14 = smov 124  }
 0x2a4   : > { %v6050_v20 = vpop.permute.xlu2 %1906 }
 0x2ab   : > { %v5994_v39 = vpop.permute.xlu1 %1800  ;;  %v6016_v15 = vpop.permute.xlu0 %1936 }
 0x2ac   : > { %v6056_v7 = vpop.permute.xlu2 %1830 }
 0x2ad   : > { %v1223_v59 = vpop.f32.mrf.mxu0 }
 0x2ae   : > { %v1224_v29 = vadd.f32 %v1223_v59, %v1161_v13 }
 0x2b2   : > { %v1183_v60 = vpop.f32.mrf.mxu2 }
 0x2b3   : > { %v1184_v33 = vadd.f32 %v1183_v60, %v1160_v45  ;;  %v6001_v44 = vpop.permute.xlu1 %1772  ;;  %v6022_v22 = vpop.permute.xlu0 %1860 }
 0x2b4   : > { %v1243_v55 = vpop.f32.mrf.mxu1 }
 0x2b5   : > { %v1244_v48 = vadd.f32 %v1243_v55, %v1224_v29  ;;  %v6062_v29 = vpop.permute.xlu2 %1802 }
 0x2b7   : > { %v1247_v62 = vmax.f32 %v1244_v48, 0.0 }
 0x2b9   : > { %1253 = vrot.lane.b32.xlu1 %v1247_v62, %s7711_s6  ;;  %v1203_v1 = vpop.f32.mrf.mxu3 }
 0x2ba   : > { %v1204_v57 = vadd.f32 %v1203_v1, %v1184_v33 }
 0x2bb   : > { %v6010_v12 = vpop.permute.xlu1 %1661  ;;  %v6028_v5 = vpop.permute.xlu0 %1832 }
 0x2bc   : > { %v1246_v51 = vmax.f32 %v1204_v57, 0.0  ;;  %7718 = vst [vmem:[#allocation20_spill] sm:$0xff] %v6010_v12 }
 0x2bd   : > { %v6068_v55 = vpop.permute.xlu2 %2187 }
 0x2be   : > { %1251 = vrot.lane.b32.xlu0 %v1246_v51, %s7711_s6  ;;  %7732 = vst [vmem:[#allocation36_spill] sm:$0xff] %v6068_v55 }
 0x2c1   : > { %1750 = vrot.lane.b32.xlu1 %v1247_v62, %s7635_s8 }
 0x2c3   : > { %v6018_v37 = vpop.permute.xlu1 %2157  ;;  %v6034_v46 = vpop.permute.xlu0 %1770 }
 0x2c4   : > { %7721 = vst [vmem:[#allocation25_spill] sm:$0xff] %v6018_v37 }
 0x2c5   : > { %v6075_v57 = vpop.permute.xlu2 %2215 }
 0x2c6   : > { %1748 = vrot.lane.b32.xlu0 %v1246_v51, %s7635_s8  ;;  %7735 = vst [vmem:[#allocation38_spill] sm:$0xff] %v6075_v57  ;;  %s7648_s8 = smov 119  }
 0x2c9   : > { %2487 = vrot.lane.b32.xlu1 %v1247_v62, %s7719_s24 }
 0x2cb   : > { %v6024_v8 = vpop.permute.xlu1 %2185  ;;  %v6040_v56 = vpop.permute.xlu0 %2155 }
 0x2cc   : > { %7722 = vst [vmem:[#allocation26_spill] sm:$0xff] %v6024_v8 }
 0x2cd   : > { %7726 = vst [vmem:[#allocation30_spill] sm:$0xff] %v6040_v56 }
 0x2ce   : > { %2485 = vrot.lane.b32.xlu0 %v1246_v51, %s7719_s24  ;;  %s7652_s24 = smov 122  }
 0x2d3   : > { %v6030_v23 = vpop.permute.xlu1 %2247  ;;  %v6046_v26 = vpop.permute.xlu0 %2217 }
 0x2d4   : > { %7724 = vst [vmem:[#allocation28_spill] sm:$0xff] %v6030_v23 }
 0x2d5   : > { %7727 = vst [vmem:[#allocation31_spill] sm:$0xff] %v6046_v26 }
 0x2db   : > { %v6036_v30 = vpop.permute.xlu1 %2356  ;;  %v6052_v28 = vpop.permute.xlu0 %2245 }
 0x2dc   : > { %7725 = vst [vmem:[#allocation29_spill] sm:$0xff] %v6036_v30 }
 0x2dd   : > { %7729 = vst [vmem:[#allocation33_spill] sm:$0xff] %v6052_v28  ;;  %v6086_v28 = vpop.permute.xlu2 %2387 }
 0x2e3   : > { %v6042_v36 = vpop.permute.xlu1 %2890  ;;  %v6058_v13 = vpop.permute.xlu0 %2389 }
 0x2e4   : > { %7731 = vst [vmem:[#allocation35_spill] sm:$0xff] %v6058_v13 }
 0x2e5   : > { %v6096_v26 = vpop.permute.xlu2 %2358 }
 0x2e6   : > { %7741 = vst [vmem:[#allocation39_spill] sm:$0xff] %v6096_v26 }
 0x2eb   : > { %v6048_v4 = vpop.permute.xlu1 %2321  ;;  %v6064_v45 = vpop.permute.xlu0 %2924 }
 0x2ec   : > { %7728 = vst [vmem:[#allocation32_spill] sm:$0xff] %v6048_v4  ;;  %v7737_v4 = vld [vmem:[#allocation23_spill] sm:$0xff] }
 0x2ed   : > { %7740 = vst [vmem:[#allocation23_spill] sm:$0xff] %v6086_v28 }
 0x2f3   : > { %v6054_v47 = vpop.permute.xlu1 %2289  ;;  %v6070_v48 = vpop.permute.xlu0 %2319 }
 0x2f4   : > { %7730 = vst [vmem:[#allocation34_spill] sm:$0xff] %v6054_v47 }
 0x2f5   : > { %7733 = vst [vmem:[#allocation37_spill] sm:$0xff] %v6070_v48 }
 0x2fb   : > { %v6060_v59 = vpop.permute.xlu1 %2828  ;;  %v6078_v51 = vpop.permute.xlu0 %2860 }
 0x303   : > { %v6066_v60 = vpop.permute.xlu1 %2750 }
 0x32b   : > { %v1254_v33 = vpop.permute.xlu1 %1253 }
 0x32c   : > { %v1260_v62 = vsel %vm7658_vm9, %v1254_v33, 0.0 }
 0x32d   : > { %1334 = vrot.lane.b32.xlu2 %v1260_v62, %s7734_s30  ;;  %v1312_v1 = vmul.f32 %v5776_v10, %v1260_v62  ;;  %v1282_v13 = vmul.f32 %v7737_v4, %v1260_v62  ;;  %v1356_v48 = vmul.f32 %v5937_v41, %v1260_v62  ;;  %v1420_v23 = vmul.f32 %v5976_v6, %v1260_v62 }
 0x32e   : > { %v1387_v57 = vmul.f32 %v5996_v16, %v1260_v62 }
 0x32f   : > { %1320 = vrot.lane.b32.xlu0 %v1312_v1, %s7736_s5  ;;  %v6088_v1 = vpop.permute.xlu0 %2826 }
 0x333   : > { %v1751_v47 = vpop.permute.xlu1 %1750 }
 0x334   : > { %v1757_v30 = vsel %vm7647_vm12, %v1751_v47, 0.0 }
 0x335   : > { %1290 = vrot.lane.b32.xlu2 %v1282_v13, %s7738_s7  ;;  %1892 = vrot.lane.b32.xlu1 %v1757_v30, %s7637_s11  ;;  %v2042_v13 = vmul.f32 %v5999_v27, %v1757_v30  ;;  %v2009_v28 = vmul.f32 %v6038_v40, %v1757_v30  ;;  %v1976_v8 = vmul.f32 %v5978_v9, %v1757_v30 }
 0x336   : > { %v1914_v62 = vmul.f32 %v6050_v20, %v1757_v30  ;;  %v1840_v56 = vmul.f32 %v6028_v5, %v1757_v30 }
 0x337   : > { %1364 = vrot.lane.b32.xlu0 %v1356_v48, %s7739_s14  ;;  %v6098_v48 = vpop.permute.xlu0 %2796 }
 0x33d   : > { %1428 = vrot.lane.b32.xlu2 %v1420_v23, %s7652_s24  ;;  %1395 = vrot.lane.b32.xlu1 %v1387_v57, %s7637_s11  ;;  %v1945_v23 = vmul.f32 %v6016_v15, %v1757_v30  ;;  %s7645_s11 = smov 121   ;;  %v1810_v57 = vmul.f32 %v6062_v29, %v1757_v30 }
 0x33f   : > { %2050 = vrot.lane.b32.xlu0 %v2042_v13, %s7654_s12  ;;  %v6108_v13 = vpop.permute.xlu2 %2922  ;;  %v1252_v26 = vpop.permute.xlu0 %1251 }
 0x345   : > { %2017 = vrot.lane.b32.xlu2 %v2009_v28, %s7648_s8  ;;  %1984 = vrot.lane.b32.xlu1 %v1976_v8, %s7650_s0  ;;  %v1870_v28 = vmul.f32 %v5988_v19, %v1757_v30  ;;  %v6115_v8 = vsel %vm7658_vm9, %v1252_v26, %v1254_v33 }
 0x347   : > { %1953 = vrot.lane.b32.xlu0 %v1945_v23, %s7645_s11  ;;  %v6118_v23 = vsel %vm7658_vm9, 0.0, %v1252_v26  ;;  %v1306_v26 = vsel %vm7657_vm11, %v5961_v2, %v5776_v10  ;;  %v6132_v33 = vpop.permute.xlu2 %2892  ;;  %s7742_s11 = smov 123  }
 0x348   : > { %v4413_v55 = vpack.i.bf16 %v6115_v8, %v6118_v23 }
 0x34d   : > { %1922 = vrot.lane.b32.xlu2 %v1914_v62, %s7652_s24  ;;  %1818 = vrot.lane.b32.xlu1 %v1810_v57, %s7736_s5  ;;  %v1780_v62 = vmul.f32 %v6001_v44, %v1757_v30  ;;  %v1276_v57 = vsel %vm7656_vm8, %v5569_v34, %v7737_v4  ;;  %v1280_v30 = vmul.f32 %v5569_v34, %v6118_v23 }
 0x34e   : > { %v1281_v37 = vmul.f32 %v1276_v57, %v6115_v8  ;;  %v1350_v34 = vsel %vm7667_vm6, %v5968_v63, %v5937_v41  ;;  %v1381_v41 = vsel %vm7647_vm12, %v5943_v25, %v5996_v16  ;;  %v2003_v16 = vsel %vm7666_vm14, %v5971_v35, %v6038_v40 }
 0x34f   : > { %1878 = vrot.lane.b32.xlu0 %v1870_v28, %s7739_s14  ;;  %v1749_v28 = vpop.permute.xlu0 %1748  ;;  %v6167_v57 = vpop.permute.xlu2 %2858  ;;  %v1970_v40 = vsel %vm7670_vm0, %v6007_v17, %v5978_v9  ;;  %vm1986_vm14 = vcmask 982016  }
 0x350   : > { %v6142_v4 = vsel %vm7647_vm12, %v1749_v28, %v1751_v47  ;;  %v6145_v10 = vsel %vm7647_vm12, 0.0, %v1749_v28  ;;  %v4423_v0 = vpack.i.bf16 %v1281_v37, %v1280_v30  ;;  %v1414_v47 = vsel %vm7669_vm4, %v6005_v21, %v5976_v6 }
 0x351   : > { %v1354_v37 = vmul.f32 %v5968_v63, %v6118_v23  ;;  %v1385_v6 = vmul.f32 %v5943_v25, %v6118_v23  ;;  %v2040_v25 = vmul.f32 %v6032_v53, %v6145_v10  ;;  %v2007_v30 = vmul.f32 %v5971_v35, %v6145_v10 }
 0x352   : > { %vm1938_vm12 = vcmask 56320  }
 0x353   : > { %v1939_v9 = vsel %vm1938_vm12, %v6044_v14, %v6016_v15  ;;  %v1864_v15 = vsel %vm7667_vm6, %v6022_v22, %v5988_v19  ;;  %v1804_v19 = vsel %vm7657_vm11, %v5994_v39, %v6062_v29  ;;  %vm2798_vm11 = vcmask 89088  }
 0x354   : > { %vm1955_vm6 = vcmask 990208  }
 0x355   : > { %1848 = vrot.lane.b32.xlu2 %v1840_v56, %s7734_s30  ;;  %4414 = vrot.lane.b32.xlu1 %v4413_v55, %s7734_s30  ;;  %v1310_v56 = vmul.f32 %v5961_v2, %v6118_v23  ;;  %v1311_v55 = vmul.f32 %v1306_v26, %v6115_v8  ;;  %v4418_v2 = vpack.i.bf16 %v6142_v4, %v6145_v10 }
 0x356   : > { %v1386_v26 = vmul.f32 %v1381_v41, %v6115_v8 }
 0x357   : > { %1788 = vrot.lane.b32.xlu0 %v1780_v62, %s7738_s7  ;;  %v4428_v49 = vpack.i.bf16 %v1311_v55, %v1310_v56  ;;  %v1419_v62 = vmul.f32 %v1414_v47, %v6115_v8  ;;  %v2036_v56 = vsel %vm2035_vm1, %v6032_v53, %v5999_v27  ;;  %v1975_v27 = vmul.f32 %v1970_v40, %v6142_v4  ;;  %v6193_v47 = vpop.permute.xlu2 %2291 }
 0x358   : > { %v2041_v55 = vmul.f32 %v2036_v56, %v6142_v4  ;;  %7743 = vst [vmem:[#allocation40_spill] sm:$0xff] %v6193_v47 }
 0x35a   : > { %v4448_v53 = vpack.i.bf16 %v2041_v55, %v2040_v25  ;;  %v3076_v55 = vld [vmem:[#allocation9 + $0x2d8] sm:$0xff] }
 0x35d   : > { %4429 = vrot.lane.b32.xlu2 %v4428_v49, %s7736_s5  ;;  %4424 = vrot.lane.b32.xlu1 %v4423_v0, %s7738_s7  ;;  %v1355_v49 = vmul.f32 %v1350_v34, %v6115_v8  ;;  %v1418_v0 = vmul.f32 %v6005_v21, %v6118_v23  ;;  %v4438_v21 = vpack.i.bf16 %v1386_v26, %v1385_v6 }
 0x35e   : > { %v1974_v34 = vmul.f32 %v6007_v17, %v6145_v10  ;;  %v1943_v17 = vmul.f32 %v6044_v14, %v6145_v10  ;;  %v1834_v14 = vsel %vm7658_vm9, %v6056_v7, %v6028_v5  ;;  %v1808_v5 = vmul.f32 %v5994_v39, %v6145_v10 }
 0x35f   : > { %4419 = vrot.lane.b32.xlu0 %v4418_v2, %s7742_s11  ;;  %v4433_v63 = vpack.i.bf16 %v1355_v49, %v1354_v37  ;;  %v4443_v28 = vpack.i.bf16 %v1419_v62, %v1418_v0  ;;  %v2008_v2 = vmul.f32 %v2003_v16, %v6142_v4  ;;  %v1908_v49 = vsel %vm7669_vm4, %v5983_v61, %v6050_v20 }
 0x360   : > { %v4458_v35 = vpack.i.bf16 %v1975_v27, %v1974_v34  ;;  %v1944_v0 = vmul.f32 %v1939_v9, %v6142_v4  ;;  %v1912_v62 = vmul.f32 %v5983_v61, %v6145_v10  ;;  %v1913_v41 = vmul.f32 %v1908_v49, %v6142_v4  ;;  %v3044_v34 = vld [vmem:[#allocation9 + $0x2c0] sm:$0xff]  ;;  %v6264_v27 = vpop.permute.xlu0 %2485 }
 0x361   : > { %v4453_v37 = vpack.i.bf16 %v2008_v2, %v2007_v30  ;;  %v1868_v61 = vmul.f32 %v6022_v22, %v6145_v10  ;;  %v1869_v20 = vmul.f32 %v1864_v15, %v6142_v4  ;;  %v1809_v16 = vmul.f32 %v1804_v19, %v6142_v4  ;;  %v2951_v15 = vld [vmem:[#allocation9 + $0x290] sm:$0xff]  ;;  %v2566_v19 = vld [vmem:[#allocation9 + $0x278] sm:$0xff] }
 0x362   : > { %v4463_v6 = vpack.i.bf16 %v1944_v0, %v1943_v17  ;;  %v4468_v26 = vpack.i.bf16 %v1913_v41, %v1912_v62  ;;  %v1774_v39 = vsel %vm7656_vm8, %v6034_v46, %v6001_v44  ;;  %v1778_v30 = vmul.f32 %v6034_v46, %v6145_v10  ;;  %v3045_v44 = vld [vmem:[#allocation9 + $0x2c8] sm:$0xff] }
 0x363   : > { %v4483_v22 = vpack.i.bf16 %v1809_v16, %v1808_v5  ;;  %v1779_v2 = vmul.f32 %v1774_v39, %v6142_v4  ;;  %v6279_v17 = vld [vmem:[#allocation9 + $0x1c8] sm:$0xff]  ;;  %vm2052_vm8 = vcmask 965632   ;;  %vm1430_vm9 = vcmask 998400  }
 0x364   : > { %v2983_v0 = vld [vmem:[#allocation9 + $0x2a8] sm:$0xff]  ;;  %vm2926_vm4 = vcmask 121856  }
 0x365   : > { %4434 = vrot.lane.b32.xlu2 %v4433_v63, %s7739_s14  ;;  %4444 = vrot.lane.b32.xlu1 %v4443_v28, %s7652_s24  ;;  %v6210_v63 = vpop.permute.xlu2 %2794  ;;  %v1838_v28 = vmul.f32 %v6056_v7, %v6145_v10  ;;  %v3075_v7 = vld [vmem:[#allocation9 + $0x2d0] sm:$0xff]  ;;  %v4488_v40 = vpack.i.bf16 %v1779_v2, %v1778_v30 }
 0x367   : > { %4439 = vrot.lane.b32.xlu0 %v4438_v21, %s7742_s11  ;;  %v1839_v21 = vmul.f32 %v1834_v14, %v6142_v4 }
 0x369   : > { %v4478_v56 = vpack.i.bf16 %v1839_v21, %v1838_v28  ;;  %v2952_v28 = vld [vmem:[#allocation9 + $0x298] sm:$0xff]  ;;  %v2597_v21 = vld [vmem:[#allocation9 + $0x288] sm:$0xff] }
 0x36d   : > { %4449 = vrot.lane.b32.xlu2 %v4448_v53, %s7654_s12  ;;  %4454 = vrot.lane.b32.xlu1 %v4453_v37, %s7648_s8  ;;  %s7744_s8 = smov 121   ;;  %v6236_v25 = vpop.permute.xlu2 %2752  ;;  %s7747_s12 = smov 7   ;;  %v3013_v53 = vld [vmem:[#allocation9 + $0x2b0] sm:$0xff]  ;;  %v6269_v37 = vld [vmem:[#allocation9 + $0x1c0] sm:$0xff] }
 0x36f   : > { %4459 = vrot.lane.b32.xlu0 %v4458_v35, %s7650_s0  ;;  %s7745_s0 = smov 8   ;;  %v6271_v35 = vpop.permute.xlu1 %2487 }
 0x370   : > { %v6320_v2 = vsel %vm2035_vm1, %v6271_v35, 0.0 }
 0x375   : > { %4464 = vrot.lane.b32.xlu2 %v4463_v6, %s7744_s8  ;;  %4469 = vrot.lane.b32.xlu1 %v4468_v26, %s7652_s24  ;;  %s7746_s24 = smov 20   ;;  %v2596_v6 = vld [vmem:[#allocation9 + $0x280] sm:$0xff] }
 0x376   : > { %v2982_v26 = vld [vmem:[#allocation9 + $0x2a0] sm:$0xff] }
 0x377   : > { %2720 = vrot.lane.b32.xlu0 %v5925_v38, %s7745_s0  ;;  %v4473_v38 = vpack.i.bf16 %v1869_v20, %v1868_v61 }
 0x37d   : > { %4474 = vrot.lane.b32.xlu2 %v4473_v38, %s7739_s14  ;;  %4479 = vrot.lane.b32.xlu1 %v4478_v56, %s7734_s30  ;;  %v2534_v56 = vld [vmem:[#allocation9 + $0x260] sm:$0xff] }
 0x37f   : > { %4484 = vrot.lane.b32.xlu0 %v4483_v22, %s7736_s5  ;;  %v2565_v22 = vld [vmem:[#allocation9 + $0x270] sm:$0xff] }
 0x385   : > { %3079 = vrot.lane.b32.xlu2 %v3075_v7, %s7746_s24  ;;  %2722 = vrot.lane.b32.xlu1 %v5910_v18, %s7745_s0  ;;  %s7748_s0 = smov 19   ;;  %v2503_v7 = vld [vmem:[#allocation9 + $0x250] sm:$0xff] }
 0x387   : > { %v6245_v29 = vpop.permute.xlu2 %1334  ;;  %3081 = vrot.lane.b32.xlu0 %v3076_v55, %s7746_s24  ;;  %s7749_s24 = smov 6  }
 0x38d   : > { %2690 = vrot.lane.b32.xlu1 %v5903_v42, %s7747_s12  ;;  %4489 = vrot.lane.b32.xlu2 %v4488_v40, %s7738_s7  ;;  %v2504_v40 = vld [vmem:[#allocation9 + $0x258] sm:$0xff] }
 0x38f   : > { %v6254_v18 = vpop.permute.xlu2 %1290  ;;  %3048 = vrot.lane.b32.xlu0 %v3044_v34, %s7748_s0  ;;  %v2535_v34 = vld [vmem:[#allocation9 + $0x268] sm:$0xff] }
 0x395   : > { %3050 = vrot.lane.b32.xlu1 %v3045_v44, %s7748_s0  ;;  %2692 = vrot.lane.b32.xlu2 %v5931_v32, %s7747_s12  ;;  %s7751_s12 = smov 5   ;;  %s7752_s0 = smov 17   ;;  %v2805_v44 = vmul.f32 %v6098_v48, %v6320_v2 }
 0x397   : > { %v6260_v46 = vpop.permute.xlu2 %1428  ;;  %2662 = vrot.lane.b32.xlu0 %v5912_v52, %s7749_s24  ;;  %v3014_v52 = vld [vmem:[#allocation9 + $0x2b8] sm:$0xff] }
 0x39d   : > { %3017 = vrot.lane.b32.xlu1 %v3013_v53, %s7750_s1  ;;  %2660 = vrot.lane.b32.xlu2 %v5919_v43, %s7749_s24  ;;  %s5072_s24 = smov 116  }
 0x39f   : > { %v6273_v49 = vpop.permute.xlu2 %2017  ;;  %2630 = vrot.lane.b32.xlu0 %v6269_v37, %s7751_s12 }
 0x3a1   : > { %v6277_v9 = vpop.permute.xlu0 %1320 }
 0x3a5   : > { %2632 = vrot.lane.b32.xlu1 %v6279_v17, %s7751_s12  ;;  %3019 = vrot.lane.b32.xlu2 %v3014_v52, %s7750_s1  ;;  %s5068_s1 = smov 117   ;;  %s7755_s12 = smov 119  }
 0x3a7   : > { %v6284_v43 = vpop.permute.xlu2 %1922  ;;  %v6286_v62 = vpop.permute.xlu1 %1892  ;;  %2988 = vrot.lane.b32.xlu0 %v2983_v0, %s7752_s0 }
 0x3a9   : > { %v6289_v41 = vpop.permute.xlu0 %1364 }
 0x3ad   : > { %2600 = vrot.lane.b32.xlu1 %v2596_v6, %s7701_s13  ;;  %2986 = vrot.lane.b32.xlu2 %v2982_v26, %s7752_s0  ;;  %s7756_s0 = smov 120  }
 0x3af   : > { %v6293_v14 = vpop.permute.xlu2 %1848  ;;  %v6295_v61 = vpop.permute.xlu1 %1395  ;;  %2955 = vrot.lane.b32.xlu0 %v2951_v15, %s7705_s20 }
 0x3b1   : > { %v6298_v20 = vpop.permute.xlu0 %2050 }
 0x3b5   : > { %2957 = vrot.lane.b32.xlu1 %v2952_v28, %s7705_s20  ;;  %2602 = vrot.lane.b32.xlu2 %v2597_v21, %s7701_s13  ;;  %v2901_v28 = vmul.f32 %v6132_v33, %v6320_v2  ;;  %v2933_v21 = vmul.f32 %v6064_v45, %v6320_v2  ;;  %s7753_s13 = smov 118  }
 0x3b7   : > { %v6302_v5 = vpop.permute.xlu1 %1984  ;;  %v6304_v16 = vpop.permute.xlu2 %4429  ;;  %2571 = vrot.lane.b32.xlu0 %v2566_v19, %s7711_s6 }
 0x3b9   : > { %v6307_v38 = vpop.permute.xlu0 %1953 }
 0x3bd   : > { %2538 = vrot.lane.b32.xlu1 %v2534_v56, %s7698_s9  ;;  %2569 = vrot.lane.b32.xlu2 %v2565_v22, %s7711_s6  ;;  %s5070_s6 = smov 113  }
 0x3bf   : > { %v6311_v55 = vpop.permute.xlu1 %1818  ;;  %v6313_v39 = vpop.permute.xlu2 %4434  ;;  %2507 = vrot.lane.b32.xlu0 %v2503_v7, %s7712_s10  ;;  %v2869_v7 = vmul.f32 %v6078_v51, %v6320_v2 }
 0x3c0   : > { %v4437_v58 = vunpack.i.h.bf16 %v6313_v39  ;;  %v4436_v24 = vunpack.i.l.bf16 %v6313_v39 }
 0x3c1   : > { %v6316_v30 = vpop.permute.xlu0 %1878 }
 0x3c5   : > { %2509 = vrot.lane.b32.xlu1 %v2504_v40, %s7712_s10  ;;  %2540 = vrot.lane.b32.xlu2 %v2535_v34, %s7698_s9  ;;  %s5069_s10 = smov 114   ;;  %v2799_v40 = vsel %vm2798_vm11, %v6210_v63, %v6098_v48  ;;  %v6357_v34 = vsel %vm2035_vm1, %v6264_v27, %v6271_v35  ;;  %s5071_s9 = smov 115   ;;  %vm1397_vm11 = vcmask 1006592  }
 0x3c6   : > { %v2804_v35 = vmul.f32 %v2799_v40, %v6357_v34 }
 0x3c7   : > { %v6326_v53 = vpop.permute.xlu1 %4414  ;;  %v6328_v52 = vpop.permute.xlu2 %4449  ;;  %2813 = vrot.lane.b32.xlu0 %v2805_v44, %s5068_s1  ;;  %v6361_v44 = vsel %vm2035_vm1, 0.0, %v6264_v27  ;;  %v2837_v27 = vmul.f32 %v6060_v59, %v6320_v2  ;;  %vm2019_vm1 = vcmask 973824  }
 0x3c8   : > { %v7659_v0 = vunpack.i.h.bf16 %v6328_v52  ;;  %v4451_v6 = vunpack.i.l.bf16 %v6328_v52  ;;  %v2803_v48 = vmul.f32 %v6210_v63, %v6361_v44  ;;  %v4417_v40 = vunpack.i.h.bf16 %v6326_v53 }
 0x3c9   : > { %v6333_v26 = vpop.permute.xlu0 %1788 }
 0x3ca   : > { %v2053_v15 = vsel %vm2052_vm8, %v4451_v6, %v7659_v0  ;;  %v4518_v63 = vpack.i.bf16 %v2804_v35, %v2803_v48  ;;  %v1367_v48 = vsel %vm461_vm3, %v4437_v58, %v6289_v41 }
 0x3cb   : > { %2093 = vmatpush.msrb.mxu0 %v2053_v15 }
 0x3cd   : > { %2909 = vrot.lane.b32.xlu1 %v2901_v28, %s5069_s10  ;;  %2941 = vrot.lane.b32.xlu2 %v2933_v21, %s5070_s6 }
 0x3cf   : > { %v6344_v19 = vpop.permute.xlu1 %4424  ;;  %v6346_v56 = vpop.permute.xlu2 %4464 }
 0x3d1   : > { %v6348_v22 = vpop.permute.xlu0 %4419 }
 0x3d5   : > { %2877 = vrot.lane.b32.xlu1 %v2869_v7, %s5071_s9  ;;  %2782 = vrot.lane.b32.xlu2 %v6320_v2, %s7753_s13 }
 0x3d7   : > { %v4445_v6 = vpop.permute.xlu1 %4444  ;;  %v6366_v15 = vpop.permute.xlu2 %4474 }
 0x3d8   : > { %v4447_v28 = vunpack.i.h.bf16 %v4445_v6  ;;  %v4446_v21 = vunpack.i.l.bf16 %v4445_v6  ;;  %v4416_v6 = vunpack.i.l.bf16 %v6326_v53  ;;  %v1366_v53 = vsel %vm461_vm3, %v4436_v24, %v4437_v58 }
 0x3d9   : > { %v4440_v0 = vpop.permute.xlu0 %4439  ;;  %v1337_v24 = vsel %vm428_vm13, %v4417_v40, %v6245_v29  ;;  %v4466_v58 = vunpack.i.l.bf16 %v6346_v56 }
 0x3da   : > { %v4442_v47 = vunpack.i.h.bf16 %v4440_v0  ;;  %v4441_v7 = vunpack.i.l.bf16 %v4440_v0  ;;  %v1431_v54 = vsel %vm1430_vm9, %v4446_v21, %v4447_v28  ;;  %v1432_v12 = vsel %vm1430_vm9, %v4447_v28, %v6260_v46 }
 0x3db   : > { %1467 = vmatpush.msra.mxu3 %v1431_v54  ;;  %1487 = vmatpush.msra.mxu1 %v1432_v12  ;;  %v4432_v46 = vunpack.i.h.bf16 %v6304_v16  ;;  %v4431_v54 = vunpack.i.l.bf16 %v6304_v16  ;;  %v1336_v35 = vsel %vm428_vm13, %v4416_v6, %v4417_v40  ;;  %v4426_v16 = vunpack.i.l.bf16 %v6344_v19 }
 0x3dc   : > { %v1398_v31 = vsel %vm1397_vm11, %v4441_v7, %v4442_v47  ;;  %v1399_v0 = vsel %vm1397_vm11, %v4442_v47, %v6295_v61  ;;  %v4467_v28 = vunpack.i.h.bf16 %v6346_v56 }
 0x3dd   : > { %2845 = vrot.lane.b32.xlu1 %v2837_v27, %s5072_s24  ;;  %4519 = vrot.lane.b32.xlu2 %v4518_v63, %s5068_s1  ;;  %v1322_v63 = vsel %vm395_vm5, %v4431_v54, %v4432_v46  ;;  %v1323_v6 = vsel %vm395_vm5, %v4432_v46, %v6277_v9  ;;  %v1264_v9 = vmul.f32 %v5903_v42, %v6118_v23  ;;  %v1248_v54 = vld [vmem:[#allocation6 + $0x18] sm:$0xff]  ;;  %v7754_v42 = vunpack.i.h.bf16 %v6328_v52  ;;  %s7757_s1 = smov 108  }
 0x3de   : > { %1468 = vmatpush.msra.mxu3 %v1398_v31  ;;  %1488 = vmatpush.msra.mxu1 %v1399_v0  ;;  %v4427_v31 = vunpack.i.h.bf16 %v6344_v19  ;;  %v4493_v19 = vpack.i.bf16 %v6357_v34, %v6361_v44  ;;  %v1265_v0 = vmul.f32 %v5931_v32, %v6115_v8  ;;  %v1956_v46 = vsel %vm1955_vm6, %v4466_v58, %v4467_v28 }
 0x3df   : > { %v4455_v12 = vpop.permute.xlu1 %4454  ;;  %v6387_v39 = vpop.permute.xlu2 %3079  ;;  %v2054_v32 = vsel %vm2052_vm8, %v7754_v42, %v6298_v20  ;;  %v4477_v23 = vunpack.i.h.bf16 %v6366_v15 }
 0x3e0   : > { %v4457_v47 = vunpack.i.h.bf16 %v4455_v12  ;;  %v4456_v61 = vunpack.i.l.bf16 %v4455_v12  ;;  %1469 = vmatpush.msra.mxu3 %v1366_v53  ;;  %1489 = vmatpush.msra.mxu1 %v1367_v48  ;;  %v1292_v56 = vsel %vm362_vm10, %v4426_v16, %v4427_v31  ;;  %v1293_v40 = vsel %vm362_vm10, %v4427_v31, %v6254_v18 }
 0x3e1   : > { %v4460_v21 = vpop.permute.xlu0 %4459  ;;  %v4422_v48 = vunpack.i.h.bf16 %v6348_v22  ;;  %v4421_v18 = vunpack.i.l.bf16 %v6348_v22  ;;  %v4476_v31 = vunpack.i.l.bf16 %v6366_v15  ;;  %v2927_v15 = vsel %vm2926_vm4, %v6108_v13, %v6064_v45 }
 0x3e2   : > { %v4462_v41 = vunpack.i.h.bf16 %v4460_v21  ;;  %v4461_v27 = vunpack.i.l.bf16 %v4460_v21  ;;  %1470 = vmatpush.msra.mxu3 %v1336_v35  ;;  %1490 = vmatpush.msra.mxu1 %v1337_v24  ;;  %v2020_v7 = vsel %vm2019_vm1, %v4456_v61, %v4457_v47  ;;  %v2021_v16 = vsel %vm2019_vm1, %v4457_v47, %v6273_v49 }
 0x3e3   : > { %2094 = vmatpush.msrb.mxu0 %v2020_v7  ;;  %v2760_v21 = vmul.f32 %v6236_v25, %v6320_v2  ;;  %v1894_v52 = vsel %vm1397_vm11, %v4421_v18, %v4422_v48  ;;  %v1880_v24 = vsel %vm461_vm3, %v4476_v31, %v4477_v23  ;;  %v1957_v49 = vsel %vm1955_vm6, %v4467_v28, %v6307_v38 }
 0x3e4   : > { %1471 = vmatpush.msra.mxu3 %v1322_v63  ;;  %1491 = vmatpush.msra.mxu1 %v1323_v6  ;;  %v1987_v29 = vsel %vm1986_vm14, %v4461_v27, %v4462_v41  ;;  %v1988_v20 = vsel %vm1986_vm14, %v4462_v41, %v6302_v5  ;;  %v2931_v27 = vmul.f32 %v6108_v13, %v6361_v44  ;;  %vm7671_vm4 = vcmask 719872  }
 0x3e5   : > { %4494 = vrot.lane.b32.xlu1 %v4493_v19, %s7753_s13  ;;  %2095 = vmatpush.msrb.mxu0 %v1987_v29  ;;  %v2932_v5 = vmul.f32 %v2927_v15, %v6357_v34  ;;  %v1895_v13 = vsel %vm1397_vm11, %v4422_v48, %v6286_v62  ;;  %v1761_v62 = vmul.f32 %v6269_v37, %v6145_v10 }
 0x3e6   : > { %1472 = vmatpush.msra.mxu3 %v1292_v56  ;;  %1492 = vmatpush.msra.mxu1 %v1293_v40  ;;  %v3087_v37 = vmul.f32 %v6387_v39, %v6361_v44 }
 0x3e7   : > { %v4470_v12 = vpop.permute.xlu1 %4469  ;;  %v6415_v53 = vpop.permute.xlu2 %4489  ;;  %2096 = vmatpush.msrb.mxu0 %v1956_v46  ;;  %v4498_v56 = vpack.i.bf16 %v2932_v5, %v2931_v27 }
 0x3e8   : > { %v4472_v61 = vunpack.i.h.bf16 %v4470_v12  ;;  %v4471_v35 = vunpack.i.l.bf16 %v4470_v12  ;;  %1473 = vmatpush.msra.mxu3 %v1264_v9  ;;  %1493 = vmatpush.msra.mxu1 %v1265_v0  ;;  %v4492_v63 = vunpack.i.h.bf16 %v6415_v53  ;;  %v4491_v19 = vunpack.i.l.bf16 %v6415_v53  ;;  %v1747_v53 = vld [vmem:[#allocation6 + $0x28] sm:$0xff] }
 0x3e9   : > { %4124 = vmatmul.msk.f32.vlgmr.msra.gmra.mxu3 %vm1454_vm7, %v1248_v54  ;;  %4125 = vmatmul.msk.f32.vlgmr.msra.gmra.mxu1 %vm1454_vm7, %v1248_v54  ;;  %v2721_v8 = vpop.permute.xlu0 %2720  ;;  %v1881_v9 = vsel %vm461_vm3, %v4477_v23, %v6316_v30 }
 0x3ea   : > { %2113 = vmatpush.msrb.mxu1 %v2054_v32  ;;  %v1924_v22 = vsel %vm1430_vm9, %v4471_v35, %v4472_v61  ;;  %v1925_v45 = vsel %vm1430_vm9, %v4472_v61, %v6284_v43  ;;  %v1790_v43 = vsel %vm362_vm10, %v4491_v19, %v4492_v63  ;;  %v2728_v48 = vmul.f32 %v2721_v8, %v6361_v44 }
 0x3eb   : > { %2097 = vmatpush.msrb.mxu0 %v1924_v22  ;;  %v1791_v32 = vsel %vm362_vm10, %v4492_v63, %v6333_v26 }
 0x3ec   : > { %2114 = vmatpush.msrb.mxu1 %v2021_v16 }
 0x3ed   : > { %2768 = vrot.lane.b32.xlu1 %v2760_v21, %s7755_s12  ;;  %2098 = vmatpush.msrb.mxu0 %v1894_v52 }
 0x3ee   : > { %2115 = vmatpush.msrb.mxu1 %v1988_v20 }
 0x3ef   : > { %v4480_v47 = vpop.permute.xlu1 %4479  ;;  %v2693_v58 = vpop.permute.xlu2 %2692  ;;  %2099 = vmatpush.msrb.mxu0 %v1880_v24 }
 0x3f0   : > { %2116 = vmatpush.msrb.mxu1 %v1957_v49  ;;  %v4482_v41 = vunpack.i.h.bf16 %v4480_v47  ;;  %v4481_v7 = vunpack.i.l.bf16 %v4480_v47  ;;  %v2700_v31 = vmul.f32 %v2693_v58, %v6320_v2 }
 0x3f1   : > { %v4485_v6 = vpop.permute.xlu0 %4484 }
 0x3f2   : > { %2117 = vmatpush.msrb.mxu1 %v1925_v45  ;;  %v4487_v38 = vunpack.i.h.bf16 %v4485_v6  ;;  %v4486_v28 = vunpack.i.l.bf16 %v4485_v6  ;;  %v1850_v29 = vsel %vm428_vm13, %v4481_v7, %v4482_v41  ;;  %v1851_v0 = vsel %vm428_vm13, %v4482_v41, %v6293_v14 }
 0x3f3   : > { %2100 = vmatpush.msrb.mxu0 %v1850_v29  ;;  %v2899_v45 = vmul.f32 %v6042_v36, %v6361_v44 }
 0x3f4   : > { %2118 = vmatpush.msrb.mxu1 %v1895_v13  ;;  %v1820_v40 = vsel %vm395_vm5, %v4486_v28, %v4487_v38  ;;  %v1821_v14 = vsel %vm395_vm5, %v4487_v38, %v6311_v55  ;;  %v1762_v55 = vmul.f32 %v6279_v17, %v6142_v4 }
 0x3f5   : > { %4499 = vrot.lane.b32.xlu1 %v4498_v56, %s5070_s6  ;;  %2101 = vmatpush.msrb.mxu0 %v1820_v40  ;;  %s7761_s6 = smov 110  }
 0x3f6   : > { %2119 = vmatpush.msrb.mxu1 %v1881_v9 }
 0x3f7   : > { %v2723_v46 = vpop.permute.xlu1 %2722  ;;  %v2661_v54 = vpop.permute.xlu2 %2660  ;;  %2102 = vmatpush.msrb.mxu0 %v1790_v43  ;;  %v2867_v43 = vmul.f32 %v6167_v57, %v6361_v44 }
 0x3f8   : > { %2120 = vmatpush.msrb.mxu1 %v1851_v0  ;;  %v2724_v12 = vsel %vm7670_vm0, %v2721_v8, %v2723_v46  ;;  %v2730_v30 = vmul.f32 %v2723_v46, %v6320_v2  ;;  %v2668_v27 = vmul.f32 %v2661_v54, %v6361_v44  ;;  %vm7776_vm0 = vcmask 908288  }
 0x3f9   : > { %v2729_v18 = vmul.f32 %v2724_v12, %v6357_v34  ;;  %v3082_v61 = vpop.permute.xlu0 %3081  ;;  %2103 = vmatpush.msrb.mxu0 %v1761_v62 }
 0x3fa   : > { %2121 = vmatpush.msrb.mxu1 %v1821_v14  ;;  %v3083_v10 = vsel %vm609_vm15, %v6387_v39, %v3082_v61  ;;  %2738 = vrot.lane.b32.xlu0 %v2730_v30, %s7756_s0  ;;  %vm2894_vm15 = vcmask 113664   ;;  %v3089_v9 = vmul.f32 %v3082_v61, %v6320_v2  ;;  %v2835_v14 = vmul.f32 %v6088_v1, %v6361_v44 }
 0x3fb   : > { %v4528_v35 = vpack.i.bf16 %v2729_v18, %v2728_v48  ;;  %v3088_v42 = vmul.f32 %v3083_v10, %v6357_v34  ;;  %4128 = vmatmul.msk.f32.vlgmr.msrb.gmra.mxu0 %vm7671_vm4, %v1747_v53  ;;  %v2895_v7 = vsel %vm2894_vm15, %v6042_v36, %v6132_v33  ;;  %vm2862_vm15 = vcmask 105472  }
 0x3fc   : > { %2122 = vmatpush.msrb.mxu1 %v1791_v32  ;;  %v2900_v6 = vmul.f32 %v2895_v7, %v6357_v34  ;;  %v2863_v36 = vsel %vm2862_vm15, %v6167_v57, %v6078_v51  ;;  %vm7764_vm15 = vcmask 31744  }
 0x3fd   : > { %v4533_v8 = vpack.i.bf16 %v3088_v42, %v3087_v37  ;;  %4529 = vrot.lane.b32.xlu2 %v4528_v35, %s7756_s0  ;;  %v2868_v0 = vmul.f32 %v2863_v36, %v6357_v34 }
 0x3fe   : > { %2123 = vmatpush.msrb.mxu1 %v1762_v55  ;;  %v4503_v56 = vpack.i.bf16 %v2900_v6, %v2899_v45 }
 0x3ff   : > { %4129 = vmatmul.msk.f32.vlgmr.msrb.gmra.mxu1 %vm7671_vm4, %v1747_v53  ;;  %v2691_v23 = vpop.permute.xlu1 %2690  ;;  %v6479_v39 = vpop.permute.xlu2 %3019  ;;  %4534 = vrot.lane.b32.xlu1 %v4533_v8, %s7757_s1  ;;  %v4508_v51 = vpack.i.bf16 %v2868_v0, %v2867_v43  ;;  %vm2879_vm4 = vcmask 941056  }
 0x400   : > { %v2694_v22 = vsel %vm1938_vm12, %v2691_v23, %v2693_v58  ;;  %v2698_v26 = vmul.f32 %v2691_v23, %v6361_v44  ;;  %vm7758_vm12 = vcmask 48128  }
 0x401   : > { %v2699_v16 = vmul.f32 %v2694_v22, %v6357_v34  ;;  %v3049_v4 = vpop.permute.xlu0 %3048 }
 0x402   : > { %2708 = vrot.lane.b32.xlu0 %v2700_v31, %s7744_s8  ;;  %v3056_v15 = vmul.f32 %v3049_v4, %v6361_v44  ;;  %v2758_v31 = vmul.f32 %v6066_v60, %v6361_v44 }
 0x403   : > { %v4538_v17 = vpack.i.bf16 %v2699_v16, %v2698_v26 }
 0x405   : > { %4539 = vrot.lane.b32.xlu2 %v4538_v17, %s7744_s8  ;;  %s7759_s8 = smov 122  }
 0x407   : > { %v6488_v21 = vpop.permute.xlu1 %3050  ;;  %v2987_v52 = vpop.permute.xlu2 %2986 }
 0x408   : > { %v3052_v20 = vsel %vm576_vm2, %v3049_v4, %v6488_v21  ;;  %vm7760_vm2 = vcmask 146432   ;;  %v2994_v30 = vmul.f32 %v2987_v52, %v6361_v44  ;;  %v3058_v43 = vmul.f32 %v6488_v21, %v6320_v2 }
 0x409   : > { %v3057_v24 = vmul.f32 %v3052_v20, %v6357_v34  ;;  %v2663_v49 = vpop.permute.xlu0 %2662 }
 0x40a   : > { %v2664_v47 = vsel %vm7758_vm12, %v2661_v54, %v2663_v49  ;;  %v2670_v58 = vmul.f32 %v2663_v49, %v6320_v2  ;;  %vm2830_vm12 = vcmask 97280  }
 0x40b   : > { %v4543_v5 = vpack.i.bf16 %v3057_v24, %v3056_v15  ;;  %v2669_v41 = vmul.f32 %v2664_v47, %v6357_v34  ;;  %v2831_v57 = vsel %vm2830_vm12, %v6088_v1, %v6060_v59  ;;  %vm7765_vm12 = vcmask 72704  }
 0x40c   : > { %2678 = vrot.lane.b32.xlu0 %v2670_v58, %s7759_s8  ;;  %v2836_v61 = vmul.f32 %v2831_v57, %v6357_v34  ;;  %v2754_v1 = vsel %vm7765_vm12, %v6066_v60, %v6236_v25  ;;  %vm7768_vm12 = vcmask 39936  }
 0x40d   : > { %v4548_v63 = vpack.i.bf16 %v2669_v41, %v2668_v27  ;;  %4544 = vrot.lane.b32.xlu1 %v4543_v5, %s7695_s21  ;;  %v2759_v22 = vmul.f32 %v2754_v1, %v6357_v34 }
 0x40e   : > { %v4513_v55 = vpack.i.bf16 %v2836_v61, %v2835_v14  ;;  %v1453_v14 = vld [vmem:[#allocation8 + $0x28] sm:$0xff] }
 0x40f   : > { %v3018_v19 = vpop.permute.xlu1 %3017  ;;  %v2603_v38 = vpop.permute.xlu2 %2602  ;;  %4549 = vrot.lane.b32.xlu2 %v4548_v63, %s7759_s8  ;;  %v4523_v20 = vpack.i.bf16 %v2759_v22, %v2758_v31 }
 0x410   : > { %v3021_v28 = vsel %vm7760_vm2, %v3018_v19, %v6479_v39  ;;  %v3025_v29 = vmul.f32 %v3018_v19, %v6361_v44  ;;  %vm7762_vm2 = vcmask 138240   ;;  %v2610_v23 = vmul.f32 %v2603_v38, %v6320_v2 }
 0x411   : > { %v3026_v13 = vmul.f32 %v3021_v28, %v6357_v34  ;;  %v2631_v33 = vpop.permute.xlu0 %2630 }
 0x412   : > { %v2638_v7 = vmul.f32 %v2631_v33, %v6361_v44 }
 0x413   : > { %v4553_v40 = vpack.i.bf16 %v3026_v13, %v3025_v29 }
 0x414   : > { %4504 = vrot.lane.b32.xlu0 %v4503_v56, %s5069_s10  ;;  %s7763_s10 = smov 111  }
 0x415   : > { %4554 = vrot.lane.b32.xlu1 %v4553_v40, %s7761_s6 }
 0x417   : > { %v2633_v46 = vpop.permute.xlu1 %2632  ;;  %v2570_v54 = vpop.permute.xlu2 %2569  ;;  %3097 = vrot.lane.b32.xlu2 %v3089_v9, %s7757_s1 }
 0x418   : > { %v2640_v53 = vmul.f32 %v2633_v46, %v6320_v2  ;;  %v2634_v15 = vsel %vm7768_vm12, %v2631_v33, %v2633_v46  ;;  %v6565_v24 = vmul.f32 %v2570_v54, %v6361_v44  ;;  %vm7770_vm12 = vcmask 7168  }
 0x419   : > { %v6519_v62 = vpop.permute.xlu0 %2988  ;;  %v2639_v27 = vmul.f32 %v2634_v15, %v6357_v34 }
 0x41a   : > { %v2990_v12 = vsel %vm7762_vm2, %v2987_v52, %v6519_v62  ;;  %vm7766_vm2 = vcmask 130048  }
 0x41b   : > { %v2995_v48 = vmul.f32 %v2990_v12, %v6357_v34 }
 0x41c   : > { %4509 = vrot.lane.b32.xlu0 %v4508_v51, %s5071_s9  ;;  %s7786_s9 = smov 64  }
 0x41d   : > { %v4563_v18 = vpack.i.bf16 %v2995_v48, %v2994_v30  ;;  %2648 = vrot.lane.b32.xlu1 %v2640_v53, %s7742_s11 }
 0x41f   : > { %v2601_v10 = vpop.permute.xlu1 %2600  ;;  %v6533_v37 = vpop.permute.xlu2 %2540  ;;  %4564 = vrot.lane.b32.xlu2 %v4563_v18, %s7763_s10 }
 0x420   : > { %v2604_v35 = vsel %vm7764_vm15, %v2601_v10, %v2603_v38  ;;  %v2608_v42 = vmul.f32 %v2601_v10, %v6361_v44  ;;  %vm7767_vm15 = vcmask 23552   ;;  %v4558_v38 = vpack.i.bf16 %v2639_v27, %v2638_v7 }
 0x421   : > { %v2609_v32 = vmul.f32 %v2604_v35, %v6357_v34  ;;  %v2956_v59 = vpop.permute.xlu0 %2955 }
 0x422   : > { %v6554_v17 = vmul.f32 %v2956_v59, %v6361_v44 }
 0x423   : > { %v4568_v8 = vpack.i.bf16 %v2609_v32, %v2608_v42 }
 0x424   : > { %4514 = vrot.lane.b32.xlu0 %v4513_v55, %s5072_s24 }
 0x425   : > { %4569 = vrot.lane.b32.xlu1 %v4568_v8, %s7739_s14  ;;  %v1452_v8 = vld [vmem:[#allocation8 + $0x20] sm:$0xff] }
 0x427   : > { %v6548_v26 = vpop.permute.xlu1 %2957  ;;  %v2942_v16 = vpop.permute.xlu2 %2941  ;;  %2618 = vrot.lane.b32.xlu2 %v2610_v23, %s7739_s14  ;;  %s7782_s14 = smov 112  }
 0x428   : > { %v2959_v4 = vsel %vm7766_vm2, %v2956_v59, %v6548_v26  ;;  %vm7769_vm2 = vcmask 15360  }
 0x429   : > { %v6557_v25 = vmul.f32 %v2959_v4, %v6357_v34  ;;  %v6559_v52 = vpop.permute.xlu0 %2571 }
 0x42a   : > { %v2573_v60 = vsel %vm7767_vm15, %v2570_v54, %v6559_v52  ;;  %vm2815_vm15 = vcmask 957440  }
 0x42b   : > { %v4638_v49 = vpack.i.bf16 %v6557_v25, %v6554_v17  ;;  %v6570_v47 = vmul.f32 %v2573_v60, %v6357_v34 }
 0x42c   : > { %4524 = vrot.lane.b32.xlu0 %v4523_v20, %s7755_s12 }
 0x42d   : > { %v4653_v58 = vpack.i.bf16 %v6570_v47, %v6565_v24 }
 0x42f   : > { %v2539_v5 = vpop.permute.xlu1 %2538  ;;  %v2783_v41 = vpop.permute.xlu2 %2782 }
 0x430   : > { %v2542_v63 = vsel %vm7769_vm2, %v2539_v5, %v6533_v37  ;;  %v6580_v45 = vmul.f32 %v2539_v5, %v6361_v44  ;;  %vm2943_vm2 = vcmask 924672  }
 0x431   : > { %v6583_v6 = vmul.f32 %v2542_v63, %v6357_v34  ;;  %v2508_v19 = vpop.permute.xlu0 %2507 }
 0x432   : > { %v6596_v40 = vmul.f32 %v2508_v19, %v6361_v44 }
 0x433   : > { %v4658_v28 = vpack.i.bf16 %v6583_v6, %v6580_v45 }
 0x434   : > { %4559 = vrot.lane.b32.xlu0 %v4558_v38, %s7742_s11  ;;  %s7779_s11 = smov 96  }
 0x437   : > { %v6588_v29 = vpop.permute.xlu1 %2509  ;;  %v6590_v13 = vpop.permute.xlu2 %4519 }
 0x438   : > { %v2511_v33 = vsel %vm7770_vm12, %v2508_v19, %v6588_v29  ;;  %v4522_v56 = vunpack.i.h.bf16 %v6590_v13  ;;  %vm7771_vm12 = vcmask 883712  }
 0x439   : > { %v6599_v36 = vmul.f32 %v2511_v33, %v6357_v34  ;;  %v2814_v9 = vpop.permute.xlu0 %2813 }
 0x43a   : > { %v6606_v0 = vsel %vm2815_vm15, %v4522_v56, %v2814_v9  ;;  %v2082_v9 = vld [vmem:[#allocation8 + $0x40] sm:$0xff] }
 0x43b   : > { %v4663_v46 = vpack.i.bf16 %v6599_v36, %v6596_v40 }
 0x43c   : > { %3066 = vrot.lane.b32.xlu0 %v3058_v43, %s7695_s21  ;;  %s7773_s21 = smov 80  }
 0x43f   : > { %v6611_v54 = vpop.permute.xlu1 %2909 }
 0x447   : > { %v6613_v12 = vpop.permute.xlu1 %2877 }
 0x44f   : > { %v6615_v51 = vpop.permute.xlu1 %2845 }
 0x457   : > { %v6617_v30 = vpop.permute.xlu1 %4494  ;;  %v6619_v53 = vpop.permute.xlu2 %4529 }
 0x458   : > { %v4497_v21 = vunpack.i.h.bf16 %v6617_v30  ;;  %v4532_v31 = vunpack.i.h.bf16 %v6619_v53 }
 0x45a   : > { %v6625_v48 = vsel %vm2052_vm8, %v4497_v21, %v2783_v41 }
 0x45f   : > { %v6627_v57 = vpop.permute.xlu1 %2768  ;;  %v6629_v18 = vpop.permute.xlu2 %4539 }
 0x460   : > { %v4542_v41 = vunpack.i.h.bf16 %v6629_v18 }
 0x466   : > { %v1495_v61 = vpop.f32.mrf.mxu1 }
 0x467   : > { %v1496_v10 = vadd.f32 %v1495_v61, %v1453_v14  ;;  %v4500_v35 = vpop.permute.xlu1 %4499  ;;  %v2083_v61 = vld [vmem:[#allocation8 + $0x48] sm:$0xff] }
 0x468   : > { %v4502_v42 = vunpack.i.h.bf16 %v4500_v35  ;;  %v4501_v32 = vunpack.i.l.bf16 %v4500_v35 }
 0x469   : > { %v1499_v59 = vmax.f32 %v1496_v10, 0.0  ;;  %v6631_v55 = vpop.permute.xlu2 %4549 }
 0x46a   : > { %v2944_v1 = vsel %vm2943_vm2, %v4501_v32, %v4502_v42  ;;  %v6633_v23 = vsel %vm2943_vm2, %v4502_v42, %v2942_v16  ;;  %vm7772_vm2 = vmmov %vm7771_vm12  ;;  %v4552_v42 = vunpack.i.h.bf16 %v6631_v55 }
 0x46b   : > { %1505 = vrot.lane.b32.xlu1 %v1499_v59, %s7713_s25  ;;  %3154 = vmatpush.msra.mxu0 %v2944_v1 }
 0x46c   : > { %v1475_v22 = vpop.f32.mrf.mxu3  ;;  %v2739_v4 = vpop.permute.xlu0 %2738 }
 0x46d   : > { %v1476_v60 = vadd.f32 %v1475_v22, %v1452_v8  ;;  %v6640_v20 = vsel %vm1986_vm14, %v4532_v31, %v2739_v4 }
 0x46f   : > { %v1498_v15 = vmax.f32 %v1476_v60, 0.0 }
 0x471   : > { %1503 = vrot.lane.b32.xlu0 %v1498_v15, %s7713_s25  ;;  %v4535_v27 = vpop.permute.xlu1 %4534  ;;  %v3098_v7 = vpop.permute.xlu2 %3097 }
 0x472   : > { %v4537_v5 = vunpack.i.h.bf16 %v4535_v27  ;;  %v4536_v16 = vunpack.i.l.bf16 %v4535_v27 }
 0x474   : > { %v6645_v63 = vsel %vm7771_vm12, %v4537_v5, %v3098_v7  ;;  %v2709_v19 = vpop.permute.xlu0 %2708  ;;  %v3099_v38 = vsel %vm7772_vm2, %v4536_v16, %v4537_v5  ;;  %vm7774_vm12 = vcmask 891904   ;;  %vm2911_vm2 = vcmask 932864  }
 0x475   : > { %3185 = vmatpush.msra.mxu1 %v3099_v38  ;;  %v6651_v33 = vsel %vm1955_vm6, %v4542_v41, %v2709_v19 }
 0x478   : > { %v2105_v43 = vpop.f32.mrf.mxu0 }
 0x479   : > { %v2106_v14 = vadd.f32 %v2105_v43, %v2082_v9  ;;  %v6668_v27 = vpop.permute.xlu2 %4564 }
 0x47a   : > { %v7675_v38 = vunpack.i.h.bf16 %v6668_v27  ;;  %v4566_v9 = vunpack.i.l.bf16 %v6668_v27 }
 0x47b   : > { %v2128_v10 = vmax.f32 %v2106_v14, 0.0 }
 0x47c   : > { %v2125_v35 = vpop.f32.mrf.mxu1 }
 0x47d   : > { %v2126_v32 = vadd.f32 %v2125_v35, %v2083_v61  ;;  %2133 = vrot.lane.b32.xlu1 %v2128_v10, %s7773_s21 }
 0x47e   : > { %v2679_v59 = vpop.permute.xlu0 %2678 }
 0x47f   : > { %v2129_v8 = vmax.f32 %v2126_v32, 0.0  ;;  %v6655_v1 = vpop.permute.xlu1 %4544  ;;  %v6660_v22 = vsel %vm1430_vm9, %v4552_v42, %v2679_v59  ;;  %v3006_v32 = vsel %vm7776_vm0, %v4566_v9, %v7675_v38  ;;  %vm7777_vm0 = vcmask 891904  }
 0x480   : > { %v4547_v4 = vunpack.i.h.bf16 %v6655_v1  ;;  %v4546_v60 = vunpack.i.l.bf16 %v6655_v1 }
 0x481   : > { %2135 = vrot.lane.b32.xlu2 %v2129_v8, %s7773_s21 }
 0x482   : > { %v3068_v15 = vsel %vm7774_vm12, %v4546_v60, %v4547_v4  ;;  %vm7775_vm12 = vcmask 900096  }
 0x483   : > { %3186 = vmatpush.msra.mxu1 %v3068_v15 }
 0x486   : > { %v4505_v5 = vpop.permute.xlu0 %4504 }
 0x487   : > { %v4507_v16 = vunpack.i.h.bf16 %v4505_v5  ;;  %v4506_v7 = vunpack.i.l.bf16 %v4505_v5  ;;  %v6670_v19 = vpop.permute.xlu1 %4554 }
 0x488   : > { %v4557_v43 = vunpack.i.h.bf16 %v6670_v19  ;;  %v4556_v14 = vunpack.i.l.bf16 %v6670_v19  ;;  %v3521_v19 = vld [vmem:[#allocation9 + $0x100] sm:$0xff] }
 0x489   : > { %v2912_v61 = vsel %vm2911_vm2, %v4506_v7, %v4507_v16  ;;  %v6677_v10 = vsel %vm2911_vm2, %v4507_v16, %v6611_v54  ;;  %vm2847_vm2 = vcmask 949248   ;;  %v4521_v16 = vunpack.i.l.bf16 %v6590_v13 }
 0x48a   : > { %3155 = vmatpush.msra.mxu0 %v2912_v61  ;;  %v3037_v35 = vsel %vm7775_vm12, %v4556_v14, %v4557_v43  ;;  %v4496_v61 = vunpack.i.l.bf16 %v6617_v30 }
 0x48b   : > { %3187 = vmatpush.msra.mxu1 %v3037_v35 }
 0x48d   : > { %3188 = vmatpush.msra.mxu1 %v3006_v32 }
 0x48e   : > { %v4510_v59 = vpop.permute.xlu0 %4509 }
 0x48f   : > { %v4512_v8 = vunpack.i.h.bf16 %v4510_v59  ;;  %v4511_v60 = vunpack.i.l.bf16 %v4510_v59  ;;  %v2649_v32 = vpop.permute.xlu1 %2648  ;;  %v2784_v59 = vsel %vm2052_vm8, %v4496_v61, %v4497_v21 }
 0x491   : > { %v2880_v15 = vsel %vm2879_vm4, %v4511_v60, %v4512_v8  ;;  %v6686_v5 = vsel %vm2879_vm4, %v4512_v8, %v6613_v12  ;;  %v2816_v12 = vsel %vm2815_vm15, %v4521_v16, %v4522_v56  ;;  %v4531_v60 = vunpack.i.l.bf16 %v6619_v53 }
 0x492   : > { %3156 = vmatpush.msra.mxu0 %v2880_v15  ;;  %v4551_v56 = vunpack.i.l.bf16 %v6631_v55  ;;  %vm7793_vm4 = vcmask 654336  }
 0x493   : > { %v2740_v30 = vsel %vm1986_vm14, %v4531_v60, %v4532_v31  ;;  %vm7785_vm14 = vcmask 261120   ;;  %vm7794_vm15 = vmmov %vm7793_vm4 }
 0x494   : > { %vm7795_vm12 = vmmov %vm7793_vm4 }
 0x496   : > { %v4515_v54 = vpop.permute.xlu0 %4514 }
 0x497   : > { %v4517_v7 = vunpack.i.h.bf16 %v4515_v54  ;;  %v4516_v14 = vunpack.i.l.bf16 %v4515_v54  ;;  %v6710_v21 = vpop.permute.xlu1 %4569 }
 0x498   : > { %v7674_v61 = vunpack.i.h.bf16 %v6710_v21 }
 0x499   : > { %v2848_v35 = vsel %vm2847_vm2, %v4516_v14, %v4517_v7  ;;  %v6691_v9 = vsel %vm2847_vm2, %v4517_v7, %v6615_v51  ;;  %v4541_v51 = vunpack.i.l.bf16 %v6629_v18  ;;  %vm7797_vm2 = vcmask 785408  }
 0x49a   : > { %3157 = vmatpush.msra.mxu0 %v2848_v35  ;;  %v4571_v35 = vunpack.i.l.bf16 %v6710_v21 }
 0x49b   : > { %v2710_v16 = vsel %vm1955_vm6, %v4541_v51, %v4542_v41  ;;  %vm7778_vm6 = vcmask 392192   ;;  %v7783_v51 = vld [vmem:[#allocation18_spill] sm:$0xff] }
 0x49c   : > { %3158 = vmatpush.msra.mxu0 %v2816_v12  ;;  %v2620_v18 = vsel %vm461_vm3, %v4571_v35, %v7674_v61  ;;  %vm7780_vm8 = vmmov %vm7778_vm6  ;;  %v7787_v35 = vld [vmem:[#allocation24_spill] sm:$0xff] }
 0x49e   : > { %v4525_v8 = vpop.permute.xlu0 %4524  ;;  %3159 = vmatpush.msra.mxu0 %v2784_v59 }
 0x49f   : > { %v4527_v15 = vunpack.i.h.bf16 %v4525_v8  ;;  %v4526_v54 = vunpack.i.l.bf16 %v4525_v8 }
 0x4a1   : > { %v2770_v7 = vsel %vm2019_vm1, %v4526_v54, %v4527_v15  ;;  %v6704_v13 = vsel %vm2019_vm1, %v4527_v15, %v6627_v57  ;;  %v2680_v57 = vsel %vm1430_vm9, %v4551_v56, %v4552_v42  ;;  %vm7781_vm9 = vmmov %vm7778_vm6  ;;  %vm7791_vm1 = vcmask 523264  }
 0x4a2   : > { %3160 = vmatpush.msra.mxu0 %v2770_v7 }
 0x4a4   : > { %3161 = vmatpush.msra.mxu0 %v2740_v30  ;;  %v7784_v30 = vld [vmem:[#allocation17_spill] sm:$0xff] }
 0x4a6   : > { %v4560_v14 = vpop.permute.xlu0 %4559  ;;  %3162 = vmatpush.msra.mxu0 %v2710_v16  ;;  %v1558_v16 = vsel %vm7785_vm14, %v7784_v30, %v5951_v11 }
 0x4a7   : > { %v4562_v53 = vunpack.i.h.bf16 %v4560_v14  ;;  %v4561_v12 = vunpack.i.l.bf16 %v4560_v14 }
 0x4a8   : > { %3163 = vmatpush.msra.mxu0 %v2680_v57 }
 0x4a9   : > { %v2650_v31 = vsel %vm1397_vm11, %v4561_v12, %v4562_v53  ;;  %v6722_v59 = vsel %vm1397_vm11, %v4562_v53, %v2649_v32  ;;  %vm7788_vm11 = vcmask 130048   ;;  %v6760_v12 = vpop.permute.xlu2 %2618 }
 0x4aa   : > { %3164 = vmatpush.msra.mxu0 %v2650_v31  ;;  %v1528_v53 = vsel %vm7788_vm11, %v7787_v35, %v5981_v3 }
 0x4ac   : > { %3165 = vmatpush.msra.mxu0 %v2620_v18 }
 0x4ae   : > { %v3067_v55 = vpop.permute.xlu0 %3066 }
 0x4af   : > { %v6730_v41 = vsel %vm7777_vm0, %v4547_v4, %v3067_v55  ;;  %v7789_v55 = vld [vmem:[#allocation20_spill] sm:$0xff]  ;;  %vm7798_vm0 = vmmov %vm7793_vm4 }
 0x4dd   : > { %v1506_v42 = vpop.permute.xlu1 %1505 }
 0x4de   : > { %v1512_v8 = vsel %vm7778_vm6, %v1506_v42, 0.0  ;;  %vm7802_vm6 = vmmov %vm7788_vm11 }
 0x4df   : > { %1586 = vrot.lane.b32.xlu2 %v1512_v8, %s7773_s21  ;;  %v1564_v32 = vmul.f32 %v5951_v11, %v1512_v8  ;;  %v1638_v60 = vmul.f32 %v6020_v50, %v1512_v8  ;;  %v1534_v4 = vmul.f32 %v5981_v3, %v1512_v8  ;;  %v1608_v7 = vmul.f32 %v7783_v51, %v1512_v8  ;;  %vm7812_vm11 = vmmov %vm7802_vm6 }
 0x4e1   : > { %1572 = vrot.lane.b32.xlu0 %v1564_v32, %s7779_s11  ;;  %1646 = vrot.lane.b32.xlu1 %v1638_v60, %s7713_s25  ;;  %v7790_v60 = vld [vmem:[#allocation19_spill] sm:$0xff] }
 0x4e3   : > { %v1504_v15 = vpop.permute.xlu0 %1503 }
 0x4e4   : > { %v6739_v54 = vsel %vm7780_vm8, %v1504_v15, %v1506_v42  ;;  %v6742_v1 = vsel %vm7781_vm9, 0.0, %v1504_v15  ;;  %v1669_v42 = vmul.f32 %v7789_v55, %v1512_v8  ;;  %v1602_v15 = vsel %vm7791_vm1, %v7790_v60, %v7783_v51  ;;  %v2136_v8 = vpop.permute.xlu2 %2135  ;;  %vm7804_vm8 = vmmov %vm7785_vm14 }
 0x4e5   : > { %v4573_v56 = vpack.i.bf16 %v6739_v54, %v6742_v1  ;;  %v1562_v14 = vmul.f32 %v7784_v30, %v6742_v1  ;;  %v1563_v57 = vmul.f32 %v1558_v16, %v6739_v54  ;;  %v1532_v31 = vmul.f32 %v7787_v35, %v6742_v1  ;;  %vm7809_vm14 = vmmov %vm7791_vm1 }
 0x4e6   : > { %v1533_v11 = vmul.f32 %v1528_v53, %v6739_v54  ;;  %v1606_v3 = vmul.f32 %v7790_v60, %v6742_v1  ;;  %vm7815_vm1 = vmmov %vm7804_vm8 }
 0x4e7   : > { %1542 = vrot.lane.b32.xlu2 %v1534_v4, %s7782_s14  ;;  %v4583_v18 = vpack.i.bf16 %v1563_v57, %v1562_v14 }
 0x4e8   : > { %v4578_v32 = vpack.i.bf16 %v1533_v11, %v1532_v31 }
 0x4e9   : > { %1616 = vrot.lane.b32.xlu0 %v1608_v7, %s7786_s9  ;;  %4574 = vrot.lane.b32.xlu1 %v4573_v56, %s7773_s21  ;;  %v1607_v7 = vmul.f32 %v1602_v15, %v6739_v54  ;;  %v7792_v56 = vld [vmem:[#allocation16_spill] sm:$0xff]  ;;  %v7799_v15 = vld [vmem:[#allocation25_spill] sm:$0xff] }
 0x4ea   : > { %v1632_v30 = vsel %vm7793_vm4, %v7792_v56, %v6020_v50  ;;  %v1636_v16 = vmul.f32 %v7792_v56, %v6742_v1  ;;  %v7796_v50 = vld [vmem:[#allocation27_spill] sm:$0xff]  ;;  %vm7818_vm4 = vcmask 916480  }
 0x4eb   : > { %v1637_v51 = vmul.f32 %v1632_v30, %v6739_v54  ;;  %v4588_v35 = vpack.i.bf16 %v1607_v7, %v1606_v3  ;;  %v1663_v11 = vsel %vm7797_vm2, %v7796_v50, %v7789_v55  ;;  %v7800_v55 = vld [vmem:[#allocation36_spill] sm:$0xff]  ;;  %v7801_v7 = vld [vmem:[#allocation30_spill] sm:$0xff] }
 0x4ec   : > { %v2159_v56 = vsel %vm7802_vm6, %v7801_v7, %v7799_v15 }
 0x4ed   : > { %v4593_v31 = vpack.i.bf16 %v1637_v51, %v1636_v16  ;;  %v7803_v16 = vld [vmem:[#allocation26_spill] sm:$0xff] }
 0x4ee   : > { %v2189_v51 = vsel %vm7804_vm8, %v7803_v16, %v7800_v55  ;;  %vm7826_vm8 = vmmov %vm7809_vm14 }
 0x4ef   : > { %4584 = vrot.lane.b32.xlu2 %v4583_v18, %s7779_s11  ;;  %v2134_v4 = vpop.permute.xlu1 %2133  ;;  %v1667_v18 = vmul.f32 %v7796_v50, %v6742_v1 }
 0x4f0   : > { %v6782_v14 = vsel %vm7794_vm15, %v2134_v4, %v2136_v8  ;;  %v6785_v57 = vsel %vm7795_vm12, 0.0, %v2134_v4  ;;  %vm7821_vm15 = vmmov %vm7797_vm2 }
 0x4f1   : > { %1677 = vrot.lane.b32.xlu0 %v1669_v42, %s7707_s26  ;;  %4579 = vrot.lane.b32.xlu1 %v4578_v32, %s7782_s14  ;;  %v4603_v53 = vpack.i.bf16 %v6782_v14, %v6785_v57  ;;  %v1668_v42 = vmul.f32 %v1663_v11, %v6739_v54  ;;  %v6799_v32 = vsel %vm7798_vm0, %v2136_v8, 0.0  ;;  %v2163_v30 = vmul.f32 %v7801_v7, %v6785_v57  ;;  %v7807_v7 = vld [vmem:[#allocation28_spill] sm:$0xff]  ;;  %vm7822_vm12 = vmmov %vm7815_vm1 }
 0x4f2   : > { %v2165_v4 = vmul.f32 %v7799_v15, %v6799_v32  ;;  %v2195_v3 = vmul.f32 %v7800_v55, %v6799_v32  ;;  %v2164_v8 = vmul.f32 %v2159_v56, %v6782_v14  ;;  %v2255_v56 = vmul.f32 %v7807_v7, %v6799_v32  ;;  %vm7823_vm2 = vmmov %vm7815_vm1 }
 0x4f3   : > { %v4598_v60 = vpack.i.bf16 %v1668_v42, %v1667_v18  ;;  %v2193_v18 = vmul.f32 %v7803_v16, %v6785_v57  ;;  %v2194_v42 = vmul.f32 %v2189_v51, %v6782_v14  ;;  %vm7824_vm0 = vmmov %vm7781_vm9 }
 0x4f4   : > { %vm7825_vm6 = vmmov %vm7824_vm0 }
 0x4f7   : > { %4589 = vrot.lane.b32.xlu2 %v4588_v35, %s7786_s9  ;;  %v7805_v35 = vld [vmem:[#allocation31_spill] sm:$0xff] }
 0x4f8   : > { %v2225_v55 = vmul.f32 %v7805_v35, %v6799_v32 }
 0x4f9   : > { %4594 = vrot.lane.b32.xlu0 %v4593_v31, %s7713_s25  ;;  %4604 = vrot.lane.b32.xlu1 %v4603_v53, %s7713_s25  ;;  %v7806_v53 = vld [vmem:[#allocation38_spill] sm:$0xff] }
 0x4fa   : > { %v2219_v31 = vsel %vm7781_vm9, %v7806_v53, %v7805_v35  ;;  %v2223_v50 = vmul.f32 %v7806_v53, %v6785_v57  ;;  %v7811_v53 = vld [vmem:[#allocation39_spill] sm:$0xff]  ;;  %vm7827_vm9 = vmmov %vm7826_vm8 }
 0x4fb   : > { %v2224_v11 = vmul.f32 %v2219_v31, %v6782_v14 }
 0x4fd   : > { %v4618_v15 = vpack.i.bf16 %v2224_v11, %v2223_v50 }
 0x4ff   : > { %4599 = vrot.lane.b32.xlu2 %v4598_v60, %s7707_s26  ;;  %v4608_v60 = vpack.i.bf16 %v2164_v8, %v2163_v30  ;;  %v7808_v30 = vld [vmem:[#allocation33_spill] sm:$0xff] }
 0x500   : > { %v2249_v8 = vsel %vm7809_vm14, %v7808_v30, %v7807_v7  ;;  %v2253_v16 = vmul.f32 %v7808_v30, %v6785_v57  ;;  %v7817_v30 = vld [vmem:[#allocation37_spill] sm:$0xff]  ;;  %vm7828_vm14 = vcmask 654336  }
 0x501   : > { %2173 = vrot.lane.b32.xlu0 %v2165_v4, %s7782_s14  ;;  %2203 = vrot.lane.b32.xlu1 %v2195_v3, %s7779_s11  ;;  %v4613_v4 = vpack.i.bf16 %v2194_v42, %v2193_v18  ;;  %v3027_v3 = vmul.f32 %v6479_v39, %v6320_v2  ;;  %v2254_v51 = vmul.f32 %v2249_v8, %v6782_v14  ;;  %v7810_v39 = vld [vmem:[#allocation29_spill] sm:$0xff] }
 0x502   : > { %v2364_v35 = vmul.f32 %v7810_v39, %v6782_v14  ;;  %v2360_v31 = vsel %vm7812_vm11, %v7810_v39, %v7811_v53  ;;  %v2996_v18 = vmul.f32 %v6519_v62, %v6320_v2  ;;  %v2965_v62 = vmul.f32 %v6548_v26, %v6320_v2  ;;  %vm7829_vm11 = vmmov %vm7828_vm14 }
 0x503   : > { %v4623_v50 = vpack.i.bf16 %v2254_v51, %v2253_v16  ;;  %v2365_v11 = vmul.f32 %v2360_v31, %v6799_v32  ;;  %v2327_v16 = vmul.f32 %v7817_v30, %v6785_v57  ;;  %v2579_v26 = vmul.f32 %v6559_v52, %v6320_v2  ;;  %v7820_v31 = vld [vmem:[#allocation34_spill] sm:$0xff] }
 0x504   : > { %v2297_v17 = vmul.f32 %v7820_v31, %v6785_v57  ;;  %v2517_v52 = vmul.f32 %v6588_v29, %v6320_v2 }
 0x505   : > { %v4633_v42 = vpack.i.bf16 %v2365_v11, %v2364_v35  ;;  %v7819_v35 = vld [vmem:[#allocation40_spill] sm:$0xff]  ;;  %v2548_v11 = vmul.f32 %v6533_v37, %v6320_v2 }
 0x507   : > { %4609 = vrot.lane.b32.xlu2 %v4608_v60, %s7782_s14  ;;  %v7813_v60 = vld [vmem:[#allocation23_spill] sm:$0xff] }
 0x509   : > { %4619 = vrot.lane.b32.xlu1 %v4618_v15, %s7773_s21  ;;  %4614 = vrot.lane.b32.xlu0 %v4613_v4, %s7779_s11  ;;  %v2395_v15 = vmul.f32 %v7813_v60, %v6782_v14  ;;  %v7814_v4 = vld [vmem:[#allocation35_spill] sm:$0xff] }
 0x50f   : > { %2233 = vrot.lane.b32.xlu2 %v2225_v55, %s7773_s21  ;;  %v2391_v55 = vsel %vm7815_vm1, %v7813_v60, %v7814_v4  ;;  %vm7830_vm1 = vmmov %vm7821_vm15 }
 0x511   : > { %3035 = vrot.lane.b32.xlu1 %v3027_v3, %s7761_s6  ;;  %2263 = vrot.lane.b32.xlu0 %v2255_v56, %s7786_s9  ;;  %v2396_v3 = vmul.f32 %v2391_v55, %v6799_v32  ;;  %v7816_v56 = vld [vmem:[#allocation32_spill] sm:$0xff]  ;;  %s4943_s6 = scalar_lea.hbm %s7541_s4, 32 }
 0x512   : > { %v2323_v8 = vsel %vm7818_vm4, %v7817_v30, %v7816_v56  ;;  %vm7831_vm4 = vmmov %vm7830_vm1 }
 0x513   : > { %v4628_v7 = vpack.i.bf16 %v2396_v3, %v2395_v15  ;;  %v2328_v51 = vmul.f32 %v2323_v8, %v6782_v14 }
 0x515   : > { %v4643_v39 = vpack.i.bf16 %v2328_v51, %v2327_v16 }
 0x517   : > { %4624 = vrot.lane.b32.xlu2 %v4623_v50, %s7786_s9  ;;  %v2293_v50 = vsel %vm7821_vm15, %v7820_v31, %v7819_v35  ;;  %vm7832_vm15 = vcmask 916480  }
 0x518   : > { %v2298_v25 = vmul.f32 %v2293_v50, %v6782_v14 }
 0x519   : > { %3004 = vrot.lane.b32.xlu1 %v2996_v18, %s7763_s10  ;;  %4634 = vrot.lane.b32.xlu0 %v4633_v42, %s7782_s14 }
 0x51f   : > { %4629 = vrot.lane.b32.xlu2 %v4628_v7, %s7779_s11 }
 0x521   : > { %2973 = vrot.lane.b32.xlu1 %v2965_v62, %s7782_s14  ;;  %4639 = vrot.lane.b32.xlu0 %v4638_v49, %s7782_s14  ;;  %v4648_v49 = vpack.i.bf16 %v2298_v25, %v2297_v17 }
 0x527   : > { %4644 = vrot.lane.b32.xlu2 %v4643_v39, %s7705_s20 }
 0x529   : > { %2587 = vrot.lane.b32.xlu0 %v2579_v26, %s7734_s30 }
 0x52f   : > { %4649 = vrot.lane.b32.xlu2 %v4648_v49, %s7707_s26 }
 0x531   : > { %2556 = vrot.lane.b32.xlu0 %v2548_v11, %s7736_s5 }
 0x537   : > { %4654 = vrot.lane.b32.xlu2 %v4653_v58, %s7734_s30 }
 0x539   : > { %v1587_v18 = vpop.permute.xlu2 %1586  ;;  %2525 = vrot.lane.b32.xlu0 %v2517_v52, %s7738_s7 }
 0x53f   : > { %4659 = vrot.lane.b32.xlu2 %v4658_v28, %s7736_s5  ;;  %s7918_s5 = sshll.u32 %s5207_s29, 4 }
 0x541   : > { %v1543_v37 = vpop.permute.xlu2 %1542 }
 0x547   : > { %4664 = vrot.lane.b32.xlu2 %v4663_v46, %s7738_s7  ;;  %s263_s7 = scalar_lea.vmem [#allocation11], %s7918_s5 }
 0x548   : > { %s4003_s13 = sshll.u32 %s263_s7, 4  ;;  %s4004_s13 = int_to_ptr.vmem [resolvable:$true] %s4003_s13 }
 0x549   : > { %v4585_v2 = vpop.permute.xlu2 %4584 }
 0x54a   : > { %v4587_v50 = vunpack.i.h.bf16 %v4585_v2  ;;  %v4586_v17 = vunpack.i.l.bf16 %v4585_v2 }
 0x54c   : > { %v1574_v2 = vsel %vm7830_vm1, %v4586_v17, %v4587_v50  ;;  %v1500_v17 = vld [vmem:[#allocation6 + $0x20] sm:$0xff] }
 0x551   : > { %v4590_v29 = vpop.permute.xlu2 %4589 }
 0x552   : > { %v4592_v62 = vunpack.i.h.bf16 %v4590_v29  ;;  %v4591_v30 = vunpack.i.l.bf16 %v4590_v29 }
 0x553   : > { %v1573_v42 = vpop.permute.xlu0 %1572  ;;  %v1647_v60 = vpop.permute.xlu1 %1646 }
 0x554   : > { %v1618_v25 = vsel %vm7826_vm8, %v4591_v30, %v4592_v62 }
 0x559   : > { %v4600_v24 = vpop.permute.xlu2 %4599 }
 0x55a   : > { %v4602_v47 = vunpack.i.h.bf16 %v4600_v24  ;;  %v4601_v58 = vunpack.i.l.bf16 %v4600_v24 }
 0x55b   : > { %v1617_v15 = vpop.permute.xlu0 %1616  ;;  %v4575_v55 = vpop.permute.xlu1 %4574 }
 0x55c   : > { %v1679_v3 = vsel %vm7822_vm12, %v4601_v58, %v4602_v47  ;;  %v4577_v51 = vunpack.i.h.bf16 %v4575_v55  ;;  %v4576_v39 = vunpack.i.l.bf16 %v4575_v55  ;;  %v1619_v49 = vsel %vm7827_vm9, %v4592_v62, %v1617_v15  ;;  %vm7833_vm12 = vmmov %vm7832_vm15 }
 0x55d   : > { %1714 = vmatpush.msrb.mxu2 %v1679_v3  ;;  %v1575_v15 = vsel %vm7831_vm4, %v4587_v50, %v1573_v42  ;;  %v6921_v3 = vld [vmem:[#allocation9 + $0x1a0] sm:$0xff] }
 0x55e   : > { %v1588_v52 = vsel %vm7828_vm14, %v4576_v39, %v4577_v51  ;;  %v1516_v42 = vmul.f32 %v6921_v3, %v6742_v1  ;;  %vm7839_vm14 = vcmask 130048  }
 0x561   : > { %v6905_v45 = vpop.permute.xlu2 %4609 }
 0x562   : > { %v4612_v29 = vunpack.i.h.bf16 %v6905_v45 }
 0x563   : > { %v1678_v6 = vpop.permute.xlu0 %1677  ;;  %v4580_v28 = vpop.permute.xlu1 %4579 }
 0x564   : > { %v1680_v7 = vsel %vm7823_vm2, %v4602_v47, %v1678_v6  ;;  %v4582_v24 = vunpack.i.h.bf16 %v4580_v28  ;;  %v4581_v47 = vunpack.i.l.bf16 %v4580_v28  ;;  %v6923_v6 = vld [vmem:[#allocation9 + $0x1a8] sm:$0xff]  ;;  %vm7834_vm2 = vmmov %vm7833_vm12 }
 0x565   : > { %1734 = vmatpush.msrb.mxu3 %v1680_v7  ;;  %vm7842_vm4 = vmmov %vm7834_vm2 }
 0x566   : > { %v1545_v28 = vsel %vm7834_vm2, %v4582_v24, %v1543_v37 }
 0x569   : > { %v2234_v40 = vpop.permute.xlu2 %2233 }
 0x56b   : > { %v4595_v36 = vpop.permute.xlu0 %4594  ;;  %v6908_v46 = vpop.permute.xlu1 %4604 }
 0x56c   : > { %v4597_v8 = vunpack.i.h.bf16 %v4595_v36  ;;  %v4596_v16 = vunpack.i.l.bf16 %v4595_v36  ;;  %v1517_v36 = vmul.f32 %v6923_v6, %v6739_v54 }
 0x56e   : > { %v1648_v26 = vsel %vm7824_vm0, %v4596_v16, %v4597_v8  ;;  %v1649_v31 = vsel %vm7825_vm6, %v4597_v8, %v1647_v60  ;;  %v1589_v60 = vsel %vm7829_vm11, %v4577_v51, %v1587_v18  ;;  %v1544_v18 = vsel %vm7833_vm12, %v4581_v47, %v4582_v24  ;;  %vm7835_vm0 = vmmov %vm7830_vm1 }
 0x56f   : > { %1715 = vmatpush.msrb.mxu2 %v1648_v26  ;;  %1735 = vmatpush.msrb.mxu3 %v1649_v31  ;;  %vm7836_vm6 = vmmov %vm7829_vm11  ;;  %vm7840_vm11 = vcmask 261120   ;;  %vm7841_vm1 = vcmask 392192  }
 0x570   : > { %vm7837_vm8 = vmmov %vm7835_vm0 }
 0x571   : > { %1716 = vmatpush.msrb.mxu2 %v1618_v25  ;;  %v6914_v11 = vpop.permute.xlu2 %4624  ;;  %1736 = vmatpush.msrb.mxu3 %v1619_v49  ;;  %vm7843_vm12 = vmmov %vm7827_vm9 }
 0x572   : > { %v4627_v50 = vunpack.i.h.bf16 %v6914_v11 }
 0x573   : > { %v2174_v58 = vpop.permute.xlu0 %2173  ;;  %v2204_v55 = vpop.permute.xlu1 %2203  ;;  %1717 = vmatpush.msrb.mxu2 %v1588_v52  ;;  %1737 = vmatpush.msrb.mxu3 %v1589_v60  ;;  %v6971_v60 = vld [vmem:[#allocation9 + $0x1b0] sm:$0xff] }
 0x574   : > { %v6928_v7 = vsel %vm7832_vm15, %v4612_v29, %v2174_v58  ;;  %vm3150_vm15 = vcmask 326656  }
 0x575   : > { %1718 = vmatpush.msrb.mxu2 %v1574_v2  ;;  %1738 = vmatpush.msrb.mxu3 %v1575_v15  ;;  %v2347_v15 = vmul.f32 %v6971_v60, %v6782_v14 }
 0x577   : > { %1719 = vmatpush.msrb.mxu2 %v1544_v18  ;;  %1739 = vmatpush.msrb.mxu3 %v1545_v28 }
 0x579   : > { %v6936_v62 = vpop.permute.xlu2 %4629  ;;  %1720 = vmatpush.msrb.mxu2 %v1516_v42  ;;  %1740 = vmatpush.msrb.mxu3 %v1517_v36  ;;  %v4607_v42 = vunpack.i.h.bf16 %v6908_v46 }
 0x57a   : > { %v7673_v30 = vunpack.i.h.bf16 %v6936_v62  ;;  %v4631_v8 = vunpack.i.l.bf16 %v6936_v62  ;;  %4126 = vmatmul.msk.f32.vlgmr.msrb.gmra.mxu2 %vm1454_vm7, %v1500_v17  ;;  %4127 = vmatmul.msk.f32.vlgmr.msrb.gmra.mxu3 %vm1454_vm7, %v1500_v17  ;;  %vm7838_vm7 = vmmov %vm7834_vm2 }
 0x57b   : > { %v6940_v16 = vpop.permute.xlu0 %4614  ;;  %v6942_v51 = vpop.permute.xlu1 %4619  ;;  %vm7844_vm2 = vmmov %vm7836_vm6 }
 0x57c   : > { %v4617_v37 = vunpack.i.h.bf16 %v6940_v16  ;;  %v4622_v39 = vunpack.i.h.bf16 %v6942_v51  ;;  %v2407_v54 = vsel %vm7835_vm0, %v4631_v8, %v7673_v30  ;;  %v4606_v8 = vunpack.i.l.bf16 %v6908_v46 }
 0x57d   : > { %2446 = vmatpush.msra.mxu2 %v2407_v54 }
 0x57e   : > { %v6950_v1 = vsel %vm7836_vm6, %v4622_v39, %v2234_v40  ;;  %v6955_v26 = vsel %vm7837_vm8, %v4617_v37, %v2204_v55  ;;  %vm7845_vm6 = vmmov %vm7842_vm4  ;;  %vm7846_vm8 = vcmask 900096  }
 0x581   : > { %v6957_v31 = vpop.permute.xlu2 %4644 }
 0x582   : > { %v7676_v58 = vunpack.i.h.bf16 %v6957_v31  ;;  %v4646_v55 = vunpack.i.l.bf16 %v6957_v31 }
 0x583   : > { %v2264_v25 = vpop.permute.xlu0 %2263  ;;  %v3036_v38 = vpop.permute.xlu1 %3035 }
 0x584   : > { %v6963_v49 = vsel %vm7827_vm9, %v4627_v50, %v2264_v25  ;;  %v2339_v25 = vsel %vm7839_vm14, %v4646_v55, %v7676_v58  ;;  %v2279_v55 = vsel %vm7841_vm1, %v4606_v8, %v4607_v42  ;;  %v7009_v58 = vld [vmem:[#allocation6 + $0x40] sm:$0xff]  ;;  %v4611_v8 = vunpack.i.l.bf16 %v6905_v45  ;;  %v7042_v45 = vld [vmem:[#allocation9 + $0x1b8] sm:$0xff]  ;;  %vm7855_vm14 = vmmov %vm7835_vm0 }
 0x585   : > { %vm7848_vm9 = vcmask 908288  }
 0x589   : > { %v6965_v40 = vpop.permute.xlu2 %4649 }
 0x58a   : > { %v4652_v18 = vunpack.i.h.bf16 %v6965_v40  ;;  %v4651_v28 = vunpack.i.l.bf16 %v6965_v40 }
 0x58b   : > { %v6967_v52 = vpop.permute.xlu0 %4634 }
 0x58c   : > { %v7672_v24 = vunpack.i.h.bf16 %v6967_v52  ;;  %v4636_v47 = vunpack.i.l.bf16 %v6967_v52 }
 0x58e   : > { %v2376_v2 = vsel %vm7838_vm7, %v4636_v47, %v7672_v24  ;;  %v4626_v47 = vunpack.i.l.bf16 %v6914_v11  ;;  %v4621_v11 = vunpack.i.l.bf16 %v6942_v51  ;;  %vm7849_vm7 = vmmov %vm7842_vm4 }
 0x58f   : > { %2447 = vmatpush.msra.mxu2 %v2376_v2 }
 0x591   : > { %v6983_v36 = vpop.permute.xlu2 %4654  ;;  %2448 = vmatpush.msra.mxu2 %v2347_v15  ;;  %v2309_v15 = vsel %vm7840_vm11, %v4651_v28, %v4652_v18  ;;  %v3641_v28 = vld [vmem:[#allocation9 + $0x230] sm:$0xff] }
 0x592   : > { %v4657_v54 = vunpack.i.h.bf16 %v6983_v36  ;;  %v4656_v17 = vunpack.i.l.bf16 %v6983_v36  ;;  %3645 = vrot.lane.b32.xlu0 %v3641_v28, %s7782_s14  ;;  %v7030_v28 = vld [vmem:[#allocation9 + $0x200] sm:$0xff] }
 0x593   : > { %v6992_v2 = vpop.permute.xlu0 %4639  ;;  %2449 = vmatpush.msra.mxu2 %v2339_v25  ;;  %v3741_v36 = vld [vmem:[#allocation9 + $0x360] sm:$0xff] }
 0x594   : > { %v4642_v24 = vunpack.i.h.bf16 %v6992_v2  ;;  %v4641_v30 = vunpack.i.l.bf16 %v6992_v2  ;;  %v2589_v61 = vsel %vm428_vm13, %v4656_v17, %v4657_v54  ;;  %v4616_v17 = vunpack.i.l.bf16 %v6940_v16  ;;  %v3773_v2 = vld [vmem:[#allocation9 + $0x378] sm:$0xff] }
 0x595   : > { %2450 = vmatpush.msra.mxu2 %v2309_v15  ;;  %3166 = vmatpush.msra.mxu0 %v2589_v61  ;;  %v2265_v61 = vsel %vm7843_vm12, %v4626_v47, %v4627_v50 }
 0x596   : > { %v2975_v25 = vsel %vm7842_vm4, %v4641_v30, %v4642_v24  ;;  %v3611_v30 = vld [vmem:[#allocation9 + $0x220] sm:$0xff]  ;;  %v2205_v47 = vsel %vm7835_vm0, %v4616_v17, %v4617_v37  ;;  %v3551_v17 = vld [vmem:[#allocation9 + $0x150] sm:$0xff] }
 0x597   : > { %2451 = vmatpush.msra.mxu2 %v2279_v55  ;;  %3189 = vmatpush.msra.mxu1 %v2975_v25 }
 0x598   : > { %4132 = vmatmul.msk.f32.vlgmr.msra.gmra.mxu1 %vm3150_vm15, %v7009_v58  ;;  %3615 = vrot.lane.b32.xlu2 %v3611_v30, %s7779_s11  ;;  %v3711_v30 = vld [vmem:[#allocation9 + $0x358] sm:$0xff] }
 0x599   : > { %3194 = vmatpush.msrb.mxu1 %v6633_v23  ;;  %v7015_v51 = vpop.permute.xlu2 %4659  ;;  %2452 = vmatpush.msra.mxu2 %v2265_v61  ;;  %v2235_v23 = vsel %vm7844_vm2, %v4621_v11, %v4622_v39  ;;  %v3612_v61 = vld [vmem:[#allocation9 + $0x228] sm:$0xff]  ;;  %v3005_v39 = vpop.permute.xlu1 %3004 }
 0x59a   : > { %v4662_v15 = vunpack.i.h.bf16 %v7015_v51  ;;  %v4661_v55 = vunpack.i.l.bf16 %v7015_v51  ;;  %3617 = vrot.lane.b32.xlu0 %v3612_v61, %s7779_s11 }
 0x59b   : > { %3195 = vmatpush.msrb.mxu1 %v6677_v10  ;;  %2453 = vmatpush.msra.mxu2 %v2235_v23  ;;  %v2588_v50 = vpop.permute.xlu0 %2587  ;;  %v2175_v10 = vsel %vm7845_vm6, %v4611_v8, %v4612_v29  ;;  %v3679_v8 = vld [vmem:[#allocation9 + $0x340] sm:$0xff]  ;;  %v3259_v23 = vld [vmem:[#allocation9 + $0x2f8] sm:$0xff] }
 0x59c   : > { %v2558_v25 = vsel %vm395_vm5, %v4661_v55, %v4662_v15  ;;  %v3289_v55 = vld [vmem:[#allocation9 + $0x300] sm:$0xff] }
 0x59d   : > { %3196 = vmatpush.msrb.mxu1 %v6686_v5  ;;  %2454 = vmatpush.msra.mxu2 %v2205_v47  ;;  %v2146_v5 = vmul.f32 %v7030_v28, %v6785_v57  ;;  %v3038_v57 = vsel %vm7846_vm8, %v4557_v43, %v3036_v38  ;;  %v3321_v47 = vld [vmem:[#allocation9 + $0x318] sm:$0xff]  ;;  %vm7864_vm8 = vmmov %vm7849_vm7 }
 0x59e   : > { %3167 = vmatpush.msra.mxu0 %v2558_v25  ;;  %v3258_v25 = vld [vmem:[#allocation9 + $0x2f0] sm:$0xff] }
 0x59f   : > { %3197 = vmatpush.msrb.mxu1 %v6691_v9  ;;  %2455 = vmatpush.msra.mxu2 %v2175_v10  ;;  %v2496_v9 = vld [vmem:[#allocation9 + $0x240] sm:$0xff] }
 0x5a0   : > { %3587 = vrot.lane.b32.xlu2 %v7042_v45, %s7773_s21 }
 0x5a1   : > { %3198 = vmatpush.msrb.mxu1 %v6606_v0  ;;  %v4665_v16 = vpop.permute.xlu2 %4664  ;;  %2456 = vmatpush.msra.mxu2 %v2146_v5  ;;  %v2974_v51 = vpop.permute.xlu1 %2973 }
 0x5a2   : > { %v4667_v37 = vunpack.i.h.bf16 %v4665_v16  ;;  %v4666_v11 = vunpack.i.l.bf16 %v4665_v16  ;;  %3555 = vrot.lane.b32.xlu0 %v3551_v17, %s7786_s9 }
 0x5a3   : > { %3199 = vmatpush.msrb.mxu1 %v6625_v48  ;;  %3225 = vmatpush.msrb.mxu2 %v6645_v63  ;;  %v2498_v48 = vmul.f32 %v2496_v9, %v6361_v44  ;;  %v2483_v63 = vld [vmem:[#allocation6 + $0x38] sm:$0xff]  ;;  %v2557_v29 = vpop.permute.xlu0 %2556  ;;  %v2976_v44 = vsel %vm7849_vm7, %v4642_v24, %v2974_v51  ;;  %v3642_v9 = vld [vmem:[#allocation9 + $0x238] sm:$0xff]  ;;  %vm7866_vm7 = vcmask 130048  }
 0x5a4   : > { %v2527_v0 = vsel %vm362_vm10, %v4666_v11, %v4667_v37  ;;  %v2559_v43 = vsel %vm395_vm5, %v4662_v15, %v2557_v29  ;;  %v2497_v24 = vld [vmem:[#allocation9 + $0x248] sm:$0xff]  ;;  %vm7851_vm5 = vcmask 719872   ;;  %v3552_v29 = vld [vmem:[#allocation9 + $0x158] sm:$0xff] }
 0x5a5   : > { %3200 = vmatpush.msrb.mxu1 %v6704_v13  ;;  %3226 = vmatpush.msrb.mxu2 %v6730_v41  ;;  %v7847_v13 = vunpack.i.h.bf16 %v6668_v27  ;;  %v3522_v27 = vld [vmem:[#allocation9 + $0x108] sm:$0xff]  ;;  %v3478_v51 = vld [vmem:[#allocation9 + $0x78] sm:$0xff] }
 0x5a6   : > { %3168 = vmatpush.msra.mxu0 %v2527_v0  ;;  %v3352_v15 = vld [vmem:[#allocation9 + $0x328] sm:$0xff] }
 0x5a7   : > { %3201 = vmatpush.msrb.mxu1 %v6640_v20  ;;  %3227 = vmatpush.msrb.mxu2 %v3038_v57  ;;  %v3007_v41 = vsel %vm7848_vm9, %v7847_v13, %v3005_v39  ;;  %v7850_v20 = vunpack.i.h.bf16 %v6710_v21  ;;  %v2499_v21 = vmul.f32 %v2497_v24, %v6357_v34  ;;  %v3680_v34 = vld [vmem:[#allocation9 + $0x348] sm:$0xff]  ;;  %v7104_v57 = vld [vmem:[#allocation6 + $0x30] sm:$0xff]  ;;  %v3772_v13 = vld [vmem:[#allocation9 + $0x370] sm:$0xff] }
 0x5a8   : > { %3169 = vmatpush.msra.mxu0 %v2498_v48  ;;  %3525 = vrot.lane.b32.xlu2 %v3521_v19, %s7713_s25 }
 0x5a9   : > { %3170 = vmatmul.f32.vlgmr.msra.gmra.mxu0 %v2483_v63  ;;  %3202 = vmatpush.msrb.mxu1 %v6651_v33  ;;  %v2621_v33 = vsel %vm461_vm3, %v7850_v20, %v6760_v12  ;;  %v3477_v12 = vld [vmem:[#allocation9 + $0x70] sm:$0xff]  ;;  %vm7852_vm3 = vmmov %vm7843_vm12 }
 0x5aa   : > { %3228 = vmatpush.msrb.mxu2 %v3007_v41  ;;  %3527 = vrot.lane.b32.xlu0 %v3522_v27, %s7713_s25  ;;  %v3710_v20 = vld [vmem:[#allocation9 + $0x350] sm:$0xff]  ;;  %vm7860_vm12 = vmmov %vm7845_vm6 }
 0x5ab   : > { %3203 = vmatpush.msrb.mxu1 %v6660_v22  ;;  %v2590_v22 = vsel %vm428_vm13, %v4657_v54, %v2588_v50  ;;  %v2526_v38 = vpop.permute.xlu0 %2525  ;;  %v3742_v54 = vld [vmem:[#allocation9 + $0x368] sm:$0xff]  ;;  %v3412_v50 = vld [vmem:[#allocation9 + $0x218] sm:$0xff]  ;;  %4130 = vmatmul.msk.f32.vlgmr.msra.gmra.mxu2 %vm7851_vm5, %v7104_v57  ;;  %vm7853_vm13 = vmmov %vm7840_vm11 }
 0x5ac   : > { %3229 = vmatpush.msrb.mxu2 %v2976_v44  ;;  %vm7856_vm11 = vmmov %vm7844_vm2 }
 0x5ad   : > { %3204 = vmatpush.msrb.mxu1 %v6722_v59  ;;  %v2528_v59 = vsel %vm362_vm10, %v4667_v37, %v2526_v38  ;;  %v3411_v38 = vld [vmem:[#allocation9 + $0x210] sm:$0xff]  ;;  %vm7854_vm10 = vmmov %vm7842_vm4 }
 0x5ae   : > { %vm7858_vm4 = vmmov %vm7835_vm0 }
 0x5af   : > { %3205 = vmatpush.msrb.mxu1 %v2621_v33  ;;  %vm7861_vm2 = vmmov %vm7852_vm3 }
 0x5b0   : > { %3778 = vrot.lane.b32.xlu2 %v3773_v2, %s7786_s9  ;;  %v7141_v2 = vld [vmem:[#allocation9 + $0x208] sm:$0xff]  ;;  %vm7862_vm0 = vmmov %vm7853_vm13 }
 0x5b1   : > { %3206 = vmatpush.msrb.mxu1 %v2590_v22  ;;  %vm7863_vm6 = vmmov %vm7862_vm0  ;;  %v2147_v46 = vmul.f32 %v7141_v2, %v6782_v14 }
 0x5b2   : > { %3481 = vrot.lane.b32.xlu0 %v3477_v12, %s7705_s20  ;;  %vm7865_vm9 = vmmov %vm7858_vm4 }
 0x5b3   : > { %3207 = vmatpush.msrb.mxu1 %v2559_v43  ;;  %4133 = vmatmul.msk.f32.vlgmr.msrb.gmra.mxu2 %vm3150_vm15, %v7009_v58  ;;  %vm7867_vm5 = vmmov %vm7856_vm11 }
 0x5b5   : > { %3208 = vmatpush.msrb.mxu1 %v2528_v59 }
 0x5b7   : > { %3209 = vmatpush.msrb.mxu1 %v2499_v21 }
 0x5b8   : > { %3210 = vmatmul.f32.vlgmr.msrb.gmra.mxu1 %v2483_v63  ;;  %3745 = vrot.lane.b32.xlu2 %v3741_v36, %s7713_s25  ;;  %v3320_v36 = vld [vmem:[#allocation9 + $0x310] sm:$0xff] }
 0x5ba   : > { %3747 = vrot.lane.b32.xlu0 %v3742_v54, %s7713_s25  ;;  %v3290_v54 = vld [vmem:[#allocation9 + $0x308] sm:$0xff] }
 0x5c0   : > { %3716 = vrot.lane.b32.xlu2 %v3711_v30, %s7707_s26 }
 0x5c2   : > { %3445 = vrot.lane.b32.xlu0 %v6921_v3, %s7782_s14  ;;  %v3351_v3 = vld [vmem:[#allocation9 + $0x320] sm:$0xff] }
 0x5c8   : > { %3683 = vrot.lane.b32.xlu2 %v3679_v8, %s7705_s20 }
 0x5ca   : > { %3685 = vrot.lane.b32.xlu0 %v3680_v34, %s7705_s20 }
 0x5d0   : > { %3417 = vrot.lane.b32.xlu2 %v3412_v50, %s7779_s11 }
 0x5d2   : > { %3385 = vrot.lane.b32.xlu0 %v7030_v28, %s7773_s21  ;;  %v3148_v28 = vld [vmem:[#allocation8 + $0x60] sm:$0xff] }
 0x5d8   : > { %3355 = vrot.lane.b32.xlu2 %v3351_v3, %s7786_s9 }
 0x5da   : > { %3357 = vrot.lane.b32.xlu0 %v3352_v15, %s7786_s9 }
 0x5e0   : > { %3326 = vrot.lane.b32.xlu2 %v3321_v47, %s7713_s25 }
 0x5e2   : > { %3293 = vrot.lane.b32.xlu0 %v3289_v55, %s7707_s26  ;;  %v2397_v55 = vmul.f32 0.0, %v7814_v4  ;;  %v2366_v4 = vmul.f32 0.0, %v7811_v53 }
 0x5e8   : > { %3262 = vrot.lane.b32.xlu2 %v3258_v25, %s7705_s20 }
 0x5ea   : > { %3264 = vrot.lane.b32.xlu0 %v3259_v23, %s7705_s20 }
 0x5f2   : > { %v7110_v63 = vpop.permute.xlu2 %3615 }
 0x5fa   : > { %v7117_v41 = vpop.permute.xlu2 %3587 }
 0x602   : > { %v7123_v19 = vpop.permute.xlu2 %3525 }
 0x604   : > { %v7094_v61 = vpop.permute.xlu0 %3645 }
 0x60a   : > { %v7128_v27 = vpop.permute.xlu2 %3778 }
 0x60c   : > { %v7097_v11 = vpop.permute.xlu0 %3617 }
 0x612   : > { %v7134_v22 = vpop.permute.xlu2 %3745 }
 0x614   : > { %v7100_v0 = vpop.permute.xlu0 %3555 }
 0x615   : > { %v3191_v39 = vpop.f32.mrf.mxu1 }
 0x61a   : > { %v7139_v24 = vpop.permute.xlu2 %3716 }
 0x61b   : > { %v3724_v59 = vmul.f32 0.0, %v7139_v24 }
 0x61c   : > { %v7106_v48 = vpop.permute.xlu0 %3527 }
 0x622   : > { %v7152_v30 = vpop.permute.xlu2 %3683 }
 0x624   : > { %v7113_v17 = vpop.permute.xlu0 %3481 }
 0x626   : > { %v3171_v10 = vpop.f32.mrf.mxu0 }
 0x627   : > { %v3172_v5 = vadd.f32 %v3171_v10, %v3148_v28 }
 0x629   : > { %v3192_v16 = vadd.f32 %v3191_v39, %v3172_v5 }
 0x62a   : > { %v7154_v8 = vpop.permute.xlu2 %3417 }
 0x62b   : > { %v3234_v37 = vmax.f32 %v3192_v16, 0.0 }
 0x62d   : > { %3240 = vrot.lane.b32.xlu1 %v3234_v37, %s7707_s26 }
 0x632   : > { %v3356_v34 = vpop.permute.xlu2 %3355 }
 0x633   : > { %v3363_v23 = vmul.f32 0.0, %v3356_v34 }
 0x635   : > { %3647 = vrot.lane.b32.xlu1 %v3642_v9, %s7782_s14  ;;  %v1722_v9 = vpop.f32.mrf.mxu2 }
 0x63d   : > { %3585 = vrot.lane.b32.xlu1 %v6971_v60, %s7773_s21  ;;  %v7120_v60 = vpop.permute.xlu0 %3747 }
 0x645   : > { %3557 = vrot.lane.b32.xlu1 %v3552_v29, %s7786_s9  ;;  %v3446_v44 = vpop.permute.xlu0 %3445  ;;  %v1700_v29 = vld [vmem:[#allocation8 + $0x30] sm:$0xff] }
 0x64d   : > { %3776 = vrot.lane.b32.xlu1 %v3772_v13, %s7786_s9  ;;  %v7126_v33 = vpop.permute.xlu0 %3685 }
 0x655   : > { %3483 = vrot.lane.b32.xlu1 %v3478_v51, %s7705_s20  ;;  %v7132_v58 = vpop.permute.xlu0 %3385  ;;  %v1723_v51 = vadd.f32 %v1722_v9, %v1700_v29  ;;  %v3149_v9 = vld [vmem:[#allocation8 + $0x68] sm:$0xff]  ;;  %v3211_v29 = vpop.f32.mrf.mxu1 }
 0x65d   : > { %3714 = vrot.lane.b32.xlu1 %v3710_v20, %s7707_s26  ;;  %v7137_v43 = vpop.permute.xlu0 %3357  ;;  %v2436_v20 = vld [vmem:[#allocation8 + $0x50] sm:$0xff] }
 0x65e   : > { %v3359_v15 = vsel %vm7852_vm3, %v3356_v34, %v7137_v43  ;;  %v3453_v34 = vmul.f32 0.0, %v3446_v44  ;;  %vm7868_vm3 = vmmov %vm7841_vm1 }
 0x665   : > { %3447 = vrot.lane.b32.xlu1 %v6923_v6, %s7782_s14  ;;  %v7146_v21 = vpop.permute.xlu0 %3293 }
 0x666   : > { %v3301_v6 = vmul.f32 0.0, %v7146_v21 }
 0x668   : > { %v4668_v12 = vpack.i.bf16 %v3301_v6, %v3724_v59  ;;  %v1745_v59 = vmax.f32 %v1723_v51, 0.0  ;;  %v3393_v51 = vmul.f32 0.0, %v7132_v58 }
 0x66a   : > { %4669 = vrot.lane.b32.xlu0 %v4668_v12, %s7779_s11 }
 0x66d   : > { %3415 = vrot.lane.b32.xlu1 %v3411_v38, %s7779_s11  ;;  %v2458_v38 = vpop.f32.mrf.mxu2 }
 0x66e   : > { %v2459_v6 = vadd.f32 %v2458_v38, %v2436_v20 }
 0x670   : > { %v2481_v12 = vmax.f32 %v2459_v6, 0.0 }
 0x675   : > { %3387 = vrot.lane.b32.xlu1 %v7141_v2, %s7773_s21  ;;  %v3231_v6 = vpop.f32.mrf.mxu2 }
 0x67d   : > { %3324 = vrot.lane.b32.xlu1 %v3320_v36, %s7713_s25  ;;  %v7183_v36 = vadd.f32 %v2481_v12, %v1745_v59  ;;  %v3212_v59 = vadd.f32 %v3211_v29, %v3149_v9 }
 0x685   : > { %3295 = vrot.lane.b32.xlu1 %v3290_v54, %s7707_s26 }
 0x69f   : > { %v7159_v50 = vpop.permute.xlu1 %3240 }
 0x6a0   : > { %v7163_v3 = vsel %vm7853_vm13, 0.0, %v7159_v50  ;;  %vm7869_vm13 = vmmov %vm7861_vm2 }
 0x6a1   : > { %v4673_v47 = vpack.i.bf16 %v7163_v3, %v2397_v55  ;;  %v3364_v25 = vmul.f32 %v3359_v15, %v7163_v3  ;;  %v3489_v10 = vmul.f32 %v7113_v17, %v7163_v3 }
 0x6a3   : > { %4674 = vrot.lane.b32.xlu0 %v4673_v47, %s7779_s11  ;;  %v4698_v28 = vpack.i.bf16 %v3364_v25, %v3363_v23  ;;  %v4678_v5 = vpack.i.bf16 %v3489_v10, %v2366_v4 }
 0x6a5   : > { %4699 = vrot.lane.b32.xlu1 %v4698_v28, %s7786_s9 }
 0x6a7   : > { %v7172_v39 = vpop.permute.xlu1 %3647 }
 0x6ab   : > { %4679 = vrot.lane.b32.xlu0 %v4678_v5, %s7782_s14 }
 0x6af   : > { %v7175_v16 = vpop.permute.xlu1 %3585 }
 0x6b7   : > { %v7177_v37 = vpop.permute.xlu1 %3557 }
 0x6bf   : > { %v7179_v13 = vpop.permute.xlu1 %3776 }
 0x6c7   : > { %v7181_v53 = vpop.permute.xlu1 %3483 }
 0x6cf   : > { %v7185_v54 = vpop.permute.xlu1 %3714 }
 0x6d7   : > { %v7187_v15 = vpop.permute.xlu1 %3447 }
 0x6d8   : > { %v3449_v55 = vsel %vm7854_vm10, %v3446_v44, %v7187_v15  ;;  %vm7870_vm10 = vmmov %vm7841_vm1 }
 0x6d9   : > { %v3454_v23 = vmul.f32 %v3449_v55, %v7163_v3  ;;  %v7205_v55 = vpop.permute.xlu2 %3326 }
 0x6db   : > { %v4683_v47 = vpack.i.bf16 %v3454_v23, %v3453_v34  ;;  %v3232_v34 = vadd.f32 %v3231_v6, %v3212_v59  ;;  %v7859_v6 = vunpack.i.h.bf16 %v6967_v52 }
 0x6dd   : > { %4684 = vrot.lane.b32.xlu0 %v4683_v47, %s7705_s20 }
 0x6df   : > { %v3416_v25 = vpop.permute.xlu1 %3415 }
 0x6e0   : > { %v3419_v28 = vsel %vm7855_vm14, %v3416_v25, %v7154_v8  ;;  %v3423_v10 = vmul.f32 0.0, %v3416_v25  ;;  %vm7871_vm14 = vmmov %vm7862_vm0 }
 0x6e1   : > { %v3424_v4 = vmul.f32 %v3419_v28, %v7163_v3 }
 0x6e3   : > { %v4688_v5 = vpack.i.bf16 %v3424_v4, %v3423_v10  ;;  %v3235_v10 = vmax.f32 %v3232_v34, 0.0  ;;  %v2348_v34 = vmul.f32 %v7042_v45, %v6799_v32  ;;  %v2329_v45 = vmul.f32 %v7816_v56, %v6799_v32 }
 0x6e5   : > { %4689 = vrot.lane.b32.xlu0 %v4688_v5, %s7707_s26 }
 0x6e7   : > { %v7198_v44 = vpop.permute.xlu1 %3387 }
 0x6e8   : > { %v3389_v20 = vsel %vm7856_vm11, %v7132_v58, %v7198_v44  ;;  %v7212_v58 = vpop.permute.xlu0 %3264  ;;  %vm7872_vm11 = vmmov %vm7866_vm7 }
 0x6e9   : > { %v3394_v38 = vmul.f32 %v3389_v20, %v7163_v3 }
 0x6eb   : > { %v4693_v12 = vpack.i.bf16 %v3394_v38, %v3393_v51  ;;  %v7857_v51 = vunpack.i.h.bf16 %v6936_v62 }
 0x6ed   : > { %4694 = vrot.lane.b32.xlu2 %v4693_v12, %s7713_s25 }
 0x6ef   : > { %v3325_v23 = vpop.permute.xlu1 %3324 }
 0x6f0   : > { %v3328_v47 = vsel %vm7841_vm1, %v3325_v23, %v7205_v55  ;;  %v3332_v25 = vmul.f32 0.0, %v3325_v23  ;;  %v7214_v5 = vpop.permute.xlu0 %4669  ;;  %v7230_v23 = vpop.permute.xlu2 %3262  ;;  %vm7873_vm1 = vmmov %vm7862_vm0 }
 0x6f1   : > { %v3333_v28 = vmul.f32 %v3328_v47, %v7163_v3 }
 0x6f3   : > { %v4703_v4 = vpack.i.bf16 %v3333_v28, %v3332_v25  ;;  %v3559_v25 = vsel %vm7861_vm2, %v7100_v0, %v7177_v37  ;;  %vm7877_vm2 = vmmov %vm7862_vm0 }
 0x6f5   : > { %4704 = vrot.lane.b32.xlu1 %v4703_v4, %s7773_s21  ;;  %3242 = vrot.lane.b32.xlu2 %v3235_v10, %s7707_s26 }
 0x715   : > { %v7216_v9 = vpop.permute.xlu0 %4674 }
 0x716   : > { %v4676_v29 = vunpack.i.l.bf16 %v7216_v9 }
 0x718   : > { %v2408_v20 = vsel %vm7858_vm4, %v7857_v51, %v4676_v29  ;;  %v3563_v29 = vmul.f32 %v7100_v0, %v7163_v3  ;;  %vm7874_vm4 = vmmov %vm7866_vm7 }
 0x719   : > { %2466 = vmatpush.msra.mxu3 %v2408_v20 }
 0x71d   : > { %v7222_v38 = vpop.permute.xlu0 %4679 }
 0x71e   : > { %v4681_v59 = vunpack.i.l.bf16 %v7222_v38 }
 0x720   : > { %v2377_v12 = vsel %vm7860_vm12, %v7859_v6, %v4681_v59  ;;  %v3649_v59 = vsel %vm7864_vm8, %v7094_v61, %v7172_v39  ;;  %v3653_v6 = vmul.f32 %v7094_v61, %v7163_v3  ;;  %v3619_v61 = vsel %vm7865_vm9, %v7110_v63, %v7097_v11  ;;  %vm7876_vm12 = vmmov %vm7874_vm4 }
 0x721   : > { %2467 = vmatpush.msra.mxu3 %v2377_v12  ;;  %vm7880_vm8 = vmmov %vm7874_vm4 }
 0x722   : > { %vm7881_vm9 = vmmov %vm7874_vm4 }
 0x723   : > { %2468 = vmatpush.msra.mxu3 %v2348_v34 }
 0x747   : > { %v7232_v47 = vpop.permute.xlu2 %4694 }
 0x74f   : > { %v3243_v62 = vpop.permute.xlu2 %3242 }
 0x750   : > { %v7239_v28 = vsel %vm7862_vm0, %v7159_v50, %v3243_v62  ;;  %v7242_v52 = vsel %vm7863_vm6, %v3243_v62, 0.0  ;;  %vm7878_vm0 = vmmov %vm7868_vm3  ;;  %vm7879_vm6 = vcmask 719872  }
 0x751   : > { %v4708_v10 = vpack.i.bf16 %v7242_v52, %v7239_v28  ;;  %v3655_v4 = vmul.f32 %v7172_v39, %v7242_v52  ;;  %v3564_v51 = vmul.f32 %v3559_v25, %v7239_v28  ;;  %v3654_v56 = vmul.f32 %v3649_v59, %v7239_v28 }
 0x752   : > { %v3625_v0 = vmul.f32 %v7097_v11, %v7242_v52  ;;  %v3535_v12 = vmul.f32 %v7106_v48, %v7242_v52  ;;  %v3753_v34 = vmul.f32 %v7134_v22, %v7239_v28  ;;  %v2299_v39 = vmul.f32 %v7819_v35, %v6799_v32 }
 0x753   : > { %4709 = vrot.lane.b32.xlu1 %v4708_v10, %s7779_s11  ;;  %v4718_v50 = vpack.i.bf16 %v2329_v45, %v3655_v4  ;;  %v4743_v20 = vpack.i.bf16 %v3564_v51, %v3563_v29  ;;  %v4713_v62 = vpack.i.bf16 %v3654_v56, %v3653_v6  ;;  %v3624_v10 = vmul.f32 %v3619_v61, %v7239_v28 }
 0x754   : > { %v4728_v25 = vpack.i.bf16 %v2299_v39, %v3625_v0  ;;  %v4758_v45 = vpack.i.bf16 %v3753_v34, %v3535_v12  ;;  %v3485_v4 = vsel %vm7866_vm7, %v7113_v17, %v7181_v53  ;;  %v3623_v35 = vmul.f32 %v7110_v63, %v7163_v3  ;;  %vm7882_vm7 = vmmov %vm7873_vm1 }
 0x755   : > { %4719 = vrot.lane.b32.xlu2 %v4718_v50, %s7705_s20  ;;  %4744 = vrot.lane.b32.xlu0 %v4743_v20, %s7786_s9  ;;  %v3595_v29 = vmul.f32 %v7117_v41, %v7242_v52  ;;  %v3490_v51 = vmul.f32 %v3485_v4, %v7239_v28  ;;  %v3491_v11 = vmul.f32 %v7181_v53, %v7242_v52  ;;  %v3693_v34 = vmul.f32 0.0, %v7126_v33 }
 0x756   : > { %v4723_v50 = vpack.i.bf16 %v3624_v10, %v3623_v35  ;;  %v3589_v17 = vsel %vm7867_vm5, %v7175_v16, %v7117_v41  ;;  %v3529_v53 = vsel %vm7868_vm3, %v7123_v19, %v7106_v48  ;;  %v3593_v56 = vmul.f32 %v7175_v16, %v7163_v3  ;;  %vm7883_vm5 = vmmov %vm7873_vm1 }
 0x757   : > { %v4738_v20 = vpack.i.bf16 %v6799_v32, %v3595_v29  ;;  %v4768_v59 = vpack.i.bf16 %v3491_v11, %v3490_v51  ;;  %v3594_v63 = vmul.f32 %v3589_v17, %v7239_v28  ;;  %v3534_v32 = vmul.f32 %v3529_v53, %v7239_v28  ;;  %vm7884_vm3 = vmmov %vm7878_vm0 }
 0x758   : > { %v3533_v0 = vmul.f32 %v7123_v19, %v7163_v3  ;;  %v3395_v12 = vmul.f32 %v7198_v44, %v7239_v28  ;;  %v3565_v48 = vmul.f32 %v7177_v37, %v7242_v52  ;;  %v3784_v16 = vmul.f32 %v7179_v13, %v7239_v28 }
 0x759   : > { %v4733_v6 = vpack.i.bf16 %v3594_v63, %v3593_v56  ;;  %v3780_v19 = vsel %vm7869_vm13, %v7179_v13, %v7128_v27  ;;  %v3786_v39 = vmul.f32 0.0, %v7128_v27  ;;  %v3749_v61 = vsel %vm7870_vm10, %v7134_v22, %v7120_v60  ;;  %vm7885_vm13 = vmmov %vm7878_vm0 }
 0x75a   : > { %v4753_v41 = vpack.i.bf16 %v3534_v32, %v3533_v0  ;;  %v3785_v44 = vmul.f32 %v3780_v19, %v7242_v52  ;;  %v3754_v13 = vmul.f32 %v3749_v61, %v7242_v52  ;;  %v3718_v10 = vsel %vm7871_vm14, %v7185_v54, %v7139_v24 }
 0x75b   : > { %4714 = vrot.lane.b32.xlu1 %v4713_v62, %s7705_s20  ;;  %v3270_v62 = vmul.f32 0.0, %v7230_v23  ;;  %v3755_v27 = vmul.f32 0.0, %v7120_v60  ;;  %v3722_v4 = vmul.f32 %v7185_v54, %v7239_v28  ;;  %v3723_v35 = vmul.f32 %v3718_v10, %v7242_v52 }
 0x75c   : > { %v4763_v37 = vpack.i.bf16 %v3786_v39, %v3785_v44  ;;  %v3687_v51 = vsel %vm7872_vm11, %v7152_v30, %v7126_v33  ;;  %v3691_v24 = vmul.f32 %v7152_v30, %v7239_v28  ;;  %v3455_v54 = vmul.f32 %v7187_v15, %v7239_v28 }
 0x75d   : > { %4729 = vrot.lane.b32.xlu2 %v4728_v25, %s7707_s26  ;;  %4759 = vrot.lane.b32.xlu0 %v4758_v45, %s7773_s21  ;;  %v4748_v25 = vpack.i.bf16 %v3784_v16, %v3565_v48  ;;  %v4788_v45 = vpack.i.bf16 %v3270_v62, %v3693_v34  ;;  %v4773_v29 = vpack.i.bf16 %v3755_v27, %v3754_v13  ;;  %vm7886_vm10 = vcmask 523264  }
 0x75e   : > { %v4778_v22 = vpack.i.bf16 %v3723_v35, %v3722_v4  ;;  %v3692_v60 = vmul.f32 %v3687_v51, %v7242_v52  ;;  %v3365_v33 = vmul.f32 %v7137_v43, %v7239_v28  ;;  %v3266_v43 = vsel %vm7874_vm4, %v7230_v23, %v7212_v58  ;;  %v7374_v23 = vpop.permute.xlu0 %4684  ;;  %vm7890_vm4 = vmmov %vm7886_vm10 }
 0x75f   : > { %v3271_v63 = vmul.f32 %v3266_v43, %v7163_v3  ;;  %vm7887_vm14 = vcmask 654336   ;;  %vm7888_vm11 = vcmask 785408  }
 0x760   : > { %v4783_v11 = vpack.i.bf16 %v3692_v60, %v3691_v24 }
 0x763   : > { %4724 = vrot.lane.b32.xlu1 %v4723_v50, %s7707_s26  ;;  %v3296_v50 = vpop.permute.xlu1 %3295 }
 0x764   : > { %v3297_v30 = vsel %vm7873_vm1, %v7146_v21, %v3296_v50  ;;  %v3303_v15 = vmul.f32 %v3296_v50, %v7239_v28  ;;  %v3272_v21 = vmul.f32 %v7212_v58, %v7239_v28  ;;  %vm7889_vm1 = vcmask 916480  }
 0x765   : > { %4739 = vrot.lane.b32.xlu2 %v4738_v20, %s7713_s25  ;;  %4769 = vrot.lane.b32.xlu0 %v4768_v59, %s7782_s14  ;;  %v3425_v20 = vmul.f32 %v7154_v8, %v7239_v28  ;;  %v3302_v59 = vmul.f32 %v3297_v30, %v7163_v3  ;;  %v3334_v8 = vmul.f32 %v7205_v55, %v7239_v28 }
 0x766   : > { %v4798_v53 = vpack.i.bf16 %v3272_v21, %v3271_v63  ;;  %v7381_v34 = vpop.permute.xlu0 %4689 }
 0x767   : > { %v4793_v17 = vpack.i.bf16 %v3303_v15, %v3302_v59  ;;  %v4682_v59 = vunpack.i.h.bf16 %v7222_v38 }
 0x76b   : > { %4734 = vrot.lane.b32.xlu1 %v4733_v6, %s7713_s25  ;;  %v7875_v6 = vunpack.i.h.bf16 %v6957_v31  ;;  %v7369_v0 = vpop.permute.xlu1 %4699 }
 0x76d   : > { %4754 = vrot.lane.b32.xlu2 %v4753_v41, %s7773_s21  ;;  %3403 = vrot.lane.b32.xlu0 %v3395_v12, %s7713_s25  ;;  %s4144_s25 = sshll.u32 %s5119_s19, 4  ;;  %s3990_s19 = scalar_lea.sflag [#allocation5], %s5207_s29 }
 0x76e   : > { %s4001_s30 = scalar_lea.hbm %s7541_s4, %s4144_s25 }
 0x76f   : > { %s4005_s24 = sshll.u32 %s4001_s30, 4  ;;  %s4006_s24 = int_to_ptr.hbm [resolvable:$true] %s4005_s24 }
 0x770   : > { %s4937_s12 = sshra.s32 %s4006_s24, 4  ;;  %s4938_s12 = int_to_ptr.hbm [resolvable:$true] %s4937_s12 }
 0x771   : > { %s4939_s0 = scalar_lea.hbm %s4938_s12, 16  ;;  %p4944_p9 = scmp.lt.s32.totalorder %s4938_s12, %s7541_s4 }
 0x772   : > { %p4940_p1 = scmp.ne.s32.totalorder %s4938_s12, %s4939_s0  ;;  %p4945_p10 = scmp.lt.s32.totalorder %s4943_s6, %s4939_s0 }
 0x773   : > { %4749 = vrot.lane.b32.xlu1 %v4748_v25, %s7786_s9  ;;  %v7376_v48 = vpop.permute.xlu1 %4704 }
 0x774   : > { %p4941_p4 = pnand %p4940_p1, %p5180_p3  ;;  %p4946_p2 = por %p4945_p10, %p4944_p9 }
 0x775   : > { %4764 = vrot.lane.b32.xlu2 %v4763_v37, %s7786_s9  ;;  %4789 = vrot.lane.b32.xlu0 %v4788_v45, %s7782_s14 }
 0x776   : > { %p4942_p8 = pneg %p4941_p4 }
 0x778   : > { %p4947_p11 = pnand %p4946_p2, %p4942_p8 }
 0x77b   : > { %4774 = vrot.lane.b32.xlu1 %v4773_v29, %s7773_s21 }
 0x77d   : > { %4779 = vrot.lane.b32.xlu2 %v4778_v22, %s7779_s11 }
 0x783   : > { %3463 = vrot.lane.b32.xlu1 %v3455_v54, %s7705_s20 }
 0x785   : > { %4784 = vrot.lane.b32.xlu2 %v4783_v11, %s7782_s14 }
 0x78b   : > { %3433 = vrot.lane.b32.xlu1 %v3425_v20, %s7707_s26 }
 0x78d   : > { %3373 = vrot.lane.b32.xlu2 %v3365_v33, %s7786_s9  ;;  %v4677_v33 = vunpack.i.h.bf16 %v7216_v9 }
 0x793   : > { %4794 = vrot.lane.b32.xlu1 %v4793_v17, %s7779_s11 }
 0x795   : > { %3342 = vrot.lane.b32.xlu2 %v3334_v8, %s7773_s21 }
 0x79d   : > { %4799 = vrot.lane.b32.xlu2 %v4798_v53, %s7782_s14 }
 0x7af   : > { %v4720_v56 = vpop.permute.xlu2 %4719 }
 0x7b0   : > { %v4722_v32 = vunpack.i.h.bf16 %v4720_v56 }
 0x7b2   : > { %v2340_v55 = vsel %vm7876_vm12, %v7875_v6, %v4722_v32  ;;  %v4687_v32 = vunpack.i.h.bf16 %v7374_v23  ;;  %v4686_v6 = vunpack.i.l.bf16 %v7374_v23  ;;  %vm7891_vm12 = vmmov %vm7890_vm4  ;;  %v3673_v23 = vld [vmem:[#allocation9 + $0x338] sm:$0xff] }
 0x7b3   : > { %2469 = vmatpush.msra.mxu3 %v2340_v55 }
 0x7b7   : > { %v4730_v41 = vpop.permute.xlu2 %4729 }
 0x7b8   : > { %v4732_v12 = vunpack.i.h.bf16 %v4730_v41  ;;  %v4731_v2 = vunpack.i.l.bf16 %v4730_v41 }
 0x7ba   : > { %v2310_v58 = vsel %vm7877_vm2, %v4652_v18, %v4732_v12  ;;  %v4692_v12 = vunpack.i.h.bf16 %v7381_v34  ;;  %vm7892_vm2 = vmmov %vm7887_vm14 }
 0x7bb   : > { %2470 = vmatpush.msra.mxu3 %v2310_v58  ;;  %v4691_v58 = vunpack.i.l.bf16 %v7381_v34 }
 0x7bf   : > { %v4740_v16 = vpop.permute.xlu2 %4739 }
 0x7c0   : > { %v4742_v19 = vunpack.i.h.bf16 %v4740_v16  ;;  %v4741_v10 = vunpack.i.l.bf16 %v4740_v16 }
 0x7c2   : > { %v2280_v31 = vsel %vm7878_vm0, %v4607_v42, %v4742_v19  ;;  %vm7893_vm0 = vmmov %vm7880_vm8 }
 0x7c3   : > { %2471 = vmatpush.msra.mxu3 %v2280_v31  ;;  %v4697_v31 = vunpack.i.h.bf16 %v7232_v47 }
 0x7c5   : > { %2472 = vmatpush.msra.mxu3 %v6963_v49  ;;  %v7384_v62 = vpop.permute.xlu1 %4709  ;;  %v4721_v49 = vunpack.i.l.bf16 %v4720_v56  ;;  %v3471_v56 = vld [vmem:[#allocation9 + $0x20] sm:$0xff] }
 0x7c6   : > { %v4711_v50 = vunpack.i.l.bf16 %v7384_v62  ;;  %v4712_v16 = vunpack.i.h.bf16 %v7384_v62  ;;  %v3473_v19 = vmul.f32 %v3471_v56, %v7163_v3  ;;  %v3465_v62 = vsel %vm7893_vm0, %v4686_v6, %v4687_v32 }
 0x7c7   : > { %2473 = vmatpush.msra.mxu3 %v6950_v1  ;;  %v7387_v40 = vpop.permute.xlu2 %4754  ;;  %v4745_v18 = vpop.permute.xlu0 %4744 }
 0x7c8   : > { %v4747_v4 = vunpack.i.h.bf16 %v4745_v18  ;;  %v4746_v35 = vunpack.i.l.bf16 %v4745_v18  ;;  %v4757_v51 = vunpack.i.h.bf16 %v7387_v40  ;;  %v4756_v24 = vunpack.i.l.bf16 %v7387_v40 }
 0x7c9   : > { %2474 = vmatpush.msra.mxu3 %v6955_v26  ;;  %v3515_v53 = vsel %vm7888_vm11, %v4677_v33, %v4711_v50  ;;  %v4696_v40 = vunpack.i.l.bf16 %v7232_v47 }
 0x7ca   : > { %v3575_v20 = vsel %vm7886_vm10, %v4746_v35, %v4747_v4  ;;  %v3545_v15 = vsel %vm7887_vm14, %v4756_v24, %v4757_v51  ;;  %vm7901_vm10 = vmmov %vm7892_vm2 }
 0x7cb   : > { %2475 = vmatpush.msra.mxu3 %v6928_v7  ;;  %vm7902_vm14 = vmmov %vm7889_vm1 }
 0x7cd   : > { %2476 = vmatpush.msra.mxu3 %v2147_v46  ;;  %v4715_v42 = vpop.permute.xlu1 %4714 }
 0x7ce   : > { %v4717_v44 = vunpack.i.h.bf16 %v4715_v42  ;;  %v4716_v39 = vunpack.i.l.bf16 %v4715_v42  ;;  %4131 = vmatmul.msk.f32.vlgmr.msra.gmra.mxu3 %vm7879_vm6, %v7104_v57  ;;  %vm7894_vm6 = vmmov %vm7888_vm11 }
 0x7cf   : > { %v7395_v25 = vpop.permute.xlu2 %4764  ;;  %v7399_v37 = vpop.permute.xlu0 %4759  ;;  %vm7903_vm11 = vmmov %vm7893_vm0 }
 0x7d0   : > { %v3665_v1 = vsel %vm7880_vm8, %v4716_v39, %v4717_v44  ;;  %v3666_v26 = vsel %vm7881_vm9, %v4717_v44, %v4721_v49  ;;  %v4766_v43 = vunpack.i.l.bf16 %v7395_v25  ;;  %v4761_v9 = vunpack.i.l.bf16 %v7399_v37  ;;  %v3472_v44 = vld [vmem:[#allocation9 + $0x28] sm:$0xff]  ;;  %vm7895_vm8 = vmmov %vm7883_vm5 }
 0x7d1   : > { %3850 = vmatpush.msrb.mxu3 %v3665_v1  ;;  %3890 = vmatpush.msrb.mxu0 %v3666_v26  ;;  %v4702_v39 = vunpack.i.h.bf16 %v7369_v0  ;;  %v4701_v49 = vunpack.i.l.bf16 %v7369_v0  ;;  %v3516_v26 = vsel %vm7894_vm6, %v4711_v50, %v4712_v16  ;;  %vm7896_vm9 = vmmov %vm7889_vm1  ;;  %v3474_v35 = vmul.f32 %v3472_v44, %v7239_v28  ;;  %v3251_v16 = vld [vmem:[#allocation9 + $0x2e0] sm:$0xff]  ;;  %v1742_v44 = vpop.f32.mrf.mxu3 }
 0x7d2   : > { %v3546_v18 = vsel %vm7892_vm2, %v4757_v51, %v4761_v9  ;;  %vm7908_vm0 = vmmov %vm7895_vm8 }
 0x7d5   : > { %v4725_v7 = vpop.permute.xlu1 %4724 }
 0x7d6   : > { %v4727_v45 = vunpack.i.h.bf16 %v4725_v7  ;;  %v4726_v14 = vunpack.i.l.bf16 %v4725_v7  ;;  %v3435_v7 = vsel %vm7895_vm8, %v4691_v58, %v4692_v12 }
 0x7d7   : > { %v7403_v57 = vpop.permute.xlu2 %4779  ;;  %v4770_v11 = vpop.permute.xlu0 %4769 }
 0x7d8   : > { %v3635_v61 = vsel %vm7882_vm7, %v4726_v14, %v4727_v45  ;;  %v3636_v13 = vsel %vm7883_vm5, %v4727_v45, %v4731_v2  ;;  %v4771_v30 = vunpack.i.l.bf16 %v4770_v11  ;;  %v4772_v46 = vunpack.i.h.bf16 %v4770_v11  ;;  %vm7897_vm7 = vmmov %vm7884_vm3 }
 0x7d9   : > { %3851 = vmatpush.msrb.mxu3 %v3635_v61  ;;  %3891 = vmatpush.msrb.mxu0 %v3636_v13  ;;  %v4762_v45 = vunpack.i.h.bf16 %v7399_v37  ;;  %v4782_v14 = vunpack.i.h.bf16 %v7403_v57  ;;  %v4781_v2 = vunpack.i.l.bf16 %v7403_v57  ;;  %v4707_v13 = vunpack.i.h.bf16 %v7376_v48  ;;  %vm7898_vm5 = vmmov %vm7892_vm2 }
 0x7da   : > { %v3501_v38 = vsel %vm7889_vm1, %v4682_v59, %v4771_v30  ;;  %v4706_v37 = vunpack.i.l.bf16 %v7376_v48  ;;  %v3237_v59 = vld [vmem:[#allocation6 + $0x50] sm:$0xff] }
 0x7dc   : > { %v3344_v48 = vsel %vm7901_vm10, %v4706_v37, %v4707_v13 }
 0x7dd   : > { %v4735_v27 = vpop.permute.xlu1 %4734 }
 0x7de   : > { %v4737_v29 = vunpack.i.h.bf16 %v4735_v27  ;;  %v4736_v22 = vunpack.i.l.bf16 %v4735_v27  ;;  %v3502_v27 = vsel %vm7896_vm9, %v4771_v30, %v4772_v46  ;;  %v3253_v46 = vmul.f32 0.0, %v3251_v16 }
 0x7df   : > { %v7414_v17 = vpop.permute.xlu2 %4784  ;;  %v7433_v42 = vpop.permute.xlu0 %3403 }
 0x7e0   : > { %v3605_v60 = vsel %vm7884_vm3, %v4736_v22, %v4737_v29  ;;  %v3606_v54 = vsel %vm7885_vm13, %v4737_v29, %v4741_v10  ;;  %v4787_v29 = vunpack.i.h.bf16 %v7414_v17  ;;  %v4786_v57 = vunpack.i.l.bf16 %v7414_v17  ;;  %vm7899_vm3 = vmmov %vm7890_vm4 }
 0x7e1   : > { %3852 = vmatpush.msrb.mxu3 %v3605_v60  ;;  %3892 = vmatpush.msrb.mxu0 %v3606_v54  ;;  %v3375_v51 = vsel %vm7899_vm3, %v4701_v49, %v4702_v39  ;;  %vm7900_vm13 = vmmov %vm7894_vm6  ;;  %v3672_v60 = vld [vmem:[#allocation9 + $0x330] sm:$0xff]  ;;  %v4767_v54 = vunpack.i.h.bf16 %v7395_v25  ;;  %v1701_v49 = vld [vmem:[#allocation8 + $0x38] sm:$0xff] }
 0x7e2   : > { %v3734_v24 = vsel %vm7900_vm13, %v4781_v2, %v4782_v14  ;;  %v3703_v11 = vsel %vm7902_vm14, %v4786_v57, %v4787_v29  ;;  %v3674_v33 = vmul.f32 %v3672_v60, %v7239_v28  ;;  %vm7904_vm1 = vmmov %vm7899_vm3  ;;  %vm7916_vm13 = vcmask 64512  }
 0x7e3   : > { %3853 = vmatpush.msrb.mxu3 %v3575_v20  ;;  %v3797_v17 = vsel %vm7904_vm1, %v4766_v43, %v4767_v54  ;;  %vm7910_vm8 = vmmov %vm7904_vm1 }
 0x7e4   : > { %vm7917_vm10 = vmmov %vm7916_vm13 }
 0x7e5   : > { %v4750_v8 = vpop.permute.xlu1 %4749  ;;  %3854 = vmatpush.msrb.mxu3 %v3545_v15 }
 0x7e6   : > { %v4752_v21 = vunpack.i.h.bf16 %v4750_v8  ;;  %v4751_v63 = vunpack.i.l.bf16 %v4750_v8  ;;  %v4671_v8 = vunpack.i.l.bf16 %v7214_v5 }
 0x7e7   : > { %3855 = vmatpush.msrb.mxu3 %v3515_v53  ;;  %v3374_v10 = vpop.permute.xlu2 %3373  ;;  %v4790_v30 = vpop.permute.xlu0 %4789 }
 0x7e8   : > { %v3796_v55 = vsel %vm7890_vm4, %v4752_v21, %v4766_v43  ;;  %v3576_v41 = vsel %vm7891_vm12, %v4747_v4, %v4751_v63  ;;  %v3405_v4 = vsel %vm7897_vm7, %v4696_v40, %v4697_v31  ;;  %v4791_v21 = vunpack.i.l.bf16 %v4790_v30  ;;  %vm7905_vm4 = vmmov %vm7892_vm2  ;;  %v3252_v40 = vld [vmem:[#allocation9 + $0x2e8] sm:$0xff] }
 0x7e9   : > { %3856 = vmatpush.msrb.mxu3 %v3501_v38  ;;  %3881 = vmatpush.msra.mxu2 %v3796_v55  ;;  %vm7906_vm12 = vmmov %vm7894_vm6  ;;  %v3675_v43 = vmul.f32 %v3673_v23, %v7242_v52  ;;  %v3376_v6 = vsel %vm7910_vm8, %v4702_v39, %v3374_v10  ;;  %v4672_v52 = vunpack.i.h.bf16 %v7214_v5 }
 0x7ea   : > { %3893 = vmatpush.msrb.mxu0 %v3576_v41  ;;  %v3735_v28 = vsel %vm7906_vm12, %v4782_v14, %v4671_v8  ;;  %vm7907_vm2 = vmmov %vm7896_vm9  ;;  %v3846_v14 = vld [vmem:[#allocation8 + $0x78] sm:$0xff] }
 0x7eb   : > { %3857 = vmatpush.msrb.mxu3 %v3473_v19  ;;  %vm7909_vm6 = vmmov %vm7897_vm7  ;;  %v4792_v19 = vunpack.i.h.bf16 %v4790_v30 }
 0x7ec   : > { %3894 = vmatpush.msrb.mxu0 %v3546_v18  ;;  %v3406_v9 = vsel %vm7909_vm6, %v4697_v31, %v7433_v42  ;;  %vm7911_vm9 = vmmov %vm7905_vm4  ;;  %v3254_v42 = vmul.f32 %v3252_v40, %v7163_v3 }
 0x7ed   : > { %v4775_v1 = vpop.permute.xlu1 %4774  ;;  %3858 = vmatpush.msrb.mxu3 %v3465_v62  ;;  %vm7912_vm7 = vmmov %vm7906_vm12  ;;  %v3236_v62 = vld [vmem:[#allocation6 + $0x48] sm:$0xff] }
 0x7ee   : > { %v4776_v61 = vunpack.i.l.bf16 %v4775_v1  ;;  %3895 = vmatpush.msrb.mxu0 %v3516_v26  ;;  %v4777_v50 = vunpack.i.h.bf16 %v4775_v1  ;;  %vm7915_vm3 = vmmov %vm7907_vm2  ;;  %v2437_v1 = vld [vmem:[#allocation8 + $0x58] sm:$0xff] }
 0x7ef   : > { %3859 = vmatpush.msrb.mxu3 %v3435_v7  ;;  %v3343_v63 = vpop.permute.xlu2 %3342  ;;  %v1743_v7 = vadd.f32 %v1742_v44, %v1701_v49 }
 0x7f0   : > { %3896 = vmatpush.msrb.mxu0 %v3502_v27  ;;  %v3765_v22 = vsel %vm7898_vm5, %v4762_v45, %v4776_v61  ;;  %v3766_v53 = vsel %vm7905_vm4, %v4776_v61, %v4777_v50  ;;  %v3345_v34 = vsel %vm7911_vm9, %v4707_v13, %v3343_v63  ;;  %vm7914_vm5 = vmmov %vm7907_vm2 }
 0x7f1   : > { %3860 = vmatpush.msrb.mxu3 %v3405_v4  ;;  %3882 = vmatpush.msra.mxu2 %v3765_v22  ;;  %v1746_v13 = vmax.f32 %v1743_v7, 0.0  ;;  %v3845_v4 = vld [vmem:[#allocation8 + $0x70] sm:$0xff] }
 0x7f2   : > { %3897 = vmatpush.msrb.mxu0 %v3474_v35 }
 0x7f3   : > { %3861 = vmatpush.msrb.mxu3 %v3375_v51  ;;  %3883 = vmatpush.msra.mxu2 %v3734_v24  ;;  %v3936_v51 = vld [vmem:[#allocation6 + $0x58] sm:$0xff] }
 0x7f5   : > { %3862 = vmatpush.msrb.mxu3 %v3344_v48  ;;  %3884 = vmatpush.msra.mxu2 %v3703_v11  ;;  %v3464_v20 = vpop.permute.xlu1 %3463  ;;  %v3938_v48 = vld [vmem:[#allocation8 + $0x80] sm:$0xff]  ;;  %v3939_v11 = vld [vmem:[#allocation8 + $0x88] sm:$0xff] }
 0x7f6   : > { %v3466_v15 = vsel %vm7903_vm11, %v4687_v32, %v3464_v20  ;;  %v3704_v32 = vsel %vm7907_vm2, %v4787_v29, %v4791_v21  ;;  %v7921_v21 = vld [vmem:[#allocation21_spill] sm:$0xff] }
 0x7f7   : > { %3885 = vmatpush.msra.mxu2 %v3674_v33  ;;  %3898 = vmatpush.msrb.mxu0 %v3466_v15  ;;  %v4800_v38 = vpop.permute.xlu2 %4799  ;;  %v7922_v63 = vmax.f32 %v7921_v21, 0.0 }
 0x7f8   : > { %4134 = vmatmul.msk.f32.vlgmr.msra.gmra.mxu2 %vm3150_vm15, %v3237_v59  ;;  %v4802_v41 = vunpack.i.h.bf16 %v4800_v38 }
 0x7f9   : > { %3921 = vmatpush.msrb.mxu2 %v3797_v17 }
 0x7fb   : > { %3922 = vmatpush.msrb.mxu2 %v3766_v53 }
 0x7fd   : > { %3923 = vmatpush.msrb.mxu2 %v3735_v28  ;;  %v3434_v56 = vpop.permute.xlu1 %3433 }
 0x7fe   : > { %v3436_v25 = vsel %vm7908_vm0, %v4692_v12, %v3434_v56  ;;  %v4801_v12 = vunpack.i.l.bf16 %v4800_v38 }
 0x7ff   : > { %3924 = vmatpush.msrb.mxu2 %v3704_v32  ;;  %3899 = vmatpush.msrb.mxu0 %v3436_v25 }
 0x800   : > { %v3282_v18 = vsel %vm7914_vm5, %v4792_v19, %v4801_v12  ;;  %v3283_v5 = vsel %vm7915_vm3, %v4801_v12, %v4802_v41 }
 0x801   : > { %3925 = vmatpush.msrb.mxu2 %v3675_v43  ;;  %3900 = vmatpush.msrb.mxu0 %v3406_v9 }
 0x802   : > { %4135 = vmatmul.msk.f32.vlgmr.msrb.gmra.mxu2 %vm3150_vm15, %v3237_v59  ;;  %vm7913_vm15 = vmmov %vm7912_vm7 }
 0x803   : > { %3901 = vmatpush.msrb.mxu0 %v3376_v6 }
 0x805   : > { %3902 = vmatpush.msrb.mxu0 %v3345_v34  ;;  %v4795_v55 = vpop.permute.xlu1 %4794 }
 0x806   : > { %v4797_v47 = vunpack.i.h.bf16 %v4795_v55  ;;  %v4796_v58 = vunpack.i.l.bf16 %v4795_v55 }
 0x808   : > { %v3313_v31 = vsel %vm7912_vm7, %v4672_v52, %v4796_v58  ;;  %v3314_v0 = vsel %vm7913_vm15, %v4796_v58, %v4797_v47 }
 0x809   : > { %3863 = vmatpush.msrb.mxu3 %v3313_v31  ;;  %3903 = vmatpush.msrb.mxu0 %v3314_v0 }
 0x80b   : > { %3864 = vmatpush.msrb.mxu3 %v3282_v18  ;;  %3904 = vmatpush.msrb.mxu0 %v3283_v5 }
 0x80d   : > { %3865 = vmatpush.msrb.mxu3 %v3253_v46  ;;  %3905 = vmatpush.msrb.mxu0 %v3254_v42 }
 0x80e   : > { %3866 = vmatmul.f32.vlgmr.msrb.gmra.mxu3 %v3236_v62  ;;  %3906 = vmatmul.f32.vlgmr.msrb.gmra.mxu0 %v3236_v62 }
 0x851   : > { %v2478_v26 = vpop.f32.mrf.mxu3 }
 0x852   : > { %v2479_v45 = vadd.f32 %v2478_v26, %v2437_v1 }
 0x854   : > { %v2482_v10 = vmax.f32 %v2479_v45, 0.0 }
 0x856   : > { %v3933_v35 = vadd.f32 %v2482_v10, %v1746_v13 }
 0x87b   : > { %v3887_v39 = vpop.f32.mrf.mxu2 }
 0x885   : > { %v3927_v61 = vpop.f32.mrf.mxu2 }
 0x88b   : > { %v3907_v2 = vpop.f32.mrf.mxu0 }
 0x88c   : > { %v3908_v27 = vadd.f32 %v3907_v2, %v3846_v14 }
 0x88e   : > { %v3928_v3 = vadd.f32 %v3927_v61, %v3908_v27 }
 0x890   : > { %v3931_v37 = vmax.f32 %v3928_v3, 0.0 }
 0x891   : > { %v3867_v29 = vpop.f32.mrf.mxu3 }
 0x892   : > { %v3935_v57 = vadd.f32 %v3933_v35, %v3931_v37  ;;  %v3868_v22 = vadd.f32 %v3867_v29, %v3845_v4 }
 0x894   : > { %v3888_v24 = vadd.f32 %v3887_v39, %v3868_v22  ;;  %3978 = vmatpush.msra.mxu2 %v3935_v57 }
 0x895   : > { %4137 = vmatmul.msk.f32.vlgmr.msra.gmra.mxu2 %vm7916_vm13, %v3936_v51 }
 0x896   : > { %v3930_v60 = vmax.f32 %v3888_v24, 0.0 }
 0x898   : > { %v3934_v54 = vadd.f32 %v7183_v36, %v3930_v60  ;;  %v7919_v36 = vld [vmem:[#allocation22_spill] sm:$0xff] }
 0x899   : > { %v7920_v17 = vmax.f32 %v7919_v36, 0.0 }
 0x89a   : > { %3958 = vmatpush.msra.mxu1 %v3934_v54 }
 0x89b   : > { %4136 = vmatmul.msk.f32.vlgmr.msra.gmra.mxu1 %vm7917_vm10, %v3936_v51 }
 0x918   : > { %v3960_v50 = vpop.f32.mrf.mxu1  ;;  %v3980_v20 = vpop.f32.mrf.mxu2 }
 0x919   : > { %v3961_v33 = vadd.f32 %v3960_v50, %v3938_v48  ;;  %v3981_v30 = vadd.f32 %v3980_v20, %v3939_v11 }
 0x91b   : > { %v3983_v15 = vmax.f32 %v3961_v33, 0.0  ;;  %v3984_v59 = vmax.f32 %v3981_v30, 0.0 }
 0x91d   : > { %v3985_v8 = vmul.f32 %v3983_v15, %v7920_v17  ;;  %v3986_v53 = vmul.f32 %v3984_v59, %v7922_v63 }
 0x91f   : > { %3987 = vst [vmem:[%s263_s7] sm:$0xff] %v3985_v8 }
 0x920   : > { %3988 = vst [vmem:[%s263_s7 + $0x8] sm:$0xff] %v3986_v53 }
 0x921   : > { %4950 = shalt.err (!%p4947_p11)
}
 0x922   : > { %4159 = dma.vmem_to_hbm [thread:$0]  (%p5180_p3), %s4004_s13, 256, %s4006_s24, %s3990_s19  }
 0x923 PF: > { %s4017_s29 = sand.u32 1, %s4985_s15   ;;  %p7923_p12 = scmp.ge.s32.totalorder %s4997_s18, 2 }
 0x924   : > { %s4018_s11 = scalar_lea.sflag [#allocation5], %s4017_s29 }
 0x925   : > { %p4176_p13 = pnand %p7923_p12, %p5133_p6 }
 0x927   : > { %p4177_p0 = pneg %p4176_p13 }
 0x929   : > { %4980 = dma.done.wait (%p4177_p0), %s4018_s11, 256  }
 0x92a   : > { %4982 = vsyncadd (%p4177_p0), %s4018_s11, 4294967040  ;;  %p19_p5 = scmp.ge.s32.totalorder %s5167_s23, 4   ;;  %s7924_s15 = smov %s4989_s16 }
 0x92b   : > { %s7925_s16 = smov %s4993_s17  ;;  %s7926_s17 = smov %s5176_s27 }
 0x92c   : > { %s7927_s18 = smov %s5167_s23  ;;  %21 = sbr.rel (!%p19_p5) target bundleno = 10 (0xa), region = 156 }
 0x931   :  { %4024 = vsyncpa [#allocation4], 1 }
 0x932   :  { %4026 = vsyncpa [#allocation4 + $0x1], 1 }
 0x933   :  { %4027 = vsyncpa [#allocation7], 1 }
 0x934   :  { %4028 = vsyncpa [#allocation10], 1 }
 0x935   :  { %4029 = vsyncpa [#allocation5], 1 }
 0x936   :  { %4031 = vsyncpa [#allocation5 + $0x1], 1 }

</bundles_post_ra>
